<compile_context>
chip_gen: v7x
topology: tpu7x:2x2x1
jax: 0.10.0
libtpu: 0.0.40
codegen_flags: <defaults>
</compile_context>

<pallas_src>
import functools

import jax
import jax.numpy as jnp
from jax import lax
from jax.experimental import pallas as pl
from jax.experimental.pallas import tpu as pltpu


def _conv_in_relu_kernel(x_ref, w_ref, o_ref, sum_ref, ssq_ref, *,
                         K, TH, Wo, Cin, Cout, stride, dilation, P_total, eps):
    # x_ref:   (Hp, Wp, Cin)    bf16 padded NHWC image for this batch element
    #                           (block index depends only on n -> resident).
    # w_ref:   (K*K, Cin, Cout) bf16 conv weights, one (Cin, Cout) slab per tap.
    # o_ref:   (Cout, TH*Wo)    f32 output tile; spatial on the 128-lane axis.
    # sum_ref: (Cout, 1) f32    running per-channel sum        (VMEM scratch)
    # ssq_ref: (Cout, 1) f32    running per-channel sum(x^2)   (VMEM scratch)
    pass_idx = pl.program_id(1)   # 0: stats pass, 1: normalize + store pass
    tile_idx = pl.program_id(2)   # spatial row-tile index

    @pl.when(jnp.logical_and(pass_idx == 0, tile_idx == 0))
    def _init():
        sum_ref[...] = jnp.zeros_like(sum_ref)
        ssq_ref[...] = jnp.zeros_like(ssq_ref)

    Pt = TH * Wo
    row0 = pl.multiple_of(tile_idx * (TH * stride), TH * stride)

    # Shift-and-accumulate conv: K*K bf16 MXU matmuls into an f32 accumulator.
    acc = jnp.zeros((Pt, Cout), dtype=jnp.float32)
    for ky in range(K):
        for kx in range(K):
            rs = row0 + ky * dilation
            cs = kx * dilation
            if stride == 1:
                xs = x_ref[pl.ds(rs, TH), pl.ds(cs, Wo), :]
            else:
                xs = x_ref[pl.ds(rs, TH, stride), pl.ds(cs, Wo, stride), :]
            xs = xs.reshape(Pt, Cin)               # lane dim (Cin) unchanged
            acc = acc + jnp.dot(xs, w_ref[ky * K + kx],
                                preferred_element_type=jnp.float32)

    # Single f32 transpose per tile -> lane-dense (Cout, Pt) layout for the
    # stats reduction (lane-axis reduce), the epilogue VPU work and the store.
    acc_t = acc.T                                  # (Cout, Pt)

    @pl.when(pass_idx == 0)
    def _stats():
        sum_ref[...] += jnp.sum(acc_t, axis=1, keepdims=True)
        ssq_ref[...] += jnp.sum(acc_t * acc_t, axis=1, keepdims=True)

    @pl.when(pass_idx == 1)
    def _normalize():
        inv_n = 1.0 / float(P_total)
        mean = sum_ref[...] * inv_n                          # (Cout, 1)
        var = jnp.maximum(ssq_ref[...] * inv_n - mean * mean, 0.0)
        y = (acc_t - mean) * lax.rsqrt(var + eps)            # InstanceNorm2d
        o_ref[...] = jnp.maximum(y, 0.0).astype(o_ref.dtype)  # ReLU


def _pick_tile_rows(Ho, Wo, target_positions=2048):
    """Largest row-tile TH dividing Ho with TH*Wo a multiple of 128 and at most
    ~target_positions spatial positions; falls back to the full image."""
    for th in range(Ho, 0, -1):
        if Ho % th:
            continue
        pt = th * Wo
        if pt <= target_positions and pt % 128 == 0:
            return th
    return Ho


def conv2d_block_forward(x, weight, bias=None, *, kernel_size, stride=1,
                         padding=0, dilation=1, eps=1e-5):
    """x: (N, Cin, H, W) f32; weight: (Cout, Cin, K, K); bias ignored (it is a
    mathematical no-op: InstanceNorm2d(affine=False) subtracts the per-channel
    mean, which cancels a per-channel conv bias exactly).
    Returns (N, Cout, H_out, W_out) f32."""
    del bias
    N, Cin, H, W = x.shape
    Cout = int(weight.shape[0])
    K = int(kernel_size)

    # ReflectionPad2d (glue).
    if padding > 0:
        x = jnp.pad(x, ((0, 0), (0, 0), (padding, padding), (padding, padding)),
                    mode="reflect")
    Hp, Wp = int(x.shape[2]), int(x.shape[3])
    eff_k = dilation * (K - 1) + 1
    Ho = (Hp - eff_k) // stride + 1
    Wo = (Wp - eff_k) // stride + 1
    P = Ho * Wo

    # Layout prep (1x traffic, no im2col blow-up): NCHW -> NHWC, bf16 for MXU.
    x_nhwc = jnp.transpose(x, (0, 2, 3, 1)).astype(jnp.bfloat16)
    # (Cout, Cin, K, K) -> (K*K, Cin, Cout): one (Cin, Cout) matmul slab per tap.
    w_taps = jnp.transpose(weight, (2, 3, 1, 0)).reshape(K * K, Cin, Cout)
    w_taps = w_taps.astype(jnp.bfloat16)

    TH = _pick_tile_rows(Ho, Wo)
    T = Ho // TH
    Pt = TH * Wo

    kernel = functools.partial(
        _conv_in_relu_kernel, K=K, TH=TH, Wo=Wo, Cin=Cin, Cout=Cout,
        stride=stride, dilation=dilation, P_total=P, eps=eps)

    # VMEM budget: resident bf16 image + double-buffered weights/output tile +
    # f32 accumulator temporaries, clamped under v7x's 64 MiB physical VMEM.
    x_bytes = Hp * Wp * Cin * 2
    w_bytes = K * K * Cin * Cout * 2
    o_bytes = Cout * Pt * 4
    acc_bytes = Pt * Cout * 4
    need = 2 * x_bytes + 2 * w_bytes + 2 * o_bytes + 8 * acc_bytes + (2 << 20)
    vmem_limit = int(min(max(2 * need, 32 << 20), 56 << 20))

    cost = pl.CostEstimate(
        flops=int(2 * 2 * N * P * K * K * Cin * Cout),   # conv computed twice
        transcendentals=int(N * Cout * T),
        bytes_accessed=int(N * x_bytes + w_bytes + N * Cout * P * 4))

    out = pl.pallas_call(
        kernel,
        out_shape=jax.ShapeDtypeStruct((N, Cout, P), jnp.float32),
        grid_spec=pltpu.PrefetchScalarGridSpec(
            num_scalar_prefetch=0,
            grid=(N, 2, T),                      # (batch, IN pass, row tile)
            in_specs=[
                # Whole padded image per batch element; block index constant
                # across (pass, tile) -> DMA'd from HBM exactly once per n.
                pl.BlockSpec((None, Hp, Wp, Cin), lambda n, p, t: (n, 0, 0, 0)),
                pl.BlockSpec((K * K, Cin, Cout), lambda n, p, t: (0, 0, 0)),
            ],
            # Pass 0 parks on block 0 (never written), pass 1 walks the row
            # tiles -> every output block hits HBM exactly once, with data.
            out_specs=pl.BlockSpec((None, Cout, Pt),
                                   lambda n, p, t: (n, 0, t * p)),
            scratch_shapes=[pltpu.VMEM((Cout, 1), jnp.float32),
                            pltpu.VMEM((Cout, 1), jnp.float32)],
        ),
        compiler_params=pltpu.CompilerParams(
            dimension_semantics=("parallel", "arbitrary", "arbitrary"),
            vmem_limit_bytes=vmem_limit),
        cost_estimate=cost,
    )(x_nhwc, w_taps)

    # (N, Cout, P) -> (N, Cout, Ho, Wo): pure reshape, no transpose round-trip.
    return out.reshape(N, Cout, Ho, Wo)


def _reference(x, weight, bias, *, kernel_size, stride, padding, dilation,
               eps=1e-5):
    # Pure-JAX reference (includes the bias, to demonstrate that dropping it in
    # the kernel is exact up to fp noise).
    if padding > 0:
        x = jnp.pad(x, ((0, 0), (0, 0), (padding, padding), (padding, padding)),
                    mode="reflect")
    y = lax.conv_general_dilated(
        x, weight, window_strides=(stride, stride), padding="VALID",
        rhs_dilation=(dilation, dilation),
        dimension_numbers=("NCHW", "OIHW", "NCHW"))
    y = y + bias.reshape(1, -1, 1, 1)
    mean = jnp.mean(y, axis=(2, 3), keepdims=True)
    var = jnp.mean((y - mean) ** 2, axis=(2, 3), keepdims=True)
    y = (y - mean) / jnp.sqrt(var + eps)
    return jnp.maximum(y, 0.0)


if __name__ == "__main__":
    # Small shapes consistent with the module.
    N, Cin, H, W = 2, 4, 16, 16
    Cout, K, stride, padding, dilation = 8, 3, 1, 1, 1

    key = jax.random.PRNGKey(0)
    k_x, k_w, k_b = jax.random.split(key, 3)
    x = jax.random.normal(k_x, (N, Cin, H, W), dtype=jnp.float32)
    fan_in = Cin * K * K
    weight = jax.random.normal(k_w, (Cout, Cin, K, K),
                               dtype=jnp.float32) / jnp.sqrt(fan_in)
    bias = jax.random.normal(k_b, (Cout,), dtype=jnp.float32) * 0.1

    out = conv2d_block_forward(x, weight, bias, kernel_size=K, stride=stride,
                               padding=padding, dilation=dilation)
    out = jax.block_until_ready(out)

    # Reference on the same bf16-rounded inputs the kernel's MXU path consumes
    # (bias included in the reference; the kernel drops it -> must still match).
    x_q = x.astype(jnp.bfloat16).astype(jnp.float32)
    w_q = weight.astype(jnp.bfloat16).astype(jnp.float32)
    ref = _reference(x_q, w_q, bias, kernel_size=K, stride=stride,
                     padding=padding, dilation=dilation)

    assert out.shape == (N, Cout, H, W), out.shape
    max_err = float(jnp.max(jnp.abs(out - ref)))
    assert jnp.allclose(out, ref, atol=2e-3, rtol=2e-3), max_err

    print("KERNEL_OK")
</pallas_src>

<mosaic_0001>
module attributes {stable_mosaic.version = 11 : i64} {
  func.func @_conv_in_relu_kernel(%arg0: i32, %arg1: i32, %arg2: i32, %arg3: memref<1x18x18x4xbf16, #tpu.memory_space<vmem>>, %arg4: memref<9x4x8xbf16, #tpu.memory_space<vmem>>, %arg5: memref<1x8x256xf32, #tpu.memory_space<vmem>>, %arg6: memref<8x1xf32, #tpu.memory_space<vmem>>, %arg7: memref<8x1xf32, #tpu.memory_space<vmem>>) attributes {dimension_semantics = [#tpu.dimension_semantics<parallel>, #tpu.dimension_semantics<arbitrary>, #tpu.dimension_semantics<arbitrary>], iteration_bounds = array<i64: 2, 2, 1>, scalar_prefetch = 0 : i64, scratch_operands = 2 : i64, tpu.core_type = #tpu.core_type<tc>, window_params = [{transform_indices = @transform_0, window_bounds = array<i64: 1, 18, 18, 4>}, {pipeline_mode = #tpu.pipeline_mode<synchronous>, transform_indices = @transform_1, window_bounds = array<i64: 9, 4, 8>}, {transform_indices = @transform_2, window_bounds = array<i64: 1, 8, 256>}]} {
    %c0_i32 = arith.constant 0 : i32
    %0 = arith.cmpi eq, %arg1, %c0_i32 : i32
    %c0_i32_0 = arith.constant 0 : i32
    %1 = arith.cmpi eq, %arg2, %c0_i32_0 : i32
    %2 = arith.andi %0, %1 : i1
    %3 = arith.extui %2 : i1 to i32
    %c0_i32_1 = arith.constant 0 : i32
    %4 = arith.cmpi ne, %3, %c0_i32_1 : i32
    scf.if %4 {
      %cst_67 = arith.constant 0.000000e+00 : f32
      %96 = vector.broadcast %cst_67 : f32 to vector<8x1xf32>
      %c0_68 = arith.constant 0 : index
      %c0_69 = arith.constant 0 : index
      %97 = vector.load %arg6[%c0_68, %c0_69] : memref<8x1xf32, #tpu.memory_space<vmem>>, vector<8x1xf32>
      tpu.vector_store %arg6[%c0_68, %c0_69], %96 {strides = array<i32>} : memref<8x1xf32, #tpu.memory_space<vmem>>, vector<8x1xf32>,
      %cst_70 = arith.constant 0.000000e+00 : f32
      %98 = vector.broadcast %cst_70 : f32 to vector<8x1xf32>
      %c0_71 = arith.constant 0 : index
      %c0_72 = arith.constant 0 : index
      %99 = vector.load %arg7[%c0_71, %c0_72] : memref<8x1xf32, #tpu.memory_space<vmem>>, vector<8x1xf32>
      tpu.vector_store %arg7[%c0_71, %c0_72], %98 {strides = array<i32>} : memref<8x1xf32, #tpu.memory_space<vmem>>, vector<8x1xf32>,
    } else {
    }
    %c16_i32 = arith.constant 16 : i32
    %5 = arith.muli %arg2, %c16_i32 : i32
    %6 = tpu.assume_multiple %5, 16 : i32
    %cst = arith.constant 0.000000e+00 : f32
    %7 = vector.broadcast %cst : f32 to vector<256x8xf32>
    %c0_i32_2 = arith.constant 0 : i32
    %8 = arith.addi %6, %c0_i32_2 : i32
    %c0 = arith.constant 0 : index
    %9 = arith.index_cast %8 : i32 to index
    %c0_3 = arith.constant 0 : index
    %c0_4 = arith.constant 0 : index
    %10 = vector.load %arg3[%c0, %9, %c0_3, %c0_4] : memref<1x18x18x4xbf16, #tpu.memory_space<vmem>>, vector<1x16x16x4xbf16>
    %11 = vector.shape_cast %10 : vector<1x16x16x4xbf16> to vector<16x16x4xbf16>
    %12 = vector.shape_cast %11 : vector<16x16x4xbf16> to vector<256x4xbf16>
    %c0_5 = arith.constant 0 : index
    %c0_6 = arith.constant 0 : index
    %c0_7 = arith.constant 0 : index
    %13 = vector.load %arg4[%c0_5, %c0_6, %c0_7] : memref<9x4x8xbf16, #tpu.memory_space<vmem>>, vector<1x4x8xbf16>
    %14 = vector.shape_cast %13 : vector<1x4x8xbf16> to vector<4x8xbf16>
    %cst_8 = arith.constant dense<0.000000e+00> : vector<256x8xf32>
    %15 = tpu.matmul %12, %14, %cst_8 {dimension_numbers = #tpu.dot_dimension_numbers<[1], [0], [0], [1], [0, 0, 1, 1], [], []>} : vector<256x4xbf16>, vector<4x8xbf16>, vector<256x8xf32> -> vector<256x8xf32>
    %16 = arith.addf %7, %15 : vector<256x8xf32>
    %c0_i32_9 = arith.constant 0 : i32
    %17 = arith.addi %6, %c0_i32_9 : i32
    %c0_10 = arith.constant 0 : index
    %18 = arith.index_cast %17 : i32 to index
    %c1 = arith.constant 1 : index
    %c0_11 = arith.constant 0 : index
    %19 = vector.load %arg3[%c0_10, %18, %c1, %c0_11] : memref<1x18x18x4xbf16, #tpu.memory_space<vmem>>, vector<1x16x16x4xbf16>
    %20 = vector.shape_cast %19 : vector<1x16x16x4xbf16> to vector<16x16x4xbf16>
    %21 = vector.shape_cast %20 : vector<16x16x4xbf16> to vector<256x4xbf16>
    %c1_12 = arith.constant 1 : index
    %c0_13 = arith.constant 0 : index
    %c0_14 = arith.constant 0 : index
    %22 = vector.load %arg4[%c1_12, %c0_13, %c0_14] : memref<9x4x8xbf16, #tpu.memory_space<vmem>>, vector<1x4x8xbf16>
    %23 = vector.shape_cast %22 : vector<1x4x8xbf16> to vector<4x8xbf16>
    %cst_15 = arith.constant dense<0.000000e+00> : vector<256x8xf32>
    %24 = tpu.matmul %21, %23, %cst_15 {dimension_numbers = #tpu.dot_dimension_numbers<[1], [0], [0], [1], [0, 0, 1, 1], [], []>} : vector<256x4xbf16>, vector<4x8xbf16>, vector<256x8xf32> -> vector<256x8xf32>
    %25 = arith.addf %16, %24 : vector<256x8xf32>
    %c0_i32_16 = arith.constant 0 : i32
    %26 = arith.addi %6, %c0_i32_16 : i32
    %c0_17 = arith.constant 0 : index
    %27 = arith.index_cast %26 : i32 to index
    %c2 = arith.constant 2 : index
    %c0_18 = arith.constant 0 : index
    %28 = vector.load %arg3[%c0_17, %27, %c2, %c0_18] : memref<1x18x18x4xbf16, #tpu.memory_space<vmem>>, vector<1x16x16x4xbf16>
    %29 = vector.shape_cast %28 : vector<1x16x16x4xbf16> to vector<16x16x4xbf16>
    %30 = vector.shape_cast %29 : vector<16x16x4xbf16> to vector<256x4xbf16>
    %c2_19 = arith.constant 2 : index
    %c0_20 = arith.constant 0 : index
    %c0_21 = arith.constant 0 : index
    %31 = vector.load %arg4[%c2_19, %c0_20, %c0_21] : memref<9x4x8xbf16, #tpu.memory_space<vmem>>, vector<1x4x8xbf16>
    %32 = vector.shape_cast %31 : vector<1x4x8xbf16> to vector<4x8xbf16>
    %cst_22 = arith.constant dense<0.000000e+00> : vector<256x8xf32>
    %33 = tpu.matmul %30, %32, %cst_22 {dimension_numbers = #tpu.dot_dimension_numbers<[1], [0], [0], [1], [0, 0, 1, 1], [], []>} : vector<256x4xbf16>, vector<4x8xbf16>, vector<256x8xf32> -> vector<256x8xf32>
    %34 = arith.addf %25, %33 : vector<256x8xf32>
    %c1_i32 = arith.constant 1 : i32
    %35 = arith.addi %6, %c1_i32 : i32
    %c0_23 = arith.constant 0 : index
    %36 = arith.index_cast %35 : i32 to index
    %c0_24 = arith.constant 0 : index
    %c0_25 = arith.constant 0 : index
    %37 = vector.load %arg3[%c0_23, %36, %c0_24, %c0_25] : memref<1x18x18x4xbf16, #tpu.memory_space<vmem>>, vector<1x16x16x4xbf16>
    %38 = vector.shape_cast %37 : vector<1x16x16x4xbf16> to vector<16x16x4xbf16>
    %39 = vector.shape_cast %38 : vector<16x16x4xbf16> to vector<256x4xbf16>
    %c3 = arith.constant 3 : index
    %c0_26 = arith.constant 0 : index
    %c0_27 = arith.constant 0 : index
    %40 = vector.load %arg4[%c3, %c0_26, %c0_27] : memref<9x4x8xbf16, #tpu.memory_space<vmem>>, vector<1x4x8xbf16>
    %41 = vector.shape_cast %40 : vector<1x4x8xbf16> to vector<4x8xbf16>
    %cst_28 = arith.constant dense<0.000000e+00> : vector<256x8xf32>
    %42 = tpu.matmul %39, %41, %cst_28 {dimension_numbers = #tpu.dot_dimension_numbers<[1], [0], [0], [1], [0, 0, 1, 1], [], []>} : vector<256x4xbf16>, vector<4x8xbf16>, vector<256x8xf32> -> vector<256x8xf32>
    %43 = arith.addf %34, %42 : vector<256x8xf32>
    %c1_i32_29 = arith.constant 1 : i32
    %44 = arith.addi %6, %c1_i32_29 : i32
    %c0_30 = arith.constant 0 : index
    %45 = arith.index_cast %44 : i32 to index
    %c1_31 = arith.constant 1 : index
    %c0_32 = arith.constant 0 : index
    %46 = vector.load %arg3[%c0_30, %45, %c1_31, %c0_32] : memref<1x18x18x4xbf16, #tpu.memory_space<vmem>>, vector<1x16x16x4xbf16>
    %47 = vector.shape_cast %46 : vector<1x16x16x4xbf16> to vector<16x16x4xbf16>
    %48 = vector.shape_cast %47 : vector<16x16x4xbf16> to vector<256x4xbf16>
    %c4 = arith.constant 4 : index
    %c0_33 = arith.constant 0 : index
    %c0_34 = arith.constant 0 : index
    %49 = vector.load %arg4[%c4, %c0_33, %c0_34] : memref<9x4x8xbf16, #tpu.memory_space<vmem>>, vector<1x4x8xbf16>
    %50 = vector.shape_cast %49 : vector<1x4x8xbf16> to vector<4x8xbf16>
    %cst_35 = arith.constant dense<0.000000e+00> : vector<256x8xf32>
    %51 = tpu.matmul %48, %50, %cst_35 {dimension_numbers = #tpu.dot_dimension_numbers<[1], [0], [0], [1], [0, 0, 1, 1], [], []>} : vector<256x4xbf16>, vector<4x8xbf16>, vector<256x8xf32> -> vector<256x8xf32>
    %52 = arith.addf %43, %51 : vector<256x8xf32>
    %c1_i32_36 = arith.constant 1 : i32
    %53 = arith.addi %6, %c1_i32_36 : i32
    %c0_37 = arith.constant 0 : index
    %54 = arith.index_cast %53 : i32 to index
    %c2_38 = arith.constant 2 : index
    %c0_39 = arith.constant 0 : index
    %55 = vector.load %arg3[%c0_37, %54, %c2_38, %c0_39] : memref<1x18x18x4xbf16, #tpu.memory_space<vmem>>, vector<1x16x16x4xbf16>
    %56 = vector.shape_cast %55 : vector<1x16x16x4xbf16> to vector<16x16x4xbf16>
    %57 = vector.shape_cast %56 : vector<16x16x4xbf16> to vector<256x4xbf16>
    %c5 = arith.constant 5 : index
    %c0_40 = arith.constant 0 : index
    %c0_41 = arith.constant 0 : index
    %58 = vector.load %arg4[%c5, %c0_40, %c0_41] : memref<9x4x8xbf16, #tpu.memory_space<vmem>>, vector<1x4x8xbf16>
    %59 = vector.shape_cast %58 : vector<1x4x8xbf16> to vector<4x8xbf16>
    %cst_42 = arith.constant dense<0.000000e+00> : vector<256x8xf32>
    %60 = tpu.matmul %57, %59, %cst_42 {dimension_numbers = #tpu.dot_dimension_numbers<[1], [0], [0], [1], [0, 0, 1, 1], [], []>} : vector<256x4xbf16>, vector<4x8xbf16>, vector<256x8xf32> -> vector<256x8xf32>
    %61 = arith.addf %52, %60 : vector<256x8xf32>
    %c2_i32 = arith.constant 2 : i32
    %62 = arith.addi %6, %c2_i32 : i32
    %c0_43 = arith.constant 0 : index
    %63 = arith.index_cast %62 : i32 to index
    %c0_44 = arith.constant 0 : index
    %c0_45 = arith.constant 0 : index
    %64 = vector.load %arg3[%c0_43, %63, %c0_44, %c0_45] : memref<1x18x18x4xbf16, #tpu.memory_space<vmem>>, vector<1x16x16x4xbf16>
    %65 = vector.shape_cast %64 : vector<1x16x16x4xbf16> to vector<16x16x4xbf16>
    %66 = vector.shape_cast %65 : vector<16x16x4xbf16> to vector<256x4xbf16>
    %c6 = arith.constant 6 : index
    %c0_46 = arith.constant 0 : index
    %c0_47 = arith.constant 0 : index
    %67 = vector.load %arg4[%c6, %c0_46, %c0_47] : memref<9x4x8xbf16, #tpu.memory_space<vmem>>, vector<1x4x8xbf16>
    %68 = vector.shape_cast %67 : vector<1x4x8xbf16> to vector<4x8xbf16>
    %cst_48 = arith.constant dense<0.000000e+00> : vector<256x8xf32>
    %69 = tpu.matmul %66, %68, %cst_48 {dimension_numbers = #tpu.dot_dimension_numbers<[1], [0], [0], [1], [0, 0, 1, 1], [], []>} : vector<256x4xbf16>, vector<4x8xbf16>, vector<256x8xf32> -> vector<256x8xf32>
    %70 = arith.addf %61, %69 : vector<256x8xf32>
    %c2_i32_49 = arith.constant 2 : i32
    %71 = arith.addi %6, %c2_i32_49 : i32
    %c0_50 = arith.constant 0 : index
    %72 = arith.index_cast %71 : i32 to index
    %c1_51 = arith.constant 1 : index
    %c0_52 = arith.constant 0 : index
    %73 = vector.load %arg3[%c0_50, %72, %c1_51, %c0_52] : memref<1x18x18x4xbf16, #tpu.memory_space<vmem>>, vector<1x16x16x4xbf16>
    %74 = vector.shape_cast %73 : vector<1x16x16x4xbf16> to vector<16x16x4xbf16>
    %75 = vector.shape_cast %74 : vector<16x16x4xbf16> to vector<256x4xbf16>
    %c7 = arith.constant 7 : index
    %c0_53 = arith.constant 0 : index
    %c0_54 = arith.constant 0 : index
    %76 = vector.load %arg4[%c7, %c0_53, %c0_54] : memref<9x4x8xbf16, #tpu.memory_space<vmem>>, vector<1x4x8xbf16>
    %77 = vector.shape_cast %76 : vector<1x4x8xbf16> to vector<4x8xbf16>
    %cst_55 = arith.constant dense<0.000000e+00> : vector<256x8xf32>
    %78 = tpu.matmul %75, %77, %cst_55 {dimension_numbers = #tpu.dot_dimension_numbers<[1], [0], [0], [1], [0, 0, 1, 1], [], []>} : vector<256x4xbf16>, vector<4x8xbf16>, vector<256x8xf32> -> vector<256x8xf32>
    %79 = arith.addf %70, %78 : vector<256x8xf32>
    %c2_i32_56 = arith.constant 2 : i32
    %80 = arith.addi %6, %c2_i32_56 : i32
    %c0_57 = arith.constant 0 : index
    %81 = arith.index_cast %80 : i32 to index
    %c2_58 = arith.constant 2 : index
    %c0_59 = arith.constant 0 : index
    %82 = vector.load %arg3[%c0_57, %81, %c2_58, %c0_59] : memref<1x18x18x4xbf16, #tpu.memory_space<vmem>>, vector<1x16x16x4xbf16>
    %83 = vector.shape_cast %82 : vector<1x16x16x4xbf16> to vector<16x16x4xbf16>
    %84 = vector.shape_cast %83 : vector<16x16x4xbf16> to vector<256x4xbf16>
    %c8 = arith.constant 8 : index
    %c0_60 = arith.constant 0 : index
    %c0_61 = arith.constant 0 : index
    %85 = vector.load %arg4[%c8, %c0_60, %c0_61] : memref<9x4x8xbf16, #tpu.memory_space<vmem>>, vector<1x4x8xbf16>
    %86 = vector.shape_cast %85 : vector<1x4x8xbf16> to vector<4x8xbf16>
    %cst_62 = arith.constant dense<0.000000e+00> : vector<256x8xf32>
    %87 = tpu.matmul %84, %86, %cst_62 {dimension_numbers = #tpu.dot_dimension_numbers<[1], [0], [0], [1], [0, 0, 1, 1], [], []>} : vector<256x4xbf16>, vector<4x8xbf16>, vector<256x8xf32> -> vector<256x8xf32>
    %88 = arith.addf %79, %87 : vector<256x8xf32>
    %89 = tpu.transpose %88, [1, 0] : vector<256x8xf32> -> vector<8x256xf32>
    %c0_i32_63 = arith.constant 0 : i32
    %90 = arith.cmpi eq, %arg1, %c0_i32_63 : i32
    %91 = arith.extui %90 : i1 to i32
    %c0_i32_64 = arith.constant 0 : i32
    %92 = arith.cmpi ne, %91, %c0_i32_64 : i32
    scf.if %92 {
      %c0_67 = arith.constant 0 : index
      %c0_68 = arith.constant 0 : index
      %96 = vector.load %arg6[%c0_67, %c0_68] : memref<8x1xf32, #tpu.memory_space<vmem>>, vector<8x1xf32>
      %cst_69 = arith.constant dense<0.000000e+00> : vector<8xf32>
      %97 = vector.multi_reduction <add>, %89, %cst_69 [1] : vector<8x256xf32> to vector<8xf32>
      %98 = vector.shape_cast %97 : vector<8xf32> to vector<8x1xf32>
      %99 = arith.addf %96, %98 : vector<8x1xf32>
      %c0_70 = arith.constant 0 : index
      %c0_71 = arith.constant 0 : index
      %100 = vector.load %arg6[%c0_70, %c0_71] : memref<8x1xf32, #tpu.memory_space<vmem>>, vector<8x1xf32>
      tpu.vector_store %arg6[%c0_70, %c0_71], %99 {strides = array<i32>} : memref<8x1xf32, #tpu.memory_space<vmem>>, vector<8x1xf32>,
      %c0_72 = arith.constant 0 : index
      %c0_73 = arith.constant 0 : index
      %101 = vector.load %arg7[%c0_72, %c0_73] : memref<8x1xf32, #tpu.memory_space<vmem>>, vector<8x1xf32>
      %102 = arith.mulf %89, %89 : vector<8x256xf32>
      %cst_74 = arith.constant dense<0.000000e+00> : vector<8xf32>
      %103 = vector.multi_reduction <add>, %102, %cst_74 [1] : vector<8x256xf32> to vector<8xf32>
      %104 = vector.shape_cast %103 : vector<8xf32> to vector<8x1xf32>
      %105 = arith.addf %101, %104 : vector<8x1xf32>
      %c0_75 = arith.constant 0 : index
      %c0_76 = arith.constant 0 : index
      %106 = vector.load %arg7[%c0_75, %c0_76] : memref<8x1xf32, #tpu.memory_space<vmem>>, vector<8x1xf32>
      tpu.vector_store %arg7[%c0_75, %c0_76], %105 {strides = array<i32>} : memref<8x1xf32, #tpu.memory_space<vmem>>, vector<8x1xf32>,
    } else {
    }
    %c1_i32_65 = arith.constant 1 : i32
    %93 = arith.cmpi eq, %arg1, %c1_i32_65 : i32
    %94 = arith.extui %93 : i1 to i32
    %c0_i32_66 = arith.constant 0 : i32
    %95 = arith.cmpi ne, %94, %c0_i32_66 : i32
    scf.if %95 {
      %c0_67 = arith.constant 0 : index
      %c0_68 = arith.constant 0 : index
      %96 = vector.load %arg6[%c0_67, %c0_68] : memref<8x1xf32, #tpu.memory_space<vmem>>, vector<8x1xf32>
      %cst_69 = arith.constant 3.906250e-03 : f32
      %97 = vector.broadcast %cst_69 : f32 to vector<8x1xf32>
      %98 = arith.mulf %96, %97 : vector<8x1xf32>
      %c0_70 = arith.constant 0 : index
      %c0_71 = arith.constant 0 : index
      %99 = vector.load %arg7[%c0_70, %c0_71] : memref<8x1xf32, #tpu.memory_space<vmem>>, vector<8x1xf32>
      %cst_72 = arith.constant 3.906250e-03 : f32
      %100 = vector.broadcast %cst_72 : f32 to vector<8x1xf32>
      %101 = arith.mulf %99, %100 : vector<8x1xf32>
      %102 = arith.mulf %98, %98 : vector<8x1xf32>
      %103 = arith.subf %101, %102 : vector<8x1xf32>
      %cst_73 = arith.constant 0.000000e+00 : f32
      %104 = vector.broadcast %cst_73 : f32 to vector<8x1xf32>
      %105 = arith.maximumf %103, %104 : vector<8x1xf32>
      %106 = vector.broadcast %98 : vector<8x1xf32> to vector<8x256xf32>
      %107 = arith.subf %89, %106 : vector<8x256xf32>
      %cst_74 = arith.constant 9.99999974E-6 : f32
      %108 = vector.broadcast %cst_74 : f32 to vector<8x1xf32>
      %109 = arith.addf %105, %108 : vector<8x1xf32>
      %110 = math.rsqrt %109 : vector<8x1xf32>
      %111 = vector.broadcast %110 : vector<8x1xf32> to vector<8x256xf32>
      %112 = arith.mulf %107, %111 : vector<8x256xf32>
      %cst_75 = arith.constant 0.000000e+00 : f32
      %113 = vector.broadcast %cst_75 : f32 to vector<8x256xf32>
      %114 = arith.maximumf %112, %113 : vector<8x256xf32>
      %c0_76 = arith.constant 0 : index
      %c0_77 = arith.constant 0 : index
      %c0_78 = arith.constant 0 : index
      %115 = vector.load %arg5[%c0_76, %c0_77, %c0_78] : memref<1x8x256xf32, #tpu.memory_space<vmem>>, vector<1x8x256xf32>
      %116 = vector.shape_cast %115 : vector<1x8x256xf32> to vector<8x256xf32>
      %117 = vector.shape_cast %114 : vector<8x256xf32> to vector<1x8x256xf32>
      tpu.vector_store %arg5[%c0_76, %c0_77, %c0_78], %117 {strides = array<i32>} : memref<1x8x256xf32, #tpu.memory_space<vmem>>, vector<1x8x256xf32>,
    } else {
    }
    return
  }
  func.func @transform_0(%arg0: i32, %arg1: i32, %arg2: i32) -> (i32, i32, i32, i32) {
    %c0_i32 = arith.constant 0 : i32
    %c0_i32_0 = arith.constant 0 : i32
    %c0_i32_1 = arith.constant 0 : i32
    %c0_i32_2 = arith.constant 0 : i32
    return %arg0, %c0_i32, %c0_i32_0, %c0_i32_1 : i32, i32, i32, i32
  }
  func.func @transform_1(%arg0: i32, %arg1: i32, %arg2: i32) -> (i32, i32, i32) {
    %c0_i32 = arith.constant 0 : i32
    %c0_i32_0 = arith.constant 0 : i32
    %c0_i32_1 = arith.constant 0 : i32
    %c0_i32_2 = arith.constant 0 : i32
    return %c0_i32, %c0_i32_0, %c0_i32_1 : i32, i32, i32
  }
  func.func @transform_2(%arg0: i32, %arg1: i32, %arg2: i32) -> (i32, i32, i32) {
    %0 = arith.muli %arg2, %arg1 : i32
    %c0_i32 = arith.constant 0 : i32
    %c0_i32_0 = arith.constant 0 : i32
    return %arg0, %c0_i32, %0 : i32, i32, i32
  }
}

</mosaic_0001>

<bundles_post_ra>
// kernel: tpu_custom_call.1
= control target key start
LH: loop header
LB: loop body
LE: loop exit
PB: predicated region body
PF: predicated region fallthrough
CT: control target
= control target key end

     0   :  { %7 = vsyncpa [#allocation5], 0  ;;  %s8380_s0 = inlined_call_operand.vmem [shape: bf16[2,18,18,4], index: 0, kind: input, shape index: {}]   ;;  %s8381_s1 = inlined_call_operand.vmem [shape: bf16[9,4,8], index: 1, kind: input, shape index: {}]   ;;  %s8382_s2 = inlined_call_operand.hbm [shape: f32[2,8,256], index: 2, kind: output, shape index: {}]  }
   0x1   :  { %9 = vsyncpa [#allocation5 + $0x1], 0  ;;  %s6538_s9 = smov 0   ;;  %s6540_s10 = smov 0  }
   0x2   :  { %s6542_s11 = smov 0   ;;  %s6544_s12 = smov 0  }
   0x3   :  { %s6546_s13 = smov 0   ;;  %s6548_s14 = smov 0  }
   0x4   :  { %s6550_s15 = smov 0   ;;  %s6552_s16 = smov 0  }
   0x5 LB: > { %s4963_s17 = sadd.s32 4294967295, %s6518_s16   ;;  %s4964_s18 = sadd.s32 4294967294, %s6518_s16   ;;  %s6518_s16 = sphi %s6552_s16, %s15_s16   ;;  %s6514_s15 = sphi %s6550_s15, %s8454_s15   ;;  %s6510_s14 = sphi %s6548_s14, %s8453_s14   ;;  %s6506_s13 = sphi %s6546_s13, %s8452_s13   ;;  %s6502_s12 = sphi %s6544_s12, %s8451_s12   ;;  %s6498_s11 = sphi %s6542_s11, %s8450_s11   ;;  %s6494_s10 = sphi %s6540_s10, %s8449_s10   ;;  %s6490_s9 = sphi %s6538_s9, %s8448_s9  }
   0x6   : > { %s30_s19 = sadd.s32 1, %s6510_s14  ;;  %s34_s20 = sadd.s32 1, %s6514_s15 }
   0x7   : > { %p32_p0 = scmp.ge.s32.totalorder %s30_s19, 2  ;;  %p102_p1 = scmp.ne.s32.totalorder %s6498_s11, %s6494_s10 }
   0x8   : > { %p103_p2 = scmp.eq.s32.totalorder %s4963_s17, 3  ;;  %p108_p4 = scmp.ne.s32.totalorder %s6494_s10, %s6490_s9 }
   0x9   : > { %s8456_s19 = smov (%p32_p0, %s30_s19), 0  ;;  %s8458_s20 = smov (!%p32_p0, %s34_s20), %s6514_s15 }
   0xa   : > { %p6587_p3 = por %p103_p2, %p102_p1  ;;  %p36_p5 = scmp.ge.s32.totalorder %s8458_s20, 2 }
   0xb   : > { %p109_p6 = scmp.eq.s32.totalorder %s4964_s18, 3  ;;  %p4967_p7 = scmp.ge.s32.totalorder %s6518_s16, 1 }
   0xc   : > { %p138_p8 = scmp.lt.s32.totalorder %s6518_s16, 5  ;;  %s8460_s20 = smov (%p36_p5, %s8458_s20), 0 }
   0xd   : > { %p6597_p9 = por %p109_p6, %p108_p4  ;;  %s87_s23 = ssub.s32 %s6514_s15, %s8460_s20 }
   0xe   : > { %p139_p10 = pnand %p4967_p7, %p138_p8  ;;  %s92_s24 = sadd.s32 1, %s6498_s11 }
   0xf   : > { %p90_p11 = scmp.eq.s32.totalorder %s87_s23, 0 }
  0x10   : > { %142 = sbr.rel (%p139_p10) target bundleno = 1036 (0x40c), region = 28 }
  0x11   : > { %s6605_s25 = scalar_select %p90_p11, %s6498_s11, %s92_s24  }
  0x17   : > { %s157_s26 = sand.u32 1, %s6494_s10   ;;  %p160_p12 = scmp.lt.s32.totalorder %s6506_s13, 1 }
  0x18   : > { %s4968_s27 = sshll.u32 %s157_s26, 4  ;;  %p168_p13 = scmp.eq.s32.totalorder %s6502_s12, 0 }
  0x19   : > { %s161_s28 = scalar_select %p160_p12, %s6506_s13, 1 }
  0x1a   : > { %s6618_s5 = scalar_lea.vmem [#allocation4], %s4968_s27  ;;  %173 = sbr.rel (!%p168_p13) target bundleno = 33 (0x21), region = 32  ;;  %vm174_vm0 = vcmask (%p168_p13), 7168   ;;  %v6520_v0 = vmov (%p168_p13), 0.0  }
  0x1b   : > { %s6243_s29 = smul.u32 216, %s161_s28  ;;  %175 = vst.msk [vmem:[#allocation2] sm:$0xff] (%p168_p13), %vm174_vm0, %v6520_v0  ;;  %176 = vst.msk [vmem:[#allocation3] sm:$0xff] (%p168_p13), %vm174_vm0, %v6520_v0 }
  0x1d   : > { %s6616_s4 = scalar_lea.vmem %s8380_s0, %s6243_s29 }
  0x21 PF: > { %v4971_v1 = vld [vmem:[%s8381_s1 + $0x2] sm:$0x3]  ;;  %vm716_vm1 = vcmask 1041408   ;;  %v5198_v2 = vld [vmem:[%s8381_s1 + $0x8] sm:$0x3]  ;;  %vm667_vm5 = vcmask 31744  }
  0x22   : > { %6233 = vmatprep.subr.msk.bf16.mxu1 %vm716_vm1, %v4971_v1  ;;  %6237 = vmatprep.subr.msk.bf16.mxu0 %vm716_vm1, %v5198_v2  ;;  %v718_v3 = vsel %vm716_vm1, %v4971_v1, 0  ;;  %v6630_v4 = vsel %vm716_vm1, %v5198_v2, 0  ;;  %v181_v5 = vld [vmem:[%s6616_s4] sm:$0xf]  ;;  %v182_v6 = vld [vmem:[%s6616_s4 + $0x4] sm:$0xf] }
  0x23   : > { %8398 = vst [vmem:[#allocation7_spill] sm:$0xff] %v6630_v4  ;;  %5670 = vmatpush3.bf16.msra.mxu1 %v718_v3  ;;  %5806 = vmatpush3.bf16.msra.mxu0 %v6630_v4  ;;  %v214_v7 = vld [vmem:[%s6616_s4 + $0x8] sm:$0x1]  ;;  %vm230_vm2 = vsmask.f32 3328  ;;  %v234_v8 = vshrl.u32 %v181_v5, 16 }
  0x24   : > { %vm231_vm3 = vsmask.f32 7440  ;;  %v237_v9 = vshll.u32 %v181_v5, 16  ;;  %v243_v10 = vshll.u32 %v182_v6, 16  ;;  %v247_v11 = vshrl.u32 %v182_v6, 16  ;;  %p5507_p0 = scmp.ne.s32.totalorder %s6502_s12, 0 }
  0x25   : > { %v213_v12 = vld [vmem:[%s8381_s1] sm:$0x3]  ;;  %v253_v13 = vshll.u32 %v214_v7, 16  ;;  %v5150_v14 = vld [vmem:[%s6616_s4 + $0xc] sm:$0xf]  ;;  %v236_v16 = vrot.slane %v234_v8, 4  ;;  %vm6660_vm4 = vmor %vm230_vm2, %vm231_vm3 }
  0x26   : > { %6234 = vmatprep.subr.msk.bf16.mxu1 %vm716_vm1, %v213_v12  ;;  %v6642_v15 = vld [vmem:[%s6616_s4 + $0x10] sm:$0xf]  ;;  %v239_v17 = vrot.slane %v237_v9, 5  ;;  %v245_v18 = vrot.slane %v243_v10, 5  ;;  %v249_v19 = vrot.slane %v247_v11, 4  ;;  %v2041_v22 = vshrl.u32 %v5150_v14, 16 }
  0x27   : > { %v6645_v20 = vld [vmem:[%s6616_s4 + $0x14] sm:$0x1]  ;;  %v255_v21 = vrot.slane %v253_v13, 5  ;;  %v2044_v23 = vshll.u32 %v5150_v14, 16  ;;  %v2050_v24 = vshll.u32 %v6642_v15, 16  ;;  %v2054_v28 = vshrl.u32 %v6642_v15, 16 }
  0x28   : > { %v6651_v25 = vld [vmem:[%s8381_s1 + $0xa] sm:$0x3]  ;;  %v240_v26 = vor.u32 %v239_v17, %v236_v16  ;;  %v250_v27 = vor.u32 %v249_v19, %v245_v18  ;;  %v2060_v29 = vshll.u32 %v6645_v20, 16  ;;  %v183_v30 = vld [vmem:[%s6616_s4 + $0xc] sm:$0xf]  ;;  %v2043_v32 = vrot.slane %v2041_v22, 4 }
  0x29   : > { %6239 = vmatprep.subr.msk.bf16.mxu0 %vm716_vm1, %v6651_v25  ;;  %v2046_v33 = vrot.slane %v2044_v23, 5  ;;  %v2052_v34 = vrot.slane %v2050_v24, 5  ;;  %v184_v35 = vld [vmem:[%s6616_s4 + $0x10] sm:$0xf]  ;;  %v2056_v38 = vrot.slane %v2054_v28, 4  ;;  %v258_v42 = vshrl.u32 %v183_v30, 16 }
  0x2a   : > { %v241_v36 = vrot.slane %v240_v26, 4  ;;  %v251_v37 = vrot.slane %v250_v27, 4  ;;  %v2062_v40 = vrot.slane %v2060_v29, 5  ;;  %v215_v41 = vld [vmem:[%s6616_s4 + $0x14] sm:$0x1]  ;;  %v261_v43 = vshll.u32 %v183_v30, 16 }
  0x2b   : > { %v2047_v39 = vor.u32 %v2046_v33, %v2043_v32  ;;  %v2057_v46 = vor.u32 %v2056_v38, %v2052_v34  ;;  %v267_v47 = vshll.u32 %v184_v35, 16  ;;  %v260_v50 = vrot.slane %v258_v42, 4  ;;  %v5153_v56 = vld [vmem:[%s6616_s4 + $0x18] sm:$0xf]  ;;  %v6677_v61 = vld [vmem:[%s6616_s4 + $0x1c] sm:$0xf] }
  0x2c   : > { %v246_v44 = vsel %vm6660_vm4, %v241_v36, %v245_v18  ;;  %v256_v45 = vsel %vm6660_vm4, %v251_v37, %v255_v21  ;;  %v263_v51 = vrot.slane %v261_v43, 5  ;;  %v271_v54 = vshrl.u32 %v184_v35, 16  ;;  %v6680_v62 = vld [vmem:[%s6616_s4 + $0x20] sm:$0x1]  ;;  %v185_v17 = vld [vmem:[%s6616_s4 + $0x18] sm:$0xf] }
  0x2d   : > { %v4972_v48 = vcombine.low %v246_v44, %v256_v45  ;;  %v2048_v49 = vrot.slane %v2047_v39, 4  ;;  %v2058_v52 = vrot.slane %v2057_v46, 4  ;;  %v269_v53 = vrot.slane %v267_v47, 5  ;;  %v186_v23 = vld [vmem:[%s6616_s4 + $0x1c] sm:$0xf] }
  0x2e   : > { %v277_v55 = vshll.u32 %v215_v41, 16  ;;  %v2784_v58 = vrot.slane %v6642_v15, 5  ;;  %v2787_v59 = vrot.slane %v6645_v20, 5  ;;  %v264_v60 = vor.u32 %v263_v51, %v260_v50  ;;  %v216_v29 = vld [vmem:[%s6616_s4 + $0x20] sm:$0x1] }
  0x2f   : > { %5671 = vmatprep.mubr.msk.bf16.mxu1 %vm667_vm5, %v4972_v48  ;;  %v2053_v57 = vsel %vm6660_vm4, %v2048_v49, %v2052_v34  ;;  %v2063_v63 = vsel %vm6660_vm4, %v2058_v52, %v2062_v40  ;;  %v273_v0 = vrot.slane %v271_v54, 4  ;;  %v1010_v2 = vsel %vm716_vm1, %v213_v12, 0  ;;  %v5156_v35 = vld [vmem:[%s6616_s4 + $0x24] sm:$0xf]  ;;  %v6706_v44 = vld [vmem:[%s6616_s4 + $0x28] sm:$0xf] }
  0x30   : > { %v279_v1 = vrot.slane %v277_v55, 5  ;;  %v5199_v3 = vcombine.low %v2053_v57, %v2063_v63  ;;  %v265_v5 = vrot.slane %v264_v60, 4  ;;  %v2065_v6 = vshrl.u32 %v5153_v56, 16  ;;  %v6712_v47 = vld [vmem:[%s6616_s4 + $0x2c] sm:$0x1] }
  0x31   : > { %v2068_v7 = vshll.u32 %v5153_v56, 16  ;;  %v274_v8 = vor.u32 %v273_v0, %v269_v53  ;;  %v2074_v9 = vshll.u32 %v6677_v61, 16  ;;  %v2078_v10 = vshrl.u32 %v6677_v61, 16 }
  0x32   : > { %v2084_v11 = vshll.u32 %v6680_v62, 16  ;;  %5807 = vmatprep.mubr.msk.bf16.mxu0 %vm667_vm5, %v5199_v3  ;;  %v270_v13 = vsel %vm6660_vm4, %v265_v5, %v269_v53  ;;  %v2067_v14 = vrot.slane %v2065_v6, 4  ;;  %v2791_v16 = vrot.slane %v6677_v61, 5  ;;  %v187_v53 = vld [vmem:[%s6616_s4 + $0x24] sm:$0xf] }
  0x33   : > { %v2070_v12 = vrot.slane %v2068_v7, 5  ;;  %v275_v18 = vrot.slane %v274_v8, 4  ;;  %v2076_v19 = vrot.slane %v2074_v9, 5  ;;  %v2080_v21 = vrot.slane %v2078_v10, 4 }
  0x34   : > { %v2086_v22 = vrot.slane %v2084_v11, 5  ;;  %v6696_v26 = vrot.slane %v2791_v16, 4  ;;  %v2794_v27 = vrot.slane %v6680_v62, 5  ;;  %v2993_v28 = vsel %vm716_vm1, %v6651_v25, 0 }
  0x35   : > { %v2071_v24 = vor.u32 %v2070_v12, %v2067_v14  ;;  %v280_v30 = vsel %vm6660_vm4, %v275_v18, %v279_v1  ;;  %v2081_v32 = vor.u32 %v2080_v21, %v2076_v19  ;;  %v282_v33 = vshrl.u32 %v185_v17, 16  ;;  %v5159_v14 = vld [vmem:[%s6616_s4 + $0x30] sm:$0xf] }
  0x36   : > { %v285_v34 = vshll.u32 %v185_v17, 16  ;;  %v4973_v36 = vcombine.low %v270_v13, %v280_v30  ;;  %v291_v38 = vshll.u32 %v186_v23, 16  ;;  %v295_v39 = vshrl.u32 %v186_v23, 16  ;;  %v217_v13 = vld [vmem:[%s6616_s4 + $0x2c] sm:$0x1] }
  0x37   : > { %v2072_v37 = vrot.slane %v2071_v24, 4  ;;  %v2082_v40 = vrot.slane %v2081_v32, 4  ;;  %v284_v41 = vrot.slane %v282_v33, 4  ;;  %v301_v43 = vshll.u32 %v216_v29, 16 }
  0x38   : > { %v287_v42 = vrot.slane %v285_v34, 5  ;;  %5672 = vmatmul.mubr.msk.bf16.vlgmr.msra.gmra.mrb[0].mxu1 %vm667_vm5, %v4973_v36  ;;  %v293_v45 = vrot.slane %v291_v38, 5  ;;  %v297_v46 = vrot.slane %v295_v39, 4  ;;  %v2089_v48 = vshrl.u32 %v5156_v35, 16 }
  0x39   : > { %v2077_v25 = vsel %vm6660_vm4, %v2072_v37, %v2076_v19  ;;  %5704 = vmatpush3.bf16.msra.mxu1 %v1010_v2  ;;  %v2087_v49 = vsel %vm6660_vm4, %v2082_v40, %v2086_v22  ;;  %v303_v51 = vrot.slane %v301_v43, 5  ;;  %v2092_v52 = vshll.u32 %v5156_v35, 16  ;;  %v188_v2 = vld [vmem:[%s6616_s4 + $0x28] sm:$0xf]  ;;  %v6735_v37 = vld [vmem:[%s6616_s4 + $0x38] sm:$0x1] }
  0x3a   : > { %v288_v50 = vor.u32 %v287_v42, %v284_v41  ;;  %v5200_v54 = vcombine.low %v2077_v25, %v2087_v49  ;;  %v298_v55 = vor.u32 %v297_v46, %v293_v45  ;;  %v2091_v56 = vrot.slane %v2089_v48, 4  ;;  %v189_v43 = vld [vmem:[%s6616_s4 + $0x30] sm:$0xf]  ;;  %v190_v49 = vld [vmem:[%s6616_s4 + $0x34] sm:$0xf] }
  0x3b   : > { %v2098_v57 = vshll.u32 %v6706_v44, 16  ;;  %v2094_v63 = vrot.slane %v2092_v52, 5  ;;  %v2102_v0 = vshrl.u32 %v6706_v44, 16  ;;  %v2108_v1 = vshll.u32 %v6712_v47, 16 }
  0x3c   : > { %v289_v60 = vrot.slane %v288_v50, 4  ;;  %5808 = vmatmul.mubr.msk.bf16.vlgmr.msra.gmra.mrb[0].mxu0 %vm667_vm5, %v5200_v54  ;;  %v299_v3 = vrot.slane %v298_v55, 4  ;;  %v306_v6 = vshrl.u32 %v187_v53, 16  ;;  %v309_v7 = vshll.u32 %v187_v53, 16 }
  0x3d   : > { %v2100_v5 = vrot.slane %v2098_v57, 5  ;;  %5840 = vmatpush3.bf16.msra.mxu0 %v2993_v28  ;;  %v2095_v9 = vor.u32 %v2094_v63, %v2091_v56  ;;  %v2104_v10 = vrot.slane %v2102_v0, 4  ;;  %v2110_v11 = vrot.slane %v2108_v1, 5  ;;  %v6729_v28 = vld [vmem:[%s6616_s4 + $0x34] sm:$0xf] }
  0x3e   : > { %v294_v8 = vsel %vm6660_vm4, %v289_v60, %v293_v45  ;;  %v304_v12 = vsel %vm6660_vm4, %v299_v3, %v303_v51  ;;  %v308_v17 = vrot.slane %v306_v6, 4  ;;  %v311_v18 = vrot.slane %v309_v7, 5  ;;  %v218_v57 = vld [vmem:[%s6616_s4 + $0x38] sm:$0x1]  ;;  %v5162_v3 = vld [vmem:[%s6616_s4 + $0x3c] sm:$0xf] }
  0x3f   : > { %v315_v19 = vshll.u32 %v188_v2, 16  ;;  %v4974_v21 = vcombine.low %v294_v8, %v304_v12  ;;  %v2096_v22 = vrot.slane %v2095_v9, 4  ;;  %v2105_v23 = vor.u32 %v2104_v10, %v2100_v5  ;;  %v6752_v9 = vld [vmem:[%s6616_s4 + $0x40] sm:$0xf] }
  0x40   : > { %v319_v24 = vshrl.u32 %v188_v2, 16  ;;  %v312_v29 = vor.u32 %v311_v18, %v308_v17  ;;  %v325_v32 = vshll.u32 %v217_v13, 16  ;;  %v2113_v33 = vshrl.u32 %v5159_v14, 16 }
  0x41   : > { %v317_v30 = vrot.slane %v315_v19, 5  ;;  %5675 = vmatprep.mubr.msk.bf16.mxu1 %vm667_vm5, %v4974_v21  ;;  %v2101_v34 = vsel %vm6660_vm4, %v2096_v22, %v2100_v5  ;;  %v2106_v35 = vrot.slane %v2105_v23, 4  ;;  %v2116_v38 = vshll.u32 %v5159_v14, 16  ;;  %v6757_v19 = vld [vmem:[%s6616_s4 + $0x44] sm:$0x1] }
  0x42   : > { %v321_v36 = vrot.slane %v319_v24, 4  ;;  %v313_v39 = vrot.slane %v312_v29, 4  ;;  %v327_v40 = vrot.slane %v325_v32, 5  ;;  %v2115_v41 = vrot.slane %v2113_v33, 4  ;;  %v6765_v32 = vld [vmem:[%s8381_s1 + $0xc] sm:$0x3] }
  0x43   : > { %v2122_v42 = vshll.u32 %v6729_v28, 16  ;;  %v2111_v25 = vsel %vm6660_vm4, %v2106_v35, %v2110_v11  ;;  %v2118_v46 = vrot.slane %v2116_v38, 5  ;;  %v2126_v48 = vshrl.u32 %v6729_v28, 16  ;;  %6240 = vmatprep.subr.msk.bf16.mxu0 %vm716_vm1, %v6765_v32 }
  0x44   : > { %v322_v45 = vor.u32 %v321_v36, %v317_v30  ;;  %v5201_v50 = vcombine.low %v2101_v34, %v2111_v25  ;;  %v318_v51 = vsel %vm6660_vm4, %v313_v39, %v317_v30  ;;  %v2132_v53 = vshll.u32 %v6735_v37, 16  ;;  %v191_v30 = vld [vmem:[%s6616_s4 + $0x3c] sm:$0xf] }
  0x45   : > { %v2124_v52 = vrot.slane %v2122_v42, 5  ;;  %v2119_v55 = vor.u32 %v2118_v46, %v2115_v41  ;;  %v2128_v56 = vrot.slane %v2126_v48, 4  ;;  %v330_v60 = vshrl.u32 %v189_v43, 16 }
  0x46   : > { %v323_v54 = vrot.slane %v322_v45, 4  ;;  %5811 = vmatprep.mubr.msk.bf16.mxu0 %vm667_vm5, %v5201_v50  ;;  %v2134_v63 = vrot.slane %v2132_v53, 5  ;;  %v333_v0 = vshll.u32 %v189_v43, 16  ;;  %v339_v1 = vshll.u32 %v190_v49, 16  ;;  %v192_v45 = vld [vmem:[%s6616_s4 + $0x40] sm:$0xf] }
  0x47   : > { %v343_v2 = vshrl.u32 %v190_v49, 16  ;;  %v2120_v6 = vrot.slane %v2119_v55, 4  ;;  %v2129_v7 = vor.u32 %v2128_v56, %v2124_v52  ;;  %v332_v8 = vrot.slane %v330_v60, 4  ;;  %v5165_v53 = vld [vmem:[%s6616_s4 + $0x48] sm:$0xf] }
  0x48   : > { %v328_v5 = vsel %vm6660_vm4, %v323_v54, %v327_v40  ;;  %v335_v11 = vrot.slane %v333_v0, 5  ;;  %v341_v13 = vrot.slane %v339_v1, 5  ;;  %v349_v18 = vshll.u32 %v218_v57, 16 }
  0x49   : > { %v4975_v10 = vcombine.low %v318_v51, %v328_v5  ;;  %v345_v14 = vrot.slane %v343_v2, 4  ;;  %v2125_v12 = vsel %vm6660_vm4, %v2120_v6, %v2124_v52  ;;  %v2130_v17 = vrot.slane %v2129_v7, 4  ;;  %v219_v51 = vld [vmem:[%s6616_s4 + $0x44] sm:$0x1]  ;;  %v6783_v5 = vld [vmem:[%s6616_s4 + $0x4c] sm:$0xf] }
  0x4a   : > { %v2137_v21 = vshrl.u32 %v5162_v3, 16  ;;  %v336_v22 = vor.u32 %v335_v11, %v332_v8  ;;  %v2140_v24 = vshll.u32 %v5162_v3, 16  ;;  %v2146_v29 = vshll.u32 %v6752_v9, 16 }
  0x4b   : > { %5676 = vmatmul.mubr.msk.bf16.gmra.mrb[4].mxu1 %vm667_vm5, %v4975_v10  ;;  %v346_v23 = vor.u32 %v345_v14, %v341_v13  ;;  %v2135_v33 = vsel %vm6660_vm4, %v2130_v17, %v2134_v63  ;;  %v351_v34 = vrot.slane %v349_v18, 5  ;;  %v2150_v36 = vshrl.u32 %v6752_v9, 16  ;;  %v6788_v14 = vld [vmem:[%s6616_s4 + $0x50] sm:$0x1] }
  0x4c   : > { %v2139_v35 = vrot.slane %v2137_v21, 4  ;;  %v5202_v38 = vcombine.low %v2125_v12, %v2135_v33  ;;  %v337_v39 = vrot.slane %v336_v22, 4  ;;  %v2142_v41 = vrot.slane %v2140_v24, 5  ;;  %v6791_v12 = vld [vmem:[%s6616_s4 + $0x48] sm:$0xf] }
  0x4d   : > { %v347_v40 = vrot.slane %v346_v23, 4  ;;  %v2148_v42 = vrot.slane %v2146_v29, 5  ;;  %v2152_v43 = vrot.slane %v2150_v36, 4  ;;  %v2156_v25 = vshll.u32 %v6757_v19, 16  ;;  %v6799_v36 = vld [vmem:[%s6616_s4 + $0x4c] sm:$0xf] }
  0x4e   : > { %v354_v46 = vshrl.u32 %v191_v30, 16  ;;  %5812 = vmatmul.mubr.msk.bf16.gmra.mrb[4].mxu0 %vm667_vm5, %v5202_v38  ;;  %v342_v48 = vsel %vm6660_vm4, %v337_v39, %v341_v13  ;;  %v2143_v50 = vor.u32 %v2142_v41, %v2139_v35  ;;  %v357_v52 = vshll.u32 %v191_v30, 16 }
  0x4f   : > { %v352_v49 = vsel %vm6660_vm4, %v347_v40, %v351_v34  ;;  %v2153_v55 = vor.u32 %v2152_v43, %v2148_v42  ;;  %v2158_v56 = vrot.slane %v2156_v25, 5  ;;  %v363_v0 = vshll.u32 %v192_v45, 16 }
  0x50   : > { %v4976_v54 = vcombine.low %v342_v48, %v352_v49  ;;  %v356_v57 = vrot.slane %v354_v46, 4  ;;  %v2144_v60 = vrot.slane %v2143_v50, 4  ;;  %v359_v63 = vrot.slane %v357_v52, 5  ;;  %v5168_v49 = vld [vmem:[%s6616_s4 + $0x54] sm:$0xf] }
  0x51   : > { %v367_v1 = vshrl.u32 %v192_v45, 16  ;;  %v2154_v2 = vrot.slane %v2153_v55, 4  ;;  %v373_v3 = vshll.u32 %v219_v51, 16  ;;  %v2161_v6 = vshrl.u32 %v5165_v53, 16 }
  0x52   : > { %5679 = vmatprep.mubr.msk.bf16.mxu1 %vm667_vm5, %v4976_v54  ;;  %v2164_v7 = vshll.u32 %v5165_v53, 16  ;;  %v2149_v8 = vsel %vm6660_vm4, %v2144_v60, %v2148_v42  ;;  %v360_v10 = vor.u32 %v359_v63, %v356_v57  ;;  %v365_v11 = vrot.slane %v363_v0, 5  ;;  %v220_v42 = vld [vmem:[%s6616_s4 + $0x50] sm:$0x1]  ;;  %v6813_v54 = vld [vmem:[%s6616_s4 + $0x58] sm:$0xf] }
  0x53   : > { %v369_v13 = vrot.slane %v367_v1, 4  ;;  %v2159_v17 = vsel %vm6660_vm4, %v2154_v2, %v2158_v56  ;;  %v375_v18 = vrot.slane %v373_v3, 5  ;;  %v2163_v21 = vrot.slane %v2161_v6, 4  ;;  %v6818_v2 = vld [vmem:[%s6616_s4 + $0x5c] sm:$0x1] }
  0x54   : > { %v2166_v22 = vrot.slane %v2164_v7, 5  ;;  %v5203_v23 = vcombine.low %v2149_v8, %v2159_v17  ;;  %v361_v24 = vrot.slane %v360_v10, 4  ;;  %v2170_v30 = vshll.u32 %v6783_v5, 16 }
  0x55   : > { %v370_v29 = vor.u32 %v369_v13, %v365_v11  ;;  %v2174_v34 = vshrl.u32 %v6783_v5, 16  ;;  %v2180_v35 = vshll.u32 %v6788_v14, 16  ;;  %v378_v38 = vshrl.u32 %v6791_v12, 16 }
  0x56   : > { %v2167_v33 = vor.u32 %v2166_v22, %v2163_v21  ;;  %5815 = vmatprep.mubr.msk.bf16.mxu0 %vm667_vm5, %v5203_v23  ;;  %v366_v39 = vsel %vm6660_vm4, %v361_v24, %v365_v11  ;;  %v2172_v41 = vrot.slane %v2170_v30, 5  ;;  %v381_v43 = vshll.u32 %v6791_v12, 16  ;;  %v6824_v21 = vld [vmem:[%s6616_s4 + $0x54] sm:$0xf]  ;;  %v6830_v30 = vld [vmem:[%s6616_s4 + $0x58] sm:$0xf] }
  0x57   : > { %v371_v40 = vrot.slane %v370_v29, 4  ;;  %v2176_v45 = vrot.slane %v2174_v34, 4  ;;  %v2182_v46 = vrot.slane %v2180_v35, 5  ;;  %v380_v48 = vrot.slane %v378_v38, 4 }
  0x58   : > { %v2168_v25 = vrot.slane %v2167_v33, 4  ;;  %v383_v51 = vrot.slane %v381_v43, 5  ;;  %v387_v52 = vshll.u32 %v6799_v36, 16  ;;  %v391_v53 = vshrl.u32 %v6799_v36, 16 }
  0x59   : > { %v376_v50 = vsel %vm6660_vm4, %v371_v40, %v375_v18  ;;  %v2177_v57 = vor.u32 %v2176_v45, %v2172_v41  ;;  %v397_v60 = vshll.u32 %v220_v42, 16  ;;  %v2185_v3 = vshrl.u32 %v5168_v49, 16 }
  0x5a   : > { %v4977_v55 = vcombine.low %v366_v39, %v376_v50  ;;  %v2173_v56 = vsel %vm6660_vm4, %v2168_v25, %v2172_v41  ;;  %v384_v63 = vor.u32 %v383_v51, %v380_v48  ;;  %v389_v0 = vrot.slane %v387_v52, 5  ;;  %v221_v41 = vld [vmem:[%s6616_s4 + $0x5c] sm:$0x1]  ;;  %v6846_v50 = vld [vmem:[%s8381_s1 + $0x4] sm:$0x3] }
  0x5b   : > { %v393_v1 = vrot.slane %v391_v53, 4  ;;  %v2178_v6 = vrot.slane %v2177_v57, 4  ;;  %v399_v7 = vrot.slane %v397_v60, 5  ;;  %v2188_v8 = vshll.u32 %v5168_v49, 16  ;;  %v5171_v49 = vld [vmem:[%s6616_s4 + $0x60] sm:$0xf]  ;;  %6235 = vmatprep.subr.msk.bf16.mxu1 %vm716_vm1, %v6846_v50 }
  0x5c   : > { %5680 = vmatmul.mubr.msk.bf16.gmra.mrb[8].mxu1 %vm667_vm5, %v4977_v55  ;;  %v2194_v10 = vshll.u32 %v6813_v54, 16  ;;  %v385_v11 = vrot.slane %v384_v63, 4  ;;  %v2187_v17 = vrot.slane %v2185_v3, 4  ;;  %v2198_v18 = vshrl.u32 %v6813_v54, 16 }
  0x5d   : > { %v394_v13 = vor.u32 %v393_v1, %v389_v0  ;;  %v2183_v22 = vsel %vm6660_vm4, %v2178_v6, %v2182_v46  ;;  %v2190_v23 = vrot.slane %v2188_v8, 5  ;;  %v2204_v29 = vshll.u32 %v6818_v2, 16  ;;  %v6857_v6 = vld [vmem:[%s6616_s4 + $0x68] sm:$0x1] }
  0x5e   : > { %v2196_v24 = vrot.slane %v2194_v10, 5  ;;  %v5204_v33 = vcombine.low %v2173_v56, %v2183_v22  ;;  %v390_v34 = vsel %vm6660_vm4, %v385_v11, %v389_v0  ;;  %v2200_v38 = vrot.slane %v2198_v18, 4  ;;  %v6849_v56 = vld [vmem:[%s6616_s4 + $0x64] sm:$0xf]  ;;  %v6863_v18 = vld [vmem:[%s6616_s4 + $0x60] sm:$0xf] }
  0x5f   : > { %v395_v35 = vrot.slane %v394_v13, 4  ;;  %v2191_v39 = vor.u32 %v2190_v23, %v2187_v17  ;;  %v2206_v40 = vrot.slane %v2204_v29, 5  ;;  %v402_v42 = vshrl.u32 %v6824_v21, 16 }
  0x60   : > { %v405_v43 = vshll.u32 %v6824_v21, 16  ;;  %5816 = vmatmul.mubr.msk.bf16.gmra.mrb[8].mxu0 %vm667_vm5, %v5204_v33  ;;  %v2201_v45 = vor.u32 %v2200_v38, %v2196_v24  ;;  %v411_v46 = vshll.u32 %v6830_v30, 16  ;;  %v415_v48 = vshrl.u32 %v6830_v30, 16 }
  0x61   : > { %v400_v25 = vsel %vm6660_vm4, %v395_v35, %v399_v7  ;;  %v2192_v52 = vrot.slane %v2191_v39, 4  ;;  %v404_v53 = vrot.slane %v402_v42, 4  ;;  %v421_v0 = vshll.u32 %v221_v41, 16  ;;  %v222_v42 = vld [vmem:[%s6616_s4 + $0x68] sm:$0x1] }
  0x62   : > { %v4978_v51 = vcombine.low %v390_v34, %v400_v25  ;;  %v407_v55 = vrot.slane %v405_v43, 5  ;;  %v2202_v57 = vrot.slane %v2201_v45, 4  ;;  %v413_v60 = vrot.slane %v411_v46, 5 }
  0x63   : > { %v417_v63 = vrot.slane %v415_v48, 4  ;;  %v2197_v1 = vsel %vm6660_vm4, %v2192_v52, %v2196_v24  ;;  %v2209_v7 = vshrl.u32 %v5171_v49, 16  ;;  %v2212_v8 = vshll.u32 %v5171_v49, 16  ;;  %v6866_v24 = vld [vmem:[%s6616_s4 + $0x64] sm:$0xf] }
  0x64   : > { %5683 = vmatprep.mubr.msk.bf16.mxu1 %vm667_vm5, %v4978_v51  ;;  %v408_v3 = vor.u32 %v407_v55, %v404_v53  ;;  %v2207_v10 = vsel %vm6660_vm4, %v2202_v57, %v2206_v40  ;;  %v423_v13 = vrot.slane %v421_v0, 5  ;;  %v2218_v17 = vshll.u32 %v6849_v56, 16  ;;  %v5231_v57 = vld [vmem:[%s6616_s4 + $0xc] sm:$0xe] }
  0x65   : > { %v418_v11 = vor.u32 %v417_v63, %v413_v60  ;;  %v5205_v22 = vcombine.low %v2197_v1, %v2207_v10  ;;  %v2211_v29 = vrot.slane %v2209_v7, 4  ;;  %v2214_v33 = vrot.slane %v2212_v8, 5  ;;  %v6888_v10 = vld [vmem:[%s6616_s4 + $0x70] sm:$0xf] }
  0x66   : > { %v409_v23 = vrot.slane %v408_v3, 4  ;;  %v2220_v35 = vrot.slane %v2218_v17, 5  ;;  %v2222_v38 = vshrl.u32 %v6849_v56, 16  ;;  %v2228_v39 = vshll.u32 %v6857_v6, 16  ;;  %v6882_v3 = vld [vmem:[%s6616_s4 + $0x6c] sm:$0xf] }
  0x67   : > { %v419_v34 = vrot.slane %v418_v11, 4  ;;  %5819 = vmatprep.mubr.msk.bf16.mxu0 %vm667_vm5, %v5205_v22  ;;  %v2215_v41 = vor.u32 %v2214_v33, %v2211_v29  ;;  %v426_v43 = vshrl.u32 %v6863_v18, 16  ;;  %v429_v25 = vshll.u32 %v6863_v18, 16 }
  0x68   : > { %v414_v40 = vsel %vm6660_vm4, %v409_v23, %v413_v60  ;;  %v2224_v46 = vrot.slane %v2222_v38, 4  ;;  %v2230_v48 = vrot.slane %v2228_v39, 5  ;;  %v435_v49 = vshll.u32 %v6866_v24, 16 }
  0x69   : > { %v424_v45 = vsel %vm6660_vm4, %v419_v34, %v423_v13  ;;  %v2216_v52 = vrot.slane %v2215_v41, 4  ;;  %v428_v53 = vrot.slane %v426_v43, 4  ;;  %v431_v55 = vrot.slane %v429_v25, 5  ;;  %v223_v41 = vld [vmem:[%s6616_s4 + $0x74] sm:$0x1] }
  0x6a   : > { %v4979_v51 = vcombine.low %v414_v40, %v424_v45  ;;  %v2225_v60 = vor.u32 %v2224_v46, %v2220_v35  ;;  %v437_v63 = vrot.slane %v435_v49, 5  ;;  %v439_v0 = vshrl.u32 %v6866_v24, 16  ;;  %v5232_v43 = vld [vmem:[%s6616_s4 + $0x18] sm:$0xe] }
  0x6b   : > { %v445_v1 = vshll.u32 %v222_v42, 16  ;;  %v2221_v7 = vsel %vm6660_vm4, %v2216_v52, %v2220_v35  ;;  %v432_v8 = vor.u32 %v431_v55, %v428_v53  ;;  %vm1221_vm6 = vcmask 1042432   ;;  %v6914_v49 = vld [vmem:[%s6616_s4 + $0x78] sm:$0xf]  ;;  %v6917_v53 = vld [vmem:[%s6616_s4 + $0x7c] sm:$0xf] }
  0x6c   : > { %5684 = vmatmul.mubr.msk.bf16.gmra.mrb[12].mxu1 %vm667_vm5, %v4979_v51  ;;  %vm1222_vm7 = vcmask 1046532   ;;  %v2226_v11 = vrot.slane %v2225_v60, 4  ;;  %v441_v13 = vrot.slane %v439_v0, 4  ;;  %v5247_v23 = vrot.slane %v5231_v57, 9 }
  0x6d   : > { %v447_v17 = vrot.slane %v445_v1, 5  ;;  %vm6890_vm8 = vmor %vm1221_vm6, %vm1222_vm7  ;;  %v433_v29 = vrot.slane %v432_v8, 4  ;;  %v2786_v33 = vrot.slane %v2784_v58, 4  ;;  %v450_v34 = vshrl.u32 %v6882_v3, 16 }
  0x6e   : > { %v453_v35 = vshll.u32 %v6882_v3, 16  ;;  %v2231_v38 = vsel %vm6660_vm4, %v2226_v11, %v2230_v48  ;;  %v442_v39 = vor.u32 %v441_v13, %v437_v63  ;;  %v2785_v40 = vsel %vm6890_vm8, %v5247_v23, %v2784_v58 }
  0x6f   : > { %v459_v42 = vshll.u32 %v6888_v10, 16  ;;  %v5206_v25 = vcombine.low %v2221_v7, %v2231_v38  ;;  %v438_v45 = vsel %vm6660_vm4, %v433_v29, %v437_v63  ;;  %v2788_v46 = vsel %vm6890_vm8, %v2786_v33, %v2787_v59  ;;  %v224_v59 = vld [vmem:[%s6616_s4 + $0x80] sm:$0x1]  ;;  %v6940_v33 = vld [vmem:[%s6616_s4 + $0x84] sm:$0xf] }
  0x70   : > { %v452_v48 = vrot.slane %v450_v34, 4  ;;  %v443_v15 = vrot.slane %v442_v39, 4  ;;  %v5264_v51 = vcombine.low %v2785_v40, %v2788_v46  ;;  %v455_v58 = vrot.slane %v453_v35, 5  ;;  %v6946_v38 = vld [vmem:[%s6616_s4 + $0x88] sm:$0xf] }
  0x71   : > { %v461_v52 = vrot.slane %v459_v42, 5  ;;  %5820 = vmatmul.mubr.msk.bf16.gmra.mrb[12].mxu0 %vm667_vm5, %v5206_v25  ;;  %v463_v55 = vshrl.u32 %v6888_v10, 16  ;;  %v469_v57 = vshll.u32 %v223_v41, 16  ;;  %v5248_v60 = vrot.slane %v5232_v43, 9  ;;  %v6954_v42 = vld [vmem:[%s8381_s1 + $0xe] sm:$0x3] }
  0x72   : > { %v2795_v20 = vsel %vm6890_vm8, %v6696_v26, %v2794_v27  ;;  %v448_v63 = vsel %vm6660_vm4, %v443_v15, %v447_v17  ;;  %5841 = vmatprep.mubr.msk.bf16.mxu0 %vm667_vm5, %v5264_v51  ;;  %v456_v0 = vor.u32 %v455_v58, %v452_v48  ;;  %v3355_v1 = vsel %vm716_vm1, %v6765_v32, 0  ;;  %v5233_v27 = vld [vmem:[%s6616_s4 + $0x24] sm:$0xe]  ;;  %v225_v48 = vld [vmem:[%s6616_s4 + $0x8c] sm:$0x1] }
  0x73   : > { %v474_v7 = vshrl.u32 %v6914_v49, 16  ;;  %v4980_v8 = vcombine.low %v438_v45, %v448_v63  ;;  %v465_v62 = vrot.slane %v463_v55, 4  ;;  %v471_v11 = vrot.slane %v469_v57, 5  ;;  %v5234_v55 = vld [vmem:[%s6616_s4 + $0x30] sm:$0xe] }
  0x74   : > { %v2792_v26 = vsel %vm6890_vm8, %v5248_v60, %v2791_v16  ;;  %v457_v13 = vrot.slane %v456_v0, 4  ;;  %v477_v29 = vshll.u32 %v6914_v49, 16  ;;  %v483_v34 = vshll.u32 %v6917_v53, 16 }
  0x75   : > { %v5265_v17 = vcombine.low %v2792_v26, %v2795_v20  ;;  %v476_v23 = vrot.slane %v474_v7, 4  ;;  %5687 = vmatprep.mubr.msk.bf16.mxu1 %vm667_vm5, %v4980_v8  ;;  %v466_v32 = vor.u32 %v465_v62, %v461_v52  ;;  %v487_v35 = vshrl.u32 %v6917_v53, 16  ;;  %v6970_v7 = vld [vmem:[%s6616_s4 + $0x90] sm:$0xf] }
  0x76   : > { %v493_v61 = vshll.u32 %v224_v59, 16  ;;  %v462_v16 = vsel %vm6660_vm4, %v457_v13, %v461_v52  ;;  %v479_v39 = vrot.slane %v477_v29, 5  ;;  %v5249_v40 = vrot.slane %v5233_v27, 9  ;;  %v6973_v27 = vld [vmem:[%s6616_s4 + $0x94] sm:$0xf] }
  0x77   : > { %v2798_v41 = vrot.slane %v6706_v44, 5  ;;  %v467_v43 = vrot.slane %v466_v32, 4  ;;  %v485_v25 = vrot.slane %v483_v34, 5  ;;  %v489_v45 = vrot.slane %v487_v35, 4 }
  0x78   : > { %v495_v46 = vrot.slane %v493_v61, 5  ;;  %v480_v15 = vor.u32 %v479_v39, %v476_v23  ;;  %v2801_v52 = vrot.slane %v6712_v47, 5  ;;  %v498_v60 = vshrl.u32 %v6940_v33, 16  ;;  %v226_v61 = vld [vmem:[%s6616_s4 + $0x98] sm:$0x1] }
  0x79   : > { %v2799_v51 = vsel %vm6890_vm8, %v5249_v40, %v2798_v41  ;;  %v2800_v58 = vrot.slane %v2798_v41, 4  ;;  %v472_v44 = vsel %vm6660_vm4, %v467_v43, %v471_v11  ;;  %5842 = vmatmul.mubr.msk.bf16.vlgmr.msra.gmra.mrb[0].mxu0 %vm667_vm5, %v5265_v17  ;;  %v490_v57 = vor.u32 %v489_v45, %v485_v25  ;;  %v5235_v43 = vld [vmem:[%s6616_s4 + $0x3c] sm:$0xe] }
  0x7a   : > { %v501_v20 = vshll.u32 %v6940_v33, 16  ;;  %v4981_v59 = vcombine.low %v462_v16, %v472_v44  ;;  %5874 = vmatpush3.bf16.msra.mxu0 %v3355_v1  ;;  %v481_v63 = vrot.slane %v480_v15, 4  ;;  %v507_v47 = vshll.u32 %v6946_v38, 16  ;;  %v6992_v15 = vld [vmem:[%s6616_s4 + $0x9c] sm:$0xf] }
  0x7b   : > { %v2802_v0 = vsel %vm6890_vm8, %v2800_v58, %v2801_v52  ;;  %v491_v8 = vrot.slane %v490_v57, 4  ;;  %v500_v11 = vrot.slane %v498_v60, 4  ;;  %6241 = vmatprep.subr.msk.bf16.mxu0 %vm716_vm1, %v6954_v42  ;;  %v511_v17 = vshrl.u32 %v6946_v38, 16  ;;  %v7003_v60 = vld [vmem:[%s6616_s4 + $0xa0] sm:$0xf] }
  0x7c   : > { %v5266_v62 = vcombine.low %v2799_v51, %v2802_v0  ;;  %v503_v26 = vrot.slane %v501_v20, 5  ;;  %5688 = vmatmul.mubr.msk.bf16.gmra.mrb[16].mxu1 %vm667_vm5, %v4981_v59  ;;  %v486_v1 = vsel %vm6660_vm4, %v481_v63, %v485_v25  ;;  %v509_v13 = vrot.slane %v507_v47, 5 }
  0x7d   : > { %v517_v23 = vshll.u32 %v225_v48, 16  ;;  %v496_v29 = vsel %vm6660_vm4, %v491_v8, %v495_v46  ;;  %v5250_v34 = vrot.slane %v5234_v55, 9  ;;  %v2805_v35 = vrot.slane %v6729_v28, 5 }
  0x7e   : > { %5845 = vmatprep.mubr.msk.bf16.mxu0 %vm667_vm5, %v5266_v62  ;;  %v504_v32 = vor.u32 %v503_v26, %v500_v11  ;;  %v4982_v16 = vcombine.low %v486_v1, %v496_v29  ;;  %v513_v39 = vrot.slane %v511_v17, 4  ;;  %v2808_v41 = vrot.slane %v6735_v37, 5  ;;  %v227_v26 = vld [vmem:[%s6616_s4 + $0xa4] sm:$0x1] }
  0x7f   : > { %v519_v40 = vrot.slane %v517_v23, 5  ;;  %v2806_v45 = vsel %vm6890_vm8, %v5250_v34, %v2805_v35  ;;  %v2807_v48 = vrot.slane %v2805_v35, 4  ;;  %v522_v46 = vshrl.u32 %v6970_v7, 16 }
  0x80   : > { %v505_v25 = vrot.slane %v504_v32, 4  ;;  %5691 = vmatprep.mubr.msk.bf16.mxu1 %vm667_vm5, %v4982_v16  ;;  %v514_v28 = vor.u32 %v513_v39, %v509_v13  ;;  %v525_v51 = vshll.u32 %v6970_v7, 16  ;;  %v531_v58 = vshll.u32 %v6973_v27, 16 }
  0x81   : > { %v535_v37 = vshrl.u32 %v6973_v27, 16  ;;  %v2809_v55 = vsel %vm6890_vm8, %v2807_v48, %v2808_v41  ;;  %v524_v44 = vrot.slane %v522_v46, 4  ;;  %v541_v57 = vshll.u32 %v226_v61, 16  ;;  %v7018_v41 = vld [vmem:[%s6616_s4 + $0xa8] sm:$0xf] }
  0x82   : > { %v510_v52 = vsel %vm6660_vm4, %v505_v25, %v509_v13  ;;  %v515_v20 = vrot.slane %v514_v28, 4  ;;  %v5267_v59 = vcombine.low %v2806_v45, %v2809_v55  ;;  %v527_v63 = vrot.slane %v525_v51, 5  ;;  %v7025_v48 = vld [vmem:[%s6616_s4 + $0xac] sm:$0xf] }
  0x83   : > { %v533_v0 = vrot.slane %v531_v58, 5  ;;  %v537_v47 = vrot.slane %v535_v37, 4  ;;  %v543_v8 = vrot.slane %v541_v57, 5  ;;  %v5251_v62 = vrot.slane %v5235_v43, 9  ;;  %v228_v57 = vld [vmem:[%s6616_s4 + $0xb0] sm:$0x1] }
  0x84   : > { %v2812_v11 = vrot.slane %v6752_v9, 5  ;;  %v520_v1 = vsel %vm6660_vm4, %v515_v20, %v519_v40  ;;  %5846 = vmatmul.mubr.msk.bf16.gmra.mrb[4].mxu0 %vm667_vm5, %v5267_v59  ;;  %v528_v13 = vor.u32 %v527_v63, %v524_v44  ;;  %v2815_v17 = vrot.slane %v6757_v19, 5  ;;  %v5236_v9 = vld [vmem:[%s6616_s4 + $0x48] sm:$0xe] }
  0x85   : > { %v546_v23 = vshrl.u32 %v6992_v15, 16  ;;  %v4983_v29 = vcombine.low %v510_v52, %v520_v1  ;;  %v538_v32 = vor.u32 %v537_v47, %v533_v0  ;;  %v549_v39 = vshll.u32 %v6992_v15, 16 }
  0x86   : > { %v2813_v34 = vsel %vm6890_vm8, %v5251_v62, %v2812_v11  ;;  %v2814_v35 = vrot.slane %v2812_v11, 4  ;;  %v529_v61 = vrot.slane %v528_v13, 4  ;;  %v555_v40 = vshll.u32 %v7003_v60, 16 }
  0x87   : > { %v548_v16 = vrot.slane %v546_v23, 4  ;;  %5692 = vmatmul.mubr.msk.bf16.gmra.mrb[20].mxu1 %vm667_vm5, %v4983_v29  ;;  %v539_v19 = vrot.slane %v538_v32, 4  ;;  %v559_v25 = vshrl.u32 %v7003_v60, 16  ;;  %v565_v45 = vshll.u32 %v227_v26, 16  ;;  %v5237_v26 = vld [vmem:[%s6616_s4 + $0x54] sm:$0xe] }
  0x88   : > { %v2816_v43 = vsel %vm6890_vm8, %v2814_v35, %v2815_v17  ;;  %v534_v46 = vsel %vm6660_vm4, %v529_v61, %v533_v0  ;;  %v551_v51 = vrot.slane %v549_v39, 5  ;;  %v557_v58 = vrot.slane %v555_v40, 5 }
  0x89   : > { %v5268_v28 = vcombine.low %v2813_v34, %v2816_v43  ;;  %v544_v37 = vsel %vm6660_vm4, %v539_v19, %v543_v8  ;;  %v561_v52 = vrot.slane %v559_v25, 4  ;;  %v567_v55 = vrot.slane %v565_v45, 5  ;;  %v7053_v25 = vld [vmem:[%s6616_s4 + $0xb8] sm:$0xf] }
  0x8a   : > { %v5252_v44 = vrot.slane %v5236_v9, 9  ;;  %v4984_v20 = vcombine.low %v534_v46, %v544_v37  ;;  %v552_v59 = vor.u32 %v551_v51, %v548_v16  ;;  %v2819_v63 = vrot.slane %v6783_v5, 5  ;;  %v7048_v16 = vld [vmem:[%s6616_s4 + $0xb4] sm:$0xf] }
  0x8b   : > { %5849 = vmatprep.mubr.msk.bf16.mxu0 %vm667_vm5, %v5268_v28  ;;  %v2822_v47 = vrot.slane %v6788_v14, 5  ;;  %v562_v0 = vor.u32 %v561_v52, %v557_v58  ;;  %v570_v62 = vshrl.u32 %v7018_v41, 16  ;;  %v573_v11 = vshll.u32 %v7018_v41, 16  ;;  %v7059_v52 = vld [vmem:[%s6616_s4 + $0xbc] sm:$0x1] }
  0x8c   : > { %v579_v8 = vshll.u32 %v7025_v48, 16  ;;  %5695 = vmatprep.mubr.msk.bf16.mxu1 %vm667_vm5, %v4984_v20  ;;  %v553_v1 = vrot.slane %v552_v59, 4  ;;  %v2820_v13 = vsel %vm6890_vm8, %v5252_v44, %v2819_v63  ;;  %v2821_v17 = vrot.slane %v2819_v63, 4 }
  0x8d   : > { %v583_v5 = vshrl.u32 %v7025_v48, 16  ;;  %v563_v14 = vrot.slane %v562_v0, 4  ;;  %v572_v23 = vrot.slane %v570_v62, 4  ;;  %v575_v29 = vrot.slane %v573_v11, 5  ;;  %v5238_v62 = vld [vmem:[%s6616_s4 + $0x60] sm:$0xe] }
  0x8e   : > { %v581_v32 = vrot.slane %v579_v8, 5  ;;  %v558_v34 = vsel %vm6660_vm4, %v553_v1, %v557_v58  ;;  %v2823_v35 = vsel %vm6890_vm8, %v2821_v17, %v2822_v47  ;;  %v589_v61 = vshll.u32 %v228_v57, 16  ;;  %v5239_v17 = vld [vmem:[%s6616_s4 + $0x6c] sm:$0xe] }
  0x8f   : > { %v585_v9 = vrot.slane %v583_v5, 4  ;;  %v568_v39 = vsel %vm6660_vm4, %v563_v14, %v567_v55  ;;  %v5269_v40 = vcombine.low %v2820_v13, %v2823_v35  ;;  %v576_v19 = vor.u32 %v575_v29, %v572_v23  ;;  %v5175_v13 = vld [vmem:[%s6616_s4 + $0x70] sm:$0xf] }
  0x90   : > { %v5253_v43 = vrot.slane %v5237_v26, 9  ;;  %v4985_v45 = vcombine.low %v558_v34, %v568_v39  ;;  %v591_v28 = vrot.slane %v589_v61, 5  ;;  %v2826_v51 = vrot.slane %v6813_v54, 5 }
  0x91   : > { %v586_v46 = vor.u32 %v585_v9, %v581_v32  ;;  %5850 = vmatmul.mubr.msk.bf16.gmra.mrb[8].mxu0 %vm667_vm5, %v5269_v40  ;;  %v577_v58 = vrot.slane %v576_v19, 4  ;;  %v2829_v37 = vrot.slane %v6818_v2, 5  ;;  %v594_v55 = vshrl.u32 %v7048_v16, 16 }
  0x92   : > { %v597_v44 = vshll.u32 %v7048_v16, 16  ;;  %5696 = vmatmul.mubr.msk.bf16.gmra.mrb[24].mxu1 %vm667_vm5, %v4985_v45  ;;  %v2827_v54 = vsel %vm6890_vm8, %v5253_v43, %v2826_v51  ;;  %v2828_v20 = vrot.slane %v2826_v51, 4  ;;  %v603_v59 = vshll.u32 %v7053_v25, 16 }
  0x93   : > { %v587_v57 = vrot.slane %v586_v46, 4  ;;  %v582_v2 = vsel %vm6660_vm4, %v577_v58, %v581_v32  ;;  %v596_v63 = vrot.slane %v594_v55, 4  ;;  %v607_v0 = vshrl.u32 %v7053_v25, 16  ;;  %v5176_v32 = vld [vmem:[%s6616_s4 + $0x74] sm:$0x1] }
  0x94   : > { %v599_v47 = vrot.slane %v597_v44, 5  ;;  %v2830_v8 = vsel %vm6890_vm8, %v2828_v20, %v2829_v37  ;;  %v605_v26 = vrot.slane %v603_v59, 5  ;;  %v613_v1 = vshll.u32 %v7059_v52, 16  ;;  %v7092_v55 = vld [vmem:[%s6616_s4 + $0x7c] sm:$0xf] }
  0x95   : > { %v592_v11 = vsel %vm6660_vm4, %v587_v57, %v591_v28  ;;  %v5270_v14 = vcombine.low %v2827_v54, %v2830_v8  ;;  %v609_v29 = vrot.slane %v607_v0, 4  ;;  %v5254_v35 = vrot.slane %v5238_v62, 9  ;;  %v7095_v44 = vld [vmem:[%s6616_s4 + $0x80] sm:$0x1]  ;;  %v5240_v57 = vld [vmem:[%s6616_s4 + $0x78] sm:$0xe] }
  0x96   : > { %v4986_v5 = vcombine.low %v582_v2, %v592_v11  ;;  %v600_v23 = vor.u32 %v599_v47, %v596_v63  ;;  %v615_v34 = vrot.slane %v613_v1, 5  ;;  %v2833_v9 = vrot.slane %v6849_v56, 5  ;;  %v6365_v59 = vld [vmem:[%s6616_s4] sm:$0xf]  ;;  %v7102_v2 = vld [vmem:[%s6616_s4 + $0x4] sm:$0xf] }
  0x97   : > { %v2836_v61 = vrot.slane %v6857_v6, 5  ;;  %5853 = vmatprep.mubr.msk.bf16.mxu0 %vm667_vm5, %v5270_v14  ;;  %v610_v40 = vor.u32 %v609_v29, %v605_v26  ;;  %v5255_v19 = vrot.slane %v5239_v17, 9  ;;  %v2840_v43 = vrot.slane %v5175_v13, 5  ;;  %v5181_v0 = vld [vmem:[%s6616_s4 + $0x88] sm:$0xf] }
  0x98   : > { %5699 = vmatprep.mubr.msk.bf16.mxu1 %vm667_vm5, %v4986_v5  ;;  %v601_v39 = vrot.slane %v600_v23, 4  ;;  %v2834_v45 = vsel %vm6890_vm8, %v5254_v35, %v2833_v9  ;;  %v2835_v46 = vrot.slane %v2833_v9, 4  ;;  %v2843_v56 = vrot.slane %v5176_v32, 5  ;;  %v5241_v62 = vld [vmem:[%s6616_s4 + $0x84] sm:$0xe] }
  0x99   : > { %v611_v28 = vrot.slane %v610_v40, 4  ;;  %v2841_v51 = vsel %vm6890_vm8, %v5255_v19, %v2840_v43  ;;  %v2842_v58 = vrot.slane %v2840_v43, 4  ;;  %v5004_v63 = vcombine.low %v6365_v59, %v7102_v2  ;;  %v5184_v23 = vld [vmem:[%s6616_s4 + $0x94] sm:$0xf]  ;;  %v5242_v29 = vld [vmem:[%s6616_s4 + $0x90] sm:$0xe] }
  0x9a   : > { %v606_v6 = vsel %vm6660_vm4, %v601_v39, %v605_v26  ;;  %v2837_v37 = vsel %vm6890_vm8, %v2835_v46, %v2836_v61  ;;  %v5182_v26 = vld [vmem:[%s6616_s4 + $0x8c] sm:$0x1]  ;;  %v5256_v1 = vrot.slane %v5240_v57, 9  ;;  %v2847_v13 = vrot.slane %v7092_v55, 5  ;;  %v5185_v9 = vld [vmem:[%s6616_s4 + $0x98] sm:$0x1] }
  0x9b   : > { %v616_v54 = vsel %vm6660_vm4, %v611_v28, %v615_v34  ;;  %v5271_v20 = vcombine.low %v2834_v45, %v2837_v37  ;;  %v2844_v47 = vsel %vm6890_vm8, %v2842_v58, %v2843_v56  ;;  %v2850_v17 = vrot.slane %v7095_v44, 5  ;;  %v5187_v61 = vld [vmem:[%s6616_s4 + $0xa0] sm:$0xf]  ;;  %v6367_v39 = vld [vmem:[%s6616_s4 + $0xc] sm:$0xf] }
  0x9c   : > { %v4987_v11 = vcombine.low %v606_v6, %v616_v54  ;;  %v5272_v8 = vcombine.low %v2841_v51, %v2844_v47  ;;  %v5257_v5 = vrot.slane %v5241_v62, 9  ;;  %v2854_v14 = vrot.slane %v5181_v0, 5  ;;  %v7124_v40 = vld [vmem:[%s6616_s4 + $0x10] sm:$0xf]  ;;  %v5188_v46 = vld [vmem:[%s6616_s4 + $0xa4] sm:$0x1] }
  0x9d   : > { %5854 = vmatmul.mubr.msk.bf16.gmra.mrb[12].mxu0 %vm667_vm5, %v5271_v20  ;;  %v2848_v32 = vsel %vm6890_vm8, %v5256_v1, %v2847_v13  ;;  %v2849_v34 = vrot.slane %v2847_v13, 4  ;;  %v2857_v35 = vrot.slane %v5182_v26, 5  ;;  %v5005_v19 = vcombine.low %v6367_v39, %v7124_v40  ;;  %v5243_v56 = vld [vmem:[%s6616_s4 + $0x9c] sm:$0xe]  ;;  %v6369_v28 = vld [vmem:[%s6616_s4 + $0x18] sm:$0xf] }
  0x9e   : > { %5700 = vmatmul.mubr.msk.bf16.gmra.mrb[28].mxu1 %vm667_vm5, %v4987_v11  ;;  %5857 = vmatprep.mubr.msk.bf16.mxu0 %vm667_vm5, %v5272_v8  ;;  %v2855_v43 = vsel %vm6890_vm8, %v5257_v5, %v2854_v14  ;;  %v2856_v45 = vrot.slane %v2854_v14, 4  ;;  %v7135_v51 = vld [vmem:[%s6616_s4 + $0x1c] sm:$0xf]  ;;  %v5258_v37 = vrot.slane %v5242_v29, 9  ;;  %v2861_v57 = vrot.slane %v5184_v23, 5 }
  0x9f   : > { %5705 = vmatprep.mubr.msk.bf16.mxu1 %vm667_vm5, %v5004_v63  ;;  %v2851_v6 = vsel %vm6890_vm8, %v2849_v34, %v2850_v17  ;;  %v5006_v58 = vcombine.low %v6369_v28, %v7135_v51  ;;  %v2864_v59 = vrot.slane %v5185_v9, 5  ;;  %v2868_v63 = vrot.slane %v5187_v61, 5  ;;  %v5190_v47 = vld [vmem:[%s6616_s4 + $0xac] sm:$0xf]  ;;  %v5193_v26 = vld [vmem:[%s6616_s4 + $0xb8] sm:$0xf] }
  0xa0   : > { %v5273_v54 = vcombine.low %v2848_v32, %v2851_v6  ;;  %v2858_v20 = vsel %vm6890_vm8, %v2856_v45, %v2857_v35  ;;  %v2863_v62 = vrot.slane %v2861_v57, 4  ;;  %v5259_v11 = vrot.slane %v5243_v56, 9  ;;  %v7148_v17 = vld [vmem:[%s8381_s1 + $0x6] sm:$0x3]  ;;  %v5191_v14 = vld [vmem:[%s6616_s4 + $0xb0] sm:$0x1] }
  0xa1   : > { %v5274_v0 = vcombine.low %v2855_v43, %v2858_v20  ;;  %v2871_v8 = vrot.slane %v5188_v46, 5  ;;  %v1435_v1 = vsel %vm716_vm1, %v6846_v50, 0  ;;  %v2870_v13 = vrot.slane %v2868_v63, 4  ;;  %v5244_v34 = vld [vmem:[%s6616_s4 + $0xa8] sm:$0xe] }
  0xa2   : > { %v2862_v5 = vsel %vm6890_vm8, %v5258_v37, %v2861_v57  ;;  %v2865_v50 = vsel %vm6890_vm8, %v2863_v62, %v2864_v59  ;;  %v2875_v23 = vrot.slane %v5190_v47, 5  ;;  %v2869_v29 = vsel %vm6890_vm8, %v5259_v11, %v2868_v63  ;;  %v5194_v9 = vld [vmem:[%s6616_s4 + $0xbc] sm:$0x1]  ;;  %v5245_v61 = vld [vmem:[%s6616_s4 + $0xb4] sm:$0xe] }
  0xa3   : > { %v2872_v32 = vsel %vm6890_vm8, %v2870_v13, %v2871_v8  ;;  %v2882_v35 = vrot.slane %v5193_v26, 5  ;;  %v6371_v39 = vld [vmem:[%s6616_s4 + $0x24] sm:$0xf]  ;;  %v5275_v45 = vcombine.low %v2862_v5, %v2865_v50  ;;  %v5260_v56 = vrot.slane %v5244_v34, 9  ;;  %v7174_v37 = vld [vmem:[%s6616_s4 + $0x34] sm:$0xf] }
  0xa4   : > { %v5276_v46 = vcombine.low %v2869_v29, %v2872_v32  ;;  %v2877_v6 = vrot.slane %v2875_v23, 4  ;;  %v2878_v28 = vrot.slane %v5191_v14, 5  ;;  %v2885_v59 = vrot.slane %v5194_v9, 5  ;;  %v5196_v63 = vld [vmem:[%s6616_s4 + $0xc4] sm:$0xf] }
  0xa5   : > { %5858 = vmatmul.mubr.msk.bf16.gmra.mrb[16].mxu0 %vm667_vm5, %v5273_v54  ;;  %v5261_v54 = vrot.slane %v5245_v61, 9  ;;  %v2884_v20 = vrot.slane %v2882_v35, 4  ;;  %v2876_v47 = vsel %vm6890_vm8, %v5260_v56, %v2875_v23  ;;  %v2889_v62 = vrot.slane %v5196_v63, 5  ;;  %v5197_v26 = vld [vmem:[%s6616_s4 + $0xc8] sm:$0x1] }
  0xa6   : > { %5706 = vmatmul.mubr.msk.bf16.vlgmr.msra.gmra.mrb[0].mxu1 %vm667_vm5, %v5005_v19  ;;  %5861 = vmatprep.mubr.msk.bf16.mxu0 %vm667_vm5, %v5274_v0  ;;  %v7169_v19 = vld [vmem:[%s6616_s4 + $0x28] sm:$0xf]  ;;  %v2879_v0 = vsel %vm6890_vm8, %v2877_v6, %v2878_v28  ;;  %v6375_v13 = vld [vmem:[%s6616_s4 + $0x3c] sm:$0xf]  ;;  %v7194_v5 = vld [vmem:[%s6616_s4 + $0x40] sm:$0xf]  ;;  %v5010_v9 = vcombine.low %v6791_v12, %v6799_v36  ;;  %v5012_v6 = vcombine.low %v6863_v18, %v6866_v24 }
  0xa7   : > { %5738 = vmatpush3.bf16.msra.mxu1 %v1435_v1  ;;  %5709 = vmatprep.mubr.msk.bf16.mxu1 %vm667_vm5, %v5006_v58  ;;  %v5007_v43 = vcombine.low %v6371_v39, %v7169_v19  ;;  %v6373_v58 = vld [vmem:[%s6616_s4 + $0x30] sm:$0xf]  ;;  %v2883_v11 = vsel %vm6890_vm8, %v5261_v54, %v2882_v35  ;;  %v2886_v8 = vsel %vm6890_vm8, %v2884_v20, %v2885_v59  ;;  %v5246_v1 = vld [vmem:[%s6616_s4 + $0xc0] sm:$0xe]  ;;  %v2891_v32 = vrot.slane %v2889_v62, 4 }
  0xa8   : > { %6236 = vmatprep.subr.msk.bf16.mxu1 %vm716_vm1, %v7148_v17  ;;  %v5008_v57 = vcombine.low %v6373_v58, %v7174_v37  ;;  %v5009_v50 = vcombine.low %v6375_v13, %v7194_v5  ;;  %v5277_v14 = vcombine.low %v2876_v47, %v2879_v0  ;;  %v5278_v23 = vcombine.low %v2883_v11, %v2886_v8  ;;  %v1173_v58 = vld [vmem:[%s6616_s4] sm:$0xe]  ;;  %v1174_v20 = vld [vmem:[%s6616_s4 + $0xc] sm:$0xe]  ;;  %v6377_v18 = vld [vmem:[%s6616_s4 + $0x8] sm:$0x1] }
  0xa9   : > { %v5262_v29 = vrot.slane %v5246_v1, 9  ;;  %v2892_v34 = vrot.slane %v5197_v26, 5  ;;  %v2266_v35 = vshll.u32 %v7092_v55, 16  ;;  %v2270_v61 = vshrl.u32 %v7092_v55, 16  ;;  %v6328_v47 = vld [vmem:[%s6616_s4 + $0x24] sm:$0xff]  }
  0xaa   : > { %v2276_v56 = vshll.u32 %v7095_v44, 16  ;;  %v1226_v54 = vrot.slane %v7102_v2, 5  ;;  %v1229_v24 = vrot.slane %v6377_v18, 5  ;;  %v6378_v44 = vld [vmem:[%s6616_s4 + $0x14] sm:$0x1]  ;;  %v5013_v63 = vcombine.low %v6882_v3, %v6888_v10 }
  0xab   : > { %v2890_v39 = vsel %vm6890_vm8, %v5262_v29, %v2889_v62  ;;  %v7209_v12 = vrot.slane %v2266_v35, 5  ;;  %v2272_v36 = vrot.slane %v2270_v61, 4  ;;  %v1236_v59 = vrot.slane %v6378_v44, 5  ;;  %v1176_v62 = vld [vmem:[%s6616_s4 + $0x24] sm:$0xe] }
  0xac   : > { %v5036_v0 = vrot.slane %v1173_v58, 9  ;;  %v4081_v11 = vsel %vm716_vm1, %v6954_v42, 0  ;;  %v1228_v8 = vrot.slane %v1226_v54, 4  ;;  %v1177_v13 = vld [vmem:[%s6616_s4 + $0x30] sm:$0xe]  ;;  %v1247_v3 = vrot.slane %v7169_v19, 5 }
  0xad   : > { %5862 = vmatmul.mubr.msk.bf16.gmra.mrb[20].mxu0 %vm667_vm5, %v5275_v45  ;;  %8403 = vst [vmem:[#allocation8_spill] sm:$0xff] %v7209_v12  ;;  %v5011_v45 = vcombine.low %v6824_v21, %v6830_v30  ;;  %v2273_v28 = vor.u32 %v2272_v36, %v7209_v12  ;;  %v1175_v21 = vld [vmem:[%s6616_s4 + $0x18] sm:$0xe]  ;;  %v1240_v30 = vrot.slane %v7135_v51, 5  ;;  %v5037_v51 = vrot.slane %v1174_v20, 9  ;;  %v6332_v58 = vld [vmem:[%s6616_s4 + $0x3c] sm:$0xff]  }
  0xae   : > { %5710 = vmatmul.mubr.msk.bf16.gmra.mrb[4].mxu1 %vm667_vm5, %v5007_v43  ;;  %5865 = vmatprep.mubr.msk.bf16.mxu0 %vm667_vm5, %v5276_v46  ;;  %v2893_v43 = vsel %vm6890_vm8, %v2891_v32, %v2892_v34  ;;  %v6326_v46 = vld [vmem:[%s6616_s4 + $0x18] sm:$0xff]   ;;  %v5038_v1 = vrot.slane %v1175_v21, 9  ;;  %v6330_v32 = vld [vmem:[%s6616_s4 + $0x30] sm:$0xff]   ;;  %v5015_v34 = vcombine.low %v6940_v33, %v6946_v38  ;;  %v5016_v42 = vcombine.low %v6970_v7, %v6973_v27  ;;  %v7375_v27 = vld [vmem:[%s6616_s4 + $0x64] sm:$0xf] }
  0xaf   : > { %5713 = vmatprep.mubr.msk.bf16.mxu1 %vm667_vm5, %v5008_v57  ;;  %v5279_v55 = vcombine.low %v2890_v39, %v2893_v43  ;;  %v1233_v57 = vrot.slane %v7124_v40, 5  ;;  %v7229_v40 = vrot.slane %v2276_v56, 5  ;;  %v7232_v2 = vrot.slane %v2273_v28, 4  ;;  %v1178_v10 = vld [vmem:[%s6616_s4 + $0x3c] sm:$0xe]  ;;  %v6336_v33 = vld [vmem:[%s6616_s4 + $0x54] sm:$0xff]  }
  0xb0   : > { %v1254_v35 = vrot.slane %v7174_v37, 5  ;;  %v7263_v19 = vsel %vm6890_vm8, %v5036_v0, %v1226_v54  ;;  %v1261_v39 = vrot.slane %v7194_v5, 5  ;;  %v7273_v37 = vsel %vm6890_vm8, %v1228_v8, %v1229_v24  ;;  %v6380_v56 = vld [vmem:[%s6616_s4 + $0x2c] sm:$0x1]  ;;  %v6381_v20 = vld [vmem:[%s6616_s4 + $0x38] sm:$0x1] }
  0xb1   : > { %8404 = vst [vmem:[#allocation9_spill] sm:$0xff] %v7229_v40  ;;  %8405 = vst [vmem:[#allocation10_spill] sm:$0xff] %v7232_v2  ;;  %v1235_v26 = vrot.slane %v1233_v57, 4  ;;  %v7267_v61 = vsel %vm6890_vm8, %v5037_v51, %v1233_v57  ;;  %v7281_v36 = vsel %vm6890_vm8, %v5038_v1, %v1240_v30  ;;  %v5040_v28 = vrot.slane %v1177_v13, 9  ;;  %v5361_v18 = vld [vmem:[%s6616_s4 + $0x18] sm:$0xf] }
  0xb2   : > { %v1256_v54 = vrot.slane %v1254_v35, 4  ;;  %v1257_v21 = vrot.slane %v6381_v20, 5  ;;  %v6334_v24 = vld [vmem:[%s6616_s4 + $0x48] sm:$0xff]   ;;  %v7302_v44 = vsel %vm716_vm1, %v7148_v17, 0  ;;  %v1180_v1 = vld [vmem:[%s6616_s4 + $0x54] sm:$0xe] }
  0xb3   : > { %v7277_v43 = vsel %vm6890_vm8, %v1235_v26, %v1236_v59  ;;  %v1263_v59 = vrot.slane %v1261_v39, 4  ;;  %v6383_v0 = vld [vmem:[%s6616_s4 + $0x4c] sm:$0xf]  ;;  %v5364_v13 = vld [vmem:[%s6616_s4 + $0x24] sm:$0xf]  ;;  %vm4818_vm9 = vcmask (!%p5507_p0), 7168  }
  0xb4   : > { %v1268_v51 = vrot.slane %v6383_v0, 5  ;;  %v3626_v20 = vshll.u32 %v5364_v13, 16  ;;  %v5366_v17 = vld [vmem:[%s6616_s4 + $0x2c] sm:$0x1]  ;;  %v6389_v8 = vld [vmem:[%s6616_s4 + $0x70] sm:$0xf] }
  0xb5   : > { %5866 = vmatmul.mubr.msk.bf16.gmra.mrb[24].mxu0 %vm667_vm5, %v5277_v14  ;;  %v1242_v14 = vrot.slane %v1240_v30, 4  ;;  %v5041_v30 = vrot.slane %v1178_v10, 9  ;;  %v6384_v10 = vld [vmem:[%s6616_s4 + $0x50] sm:$0x1]  ;;  %v6399_v2 = vld [vmem:[%s6616_s4 + $0xa4] sm:$0x1] }
  0xb6   : > { %5714 = vmatmul.mubr.msk.bf16.gmra.mrb[8].mxu1 %vm667_vm5, %v5009_v50  ;;  %5869 = vmatprep.mubr.msk.bf16.mxu0 %vm667_vm5, %v5278_v23  ;;  %v5014_v50 = vcombine.low %v6914_v49, %v6917_v53  ;;  %v6379_v23 = vld [vmem:[%s6616_s4 + $0x20] sm:$0x1]  ;;  %v7257_v49 = vld [vmem:[%s8381_s1 + $0x10] sm:$0x3]  ;;  %v5018_v53 = vcombine.low %v7018_v41, %v7025_v48 }
  0xb7   : > { %5717 = vmatprep.mubr.msk.bf16.mxu1 %vm667_vm5, %v5010_v9  ;;  %v1243_v29 = vrot.slane %v6379_v23, 5  ;;  %v5017_v9 = vcombine.low %v6992_v15, %v7003_v60  ;;  %v7328_v23 = vsel %vm6890_vm8, %v5040_v28, %v1254_v35  ;;  %v1270_v35 = vrot.slane %v1268_v51, 4 }
  0xb9   : > { %v7289_v5 = vsel %vm6890_vm8, %v1242_v14, %v1243_v29 }
  0xbd   : > { %5870 = vmatmul.mubr.msk.bf16.gmra.mrb[28].mxu0 %vm667_vm5, %v5279_v55  ;;  %v5039_v55 = vrot.slane %v1176_v62, 9  ;;  %v5362_v62 = vld [vmem:[%s6616_s4 + $0x1c] sm:$0xf] }
  0xbe   : > { %5718 = vmatmul.mubr.msk.bf16.gmra.mrb[12].mxu1 %vm667_vm5, %v5011_v45  ;;  %5875 = vmatprep.mubr.msk.bf16.mxu0 %vm667_vm5, %v6326_v46  ;;  %v7284_v45 = vld [vmem:[%s6616_s4 + $0x48] sm:$0xe]  ;;  %v1249_v46 = vrot.slane %v1247_v3, 4  ;;  %v3612_v28 = vshrl.u32 %v5362_v62, 16 }
  0xbf   : > { %5721 = vmatprep.mubr.msk.bf16.mxu1 %vm667_vm5, %v5012_v6  ;;  %v1250_v6 = vrot.slane %v6380_v56, 5  ;;  %v7317_v26 = vsel %vm6890_vm8, %v5039_v55, %v1247_v3  ;;  %v5042_v29 = vrot.slane %v7284_v45, 9  ;;  %v7334_v56 = vsel %vm6890_vm8, %v1256_v54, %v1257_v21 }
  0xc0   : > { %v7338_v3 = vsel %vm6890_vm8, %v5041_v30, %v1261_v39  ;;  %v3599_v55 = vshrl.u32 %v5361_v18, 16  ;;  %v3608_v45 = vshll.u32 %v5362_v62, 16  ;;  %v3623_v54 = vshrl.u32 %v5364_v13, 16  ;;  %v6338_v62 = vld [vmem:[%s6616_s4 + $0x60] sm:$0xff]  }
  0xc1   : > { %v7324_v14 = vsel %vm6890_vm8, %v1249_v46, %v1250_v6  ;;  %v3602_v46 = vshll.u32 %v5361_v18, 16  ;;  %v5043_v18 = vrot.slane %v1180_v1, 9  ;;  %v5363_v1 = vld [vmem:[%s6616_s4 + $0x20] sm:$0x1] }
  0xc2   : > { %v7379_v13 = vrot.slane %v3608_v45, 5 }
  0xc3   : > { %v3604_v0 = vrot.slane %v3602_v46, 5  ;;  %v5367_v46 = vld [vmem:[%s6616_s4 + $0x30] sm:$0xf] }
  0xc5   : > { %5876 = vmatmul.mubr.msk.bf16.vlgmr.msra.gmra.mrb[0].mxu0 %vm667_vm5, %v6328_v47 }
  0xc6   : > { %5722 = vmatmul.mubr.msk.bf16.gmra.mrb[16].mxu1 %vm667_vm5, %v5013_v63  ;;  %5908 = vmatpush3.bf16.msra.mxu0 %v4081_v11  ;;  %v6382_v63 = vld [vmem:[%s6616_s4 + $0x44] sm:$0x1]  ;;  %v3647_v11 = vshrl.u32 %v5367_v46, 16 }
  0xc7   : > { %5725 = vmatprep.mubr.msk.bf16.mxu1 %vm667_vm5, %v5014_v50  ;;  %5879 = vmatprep.mubr.msk.bf16.mxu0 %vm667_vm5, %v6330_v32  ;;  %v1264_v47 = vrot.slane %v6382_v63, 5  ;;  %v5365_v50 = vld [vmem:[%s6616_s4 + $0x28] sm:$0xf]  ;;  %v1271_v32 = vrot.slane %v6384_v10, 5 }
  0xc8   : > { %6242 = vmatprep.subr.msk.bf16.mxu0 %vm716_vm1, %v7257_v49  ;;  %v3632_v21 = vshll.u32 %v5365_v50, 16  ;;  %v3636_v39 = vshrl.u32 %v5365_v50, 16  ;;  %v3625_v50 = vrot.slane %v3623_v54, 4 }
  0xc9   : > { %v7342_v6 = vsel %vm6890_vm8, %v1263_v59, %v1264_v47  ;;  %v6385_v59 = vld [vmem:[%s6616_s4 + $0x58] sm:$0xf]  ;;  %v3601_v47 = vrot.slane %v3599_v55, 4  ;;  %v7372_v7 = vsel %vm6890_vm8, %v1270_v35, %v1271_v32  ;;  %v6387_v35 = vld [vmem:[%s6616_s4 + $0x5c] sm:$0x1] }
  0xca   : > { %v1275_v63 = vrot.slane %v6385_v59, 5  ;;  %v7381_v10 = vrot.slane %v3632_v21, 5  ;;  %v3638_v55 = vrot.slane %v3636_v39, 4  ;;  %v1278_v59 = vrot.slane %v6387_v35, 5  ;;  %v5368_v21 = vld [vmem:[%s6616_s4 + $0x34] sm:$0xf] }
  0xcb   : > { %v3605_v54 = vor.u32 %v3604_v0, %v3601_v47  ;;  %v1182_v35 = vld [vmem:[%s6616_s4 + $0x6c] sm:$0xe]  ;;  %v3642_v47 = vshll.u32 %v5366_v17, 16  ;;  %v6390_v0 = vld [vmem:[%s6616_s4 + $0x7c] sm:$0xf] }
  0xcc   : > { %v1277_v32 = vrot.slane %v1275_v63, 4  ;;  %v6391_v17 = vld [vmem:[%s6616_s4 + $0x74] sm:$0x1] }
  0xcd   : > { %5880 = vmatmul.mubr.msk.bf16.gmra.mrb[4].mxu0 %vm667_vm5, %v6332_v58  ;;  %v6388_v58 = vld [vmem:[%s6616_s4 + $0x68] sm:$0x1]  ;;  %v3606_v15 = vrot.slane %v3605_v54, 4 }
  0xce   : > { %5726 = vmatmul.mubr.msk.bf16.gmra.mrb[20].mxu1 %vm667_vm5, %v5015_v34  ;;  %5883 = vmatprep.mubr.msk.bf16.mxu0 %vm667_vm5, %v6334_v24  ;;  %v7364_v34 = vsel %vm6890_vm8, %v5042_v29, %v1268_v51  ;;  %v7367_v24 = vld [vmem:[%s6616_s4 + $0x60] sm:$0xe]  ;;  %v3614_v51 = vrot.slane %v3612_v28, 4  ;;  %v3628_v29 = vrot.slane %v3626_v20, 5  ;;  %v1285_v30 = vrot.slane %v6388_v58, 5 }
  0xcf   : > { %5729 = vmatprep.mubr.msk.bf16.mxu1 %vm667_vm5, %v5016_v42  ;;  %v8383_v42 = vrot.slane %v7375_v27, 5  ;;  %v5044_v38 = vrot.slane %v7367_v24, 9  ;;  %v7392_v28 = vsel %vm6890_vm8, %v5043_v18, %v1275_v63  ;;  %v3618_v20 = vshll.u32 %v5363_v1, 16 }
  0xd0   : > { %v3615_v39 = vor.u32 %v3614_v51, %v7379_v13  ;;  %v1289_v24 = vrot.slane %v6389_v8, 5  ;;  %v3650_v58 = vshll.u32 %v5367_v46, 16  ;;  %v3629_v18 = vor.u32 %v3628_v29, %v3625_v50 }
  0xd1   : > { %v1284_v45 = vrot.slane %v8383_v42, 4  ;;  %v3639_v63 = vor.u32 %v3638_v55, %v7381_v10  ;;  %v7409_v8 = vsel %vm6890_vm8, %v1277_v32, %v1278_v59  ;;  %v1296_v1 = vrot.slane %v6390_v0, 5  ;;  %v6340_v59 = vld [vmem:[%s6616_s4 + $0x6c] sm:$0xff]   ;;  %v6341_v0 = vld [vmem:[%s6616_s4 + $0x78] sm:$0xff]  }
  0xd2   : > { %v3656_v51 = vshll.u32 %v5368_v21, 16  ;;  %v3660_v50 = vshrl.u32 %v5368_v21, 16  ;;  %v3620_v60 = vrot.slane %v3618_v20, 5  ;;  %v3616_v29 = vrot.slane %v3615_v39, 4  ;;  %v7422_v20 = vld [vmem:[%s6616_s4 + $0x38] sm:$0x1] }
  0xd3   : > { %v1291_v55 = vrot.slane %v1289_v24, 4  ;;  %v3649_v46 = vrot.slane %v3647_v11, 4  ;;  %v3652_v32 = vrot.slane %v3650_v58, 5  ;;  %v3630_v21 = vrot.slane %v3629_v18, 4  ;;  %8406 = vst [vmem:[#allocation11_spill] sm:$0xff] %v7422_v20 }
  0xd4   : > { %v3640_v57 = vrot.slane %v3639_v63, 4  ;;  %v3644_v42 = vrot.slane %v3642_v47, 5  ;;  %v1298_v48 = vrot.slane %v1296_v1, 4  ;;  %v8407_v39 = vrot.slane %v7375_v27, 5  ;;  %v1184_v47 = vld [vmem:[%s6616_s4 + $0x84] sm:$0xe] }
  0xd5   : > { %5884 = vmatmul.mubr.msk.bf16.gmra.mrb[8].mxu0 %vm667_vm5, %v6336_v33  ;;  %v1183_v33 = vld [vmem:[%s6616_s4 + $0x78] sm:$0xe]  ;;  %v7436_v18 = vsel %vm6890_vm8, %v1284_v45, %v1285_v30  ;;  %v3621_v30 = vsel %vm6660_vm4, %v3616_v29, %v3620_v60  ;;  %v3635_v45 = vsel %vm6660_vm4, %v3630_v21, %v7381_v10  ;;  %v8409_v29 = vcombine.low %v7263_v19, %v7273_v37 }
  0xd6   : > { %5730 = vmatmul.mubr.msk.bf16.gmra.mrb[24].mxu1 %vm667_vm5, %v5017_v9  ;;  %5887 = vmatprep.mubr.msk.bf16.mxu0 %vm667_vm5, %v6338_v62  ;;  %v5045_v9 = vrot.slane %v1182_v35, 9  ;;  %v1292_v62 = vrot.slane %v6391_v17, 5  ;;  %v5046_v41 = vrot.slane %v1183_v33, 9  ;;  %v7424_v35 = vrot.slane %v3656_v51, 5 }
  0xd7   : > { %5733 = vmatprep.mubr.msk.bf16.mxu1 %vm667_vm5, %v5018_v53  ;;  %v6392_v53 = vld [vmem:[%s6616_s4 + $0x80] sm:$0x1]  ;;  %v3662_v17 = vrot.slane %v3660_v50, 4  ;;  %v7432_v58 = vsel %vm6890_vm8, %v5044_v38, %v8407_v39  ;;  %v3611_v33 = vsel %vm6660_vm4, %v3606_v15, %v7379_v13  ;;  %v3653_v51 = vor.u32 %v3652_v32, %v3649_v46  ;;  %v6393_v38 = vld [vmem:[%s6616_s4 + $0x88] sm:$0xf] }
  0xd8   : > { %v1299_v54 = vrot.slane %v6392_v53, 5  ;;  %v7440_v63 = vsel %vm6890_vm8, %v5045_v9, %v1289_v24  ;;  %v7448_v27 = vsel %vm6890_vm8, %v1291_v55, %v1292_v62  ;;  %v1303_v50 = vrot.slane %v6393_v38, 5  ;;  %v5370_v15 = vld [vmem:[%s6616_s4 + $0x3c] sm:$0xf]  ;;  %v6394_v55 = vld [vmem:[%s6616_s4 + $0x8c] sm:$0x1] }
  0xd9   : > { %v7459_v13 = vsel %vm6890_vm8, %v5046_v41, %v1296_v1  ;;  %v3666_v24 = vshll.u32 %v7422_v20, 16  ;;  %v8408_v9 = vcombine.low %v7048_v16, %v7053_v25  ;;  %v3645_v60 = vsel %vm6660_vm4, %v3640_v57, %v3644_v42  ;;  %v7489_v32 = vld [vmem:[%s6616_s4 + $0x40] sm:$0xf]  ;;  %v7493_v41 = vld [vmem:[%s6616_s4 + $0x4c] sm:$0xf] }
  0xda   : > { %v7472_v10 = vsel %vm6890_vm8, %v1298_v48, %v1299_v54  ;;  %v3663_v1 = vor.u32 %v3662_v17, %v7424_v35  ;;  %v5047_v62 = vrot.slane %v1184_v47, 9  ;;  %v7485_v42 = vsel %vm716_vm1, %v7257_v49, 0  ;;  %8410 = vst [vmem:[#allocation12_spill] sm:$0xff] %v7489_v32  ;;  %v6342_v48 = vld [vmem:[%s6616_s4 + $0x84] sm:$0xff]   ;;  %v5376_v39 = vld [vmem:[%s6616_s4 + $0x54] sm:$0xf] }
  0xdb   : > { %v1306_v46 = vrot.slane %v6394_v55, 5  ;;  %v3654_v19 = vrot.slane %v3653_v51, 4  ;;  %v1305_v37 = vrot.slane %v1303_v50, 4  ;;  %v3674_v21 = vshll.u32 %v5370_v15, 16  ;;  %v6343_v47 = vld [vmem:[%s6616_s4 + $0x90] sm:$0xff]  }
  0xdc   : > { %v7496_v53 = vcombine.low %v3611_v33, %v3621_v30  ;;  %v7498_v54 = vcombine.low %v3635_v45, %v3645_v60  ;;  %v3668_v17 = vrot.slane %v3666_v24, 5  ;;  %v3664_v51 = vrot.slane %v3663_v1, 4  ;;  %v7511_v33 = vld [vmem:[%s6616_s4 + $0x58] sm:$0xf]  ;;  %v7514_v30 = vld [vmem:[%s6616_s4 + $0x44] sm:$0x1] }
  0xdd   : > { %5888 = vmatmul.mubr.msk.bf16.gmra.mrb[12].mxu0 %vm667_vm5, %v6340_v59  ;;  %v5373_v59 = vld [vmem:[%s6616_s4 + $0x48] sm:$0xf]  ;;  %v7506_v38 = vsel %vm6890_vm8, %v5047_v62, %v1303_v50  ;;  %8411 = vst [vmem:[#allocation13_spill] sm:$0xff] %v7514_v30  ;;  %v3704_v24 = vshll.u32 %v7493_v41, 16  ;;  %v3659_v1 = vsel %vm6660_vm4, %v3654_v19, %v7424_v35  ;;  %v7523_v50 = vsel %vm6890_vm8, %v1305_v37, %v1306_v46  ;;  %v7527_v49 = vld [vmem:[%s6616_s4 + $0x90] sm:$0xe] }
  0xde   : > { %5734 = vmatmul.mubr.msk.bf16.gmra.mrb[28].mxu1 %vm667_vm5, %v8408_v9  ;;  %5891 = vmatprep.mubr.msk.bf16.mxu0 %vm667_vm5, %v6341_v0  ;;  %v3671_v0 = vshrl.u32 %v5370_v15, 16  ;;  %v3680_v15 = vshll.u32 %v7489_v32, 16  ;;  %v3684_v9 = vshrl.u32 %v7489_v32, 16  ;;  %v3695_v45 = vshrl.u32 %v5373_v59, 16  ;;  %v6398_v20 = vld [vmem:[%s6616_s4 + $0xa0] sm:$0xf] }
  0xdf   : > { %5739 = vmatprep.mubr.msk.bf16.mxu1 %vm667_vm5, %v8409_v29  ;;  %v3698_v60 = vshll.u32 %v5373_v59, 16  ;;  %v3708_v29 = vshrl.u32 %v7493_v41, 16  ;;  %v3676_v55 = vrot.slane %v3674_v21, 5  ;;  %v3719_v59 = vshrl.u32 %v5376_v39, 16 }
  0xe0   : > { %v3673_v62 = vrot.slane %v3671_v0, 4  ;;  %v3722_v57 = vshll.u32 %v5376_v39, 16  ;;  %v3728_v16 = vshll.u32 %v7511_v33, 16  ;;  %v3732_v11 = vshrl.u32 %v7511_v33, 16 }
  0xe1   : > { %v8412_v35 = vcombine.low %v7267_v61, %v7277_v43  ;;  %v3669_v46 = vsel %vm6660_vm4, %v3664_v51, %v3668_v17  ;;  %v7538_v19 = vrot.slane %v3680_v15, 5  ;;  %v3686_v37 = vrot.slane %v3684_v9, 4  ;;  %v7547_v61 = vld [vmem:[%s6616_s4 + $0x50] sm:$0x1]  ;;  %v7557_v9 = vld [vmem:[%s6616_s4 + $0x5c] sm:$0x1] }
  0xe2   : > { %v3690_v0 = vshll.u32 %v7514_v30, 16  ;;  %v8413_v21 = vcombine.low %v7281_v36, %v7289_v5  ;;  %v3697_v43 = vrot.slane %v3695_v45, 4  ;;  %v7549_v39 = vrot.slane %v3704_v24, 5  ;;  %v6395_v36 = vld [vmem:[%s6616_s4 + $0x94] sm:$0xf] }
  0xe3   : > { %v3710_v17 = vrot.slane %v3708_v29, 4  ;;  %v3677_v15 = vor.u32 %v3676_v55, %v3673_v62  ;;  %v1310_v5 = vrot.slane %v6395_v36, 5  ;;  %v6396_v45 = vld [vmem:[%s8381_s1 + $0x8] sm:$0x3]  ;;  %v3724_v24 = vrot.slane %v3722_v57, 5 }
  0xe4   : > { %v7563_v29 = vrot.slane %v3728_v16, 5  ;;  %v3734_v62 = vrot.slane %v3732_v11, 4  ;;  %v6345_v55 = vld [vmem:[%s6616_s4 + $0xa8] sm:$0xff]   ;;  %v7570_v36 = vrot.slane %v3690_v0, 5  ;;  %v3714_v51 = vshll.u32 %v7547_v61, 16 }
  0xe5   : > { %5892 = vmatmul.mubr.msk.bf16.gmra.mrb[16].mxu0 %vm667_vm5, %v6342_v48  ;;  %v3700_v48 = vrot.slane %v3698_v60, 5  ;;  %v3721_v60 = vrot.slane %v3719_v59, 4  ;;  %v7574_v30 = vld [vmem:[%s6616_s4 + $0x64] sm:$0xf]  ;;  %v3711_v57 = vor.u32 %v3710_v17, %v7549_v39  ;;  %v1186_v16 = vld [vmem:[%s6616_s4 + $0x9c] sm:$0xe] }
  0xe6   : > { %5740 = vmatmul.mubr.msk.bf16.vlgmr.msra.gmra.mrb[0].mxu1 %vm667_vm5, %v8412_v35  ;;  %5895 = vmatprep.mubr.msk.bf16.mxu0 %vm667_vm5, %v6343_v47  ;;  %v6344_v47 = vld [vmem:[%s6616_s4 + $0x9c] sm:$0xff]   ;;  %v7567_v35 = vcombine.low %v3659_v1, %v3669_v46  ;;  %8414 = vst [vmem:[#allocation14_spill] sm:$0xff] %v7574_v30  ;;  %v1317_v11 = vrot.slane %v6398_v20, 5  ;;  %v7580_v12 = vrot.slane %v3677_v15, 4  ;;  %v3738_v1 = vshll.u32 %v7557_v9, 16 }
  0xe7   : > { %5772 = vmatpush3.bf16.msra.mxu1 %v7302_v44  ;;  %5743 = vmatprep.mubr.msk.bf16.mxu1 %vm667_vm5, %v8413_v21  ;;  %v5048_v44 = vrot.slane %v7527_v49, 9  ;;  %v5379_v49 = vld [vmem:[%s6616_s4 + $0x60] sm:$0xf]  ;;  %v3687_v21 = vor.u32 %v3686_v37, %v7538_v19  ;;  %v3701_v59 = vor.u32 %v3700_v48, %v3697_v43  ;;  %v3725_v0 = vor.u32 %v3724_v24, %v3721_v60 }
  0xe8   : > { %6238 = vmatprep.subr.msk.bf16.mxu1 %vm716_vm1, %v6396_v45  ;;  %v6397_v45 = vld [vmem:[%s6616_s4 + $0x98] sm:$0x1]  ;;  %v3743_v46 = vshrl.u32 %v5379_v49, 16  ;;  %v3746_v37 = vshll.u32 %v5379_v49, 16  ;;  %v3735_v4 = vor.u32 %v3734_v62, %v7563_v29  ;;  %v3752_v43 = vshll.u32 %v7574_v30, 16 }
  0xe9   : > { %v1313_v32 = vrot.slane %v6397_v45, 5  ;;  %v3756_v48 = vshrl.u32 %v7574_v30, 16  ;;  %v8415_v20 = vcombine.low %v7317_v26, %v7324_v14  ;;  %v3688_v17 = vrot.slane %v3687_v21, 4 }
  0xea   : > { %v1312_v15 = vrot.slane %v1310_v5, 4  ;;  %v5049_v60 = vrot.slane %v1186_v16, 9  ;;  %v8416_v24 = vcombine.low %v7328_v23, %v7334_v56  ;;  %v3702_v62 = vrot.slane %v3701_v59, 4 }
  0xeb   : > { %v3712_v49 = vrot.slane %v3711_v57, 4  ;;  %v1319_v45 = vrot.slane %v1317_v11, 4  ;;  %v1320_v26 = vrot.slane %v6399_v2, 5  ;;  %v3740_v14 = vrot.slane %v3738_v1, 5  ;;  %v6347_v57 = vld [vmem:[%s6616_s4 + $0xc0] sm:$0xff]  }
  0xec   : > { %v3745_v40 = vrot.slane %v3743_v46, 4  ;;  %v3748_v30 = vrot.slane %v3746_v37, 5  ;;  %v3726_v16 = vrot.slane %v3725_v0, 4  ;;  %v3736_v23 = vrot.slane %v3735_v4, 4  ;;  %v7619_v37 = vld [vmem:[%s6616_s4 + $0x68] sm:$0x1] }
  0xed   : > { %5896 = vmatmul.mubr.msk.bf16.gmra.mrb[20].mxu0 %vm667_vm5, %v6344_v47  ;;  %v3716_v47 = vrot.slane %v3714_v51, 5  ;;  %v6346_v51 = vld [vmem:[%s6616_s4 + $0xb4] sm:$0xff]   ;;  %v7600_v56 = vrot.slane %v3752_v43, 5  ;;  %v3758_v59 = vrot.slane %v3756_v48, 4  ;;  %v3683_v2 = vsel %vm6660_vm4, %v7580_v12, %v7538_v19  ;;  %8417 = vst [vmem:[#allocation15_spill] sm:$0xff] %v7619_v37 }
  0xee   : > { %5744 = vmatmul.mubr.msk.bf16.gmra.mrb[4].mxu1 %vm667_vm5, %v8415_v20  ;;  %5899 = vmatprep.mubr.msk.bf16.mxu0 %vm667_vm5, %v6345_v55  ;;  %v1187_v20 = vld [vmem:[%s6616_s4 + $0xa8] sm:$0xe]  ;;  %v6400_v55 = vld [vmem:[%s6616_s4 + $0xac] sm:$0xf]  ;;  %v3693_v1 = vsel %vm6660_vm4, %v3688_v17, %v7570_v36  ;;  %v7612_v46 = vsel %vm6890_vm8, %v5048_v44, %v1310_v5  ;;  %v7616_v4 = vsel %vm6890_vm8, %v1312_v15, %v1313_v32  ;;  %v1188_v5 = vld [vmem:[%s6616_s4 + $0xb4] sm:$0xe] }
  0xef   : > { %5747 = vmatprep.mubr.msk.bf16.mxu1 %vm667_vm5, %v8416_v24  ;;  %v1324_v21 = vrot.slane %v6400_v55, 5  ;;  %v3707_v0 = vsel %vm6660_vm4, %v3702_v62, %v7549_v39  ;;  %v7626_v12 = vsel %vm6890_vm8, %v5049_v60, %v1317_v11  ;;  %v7630_v19 = vsel %vm6890_vm8, %v1319_v45, %v1320_v26  ;;  %v5382_v36 = vld [vmem:[%s6616_s4 + $0x6c] sm:$0xf]  ;;  %v6401_v48 = vld [vmem:[%s6616_s4 + $0xb0] sm:$0x1] }
  0xf0   : > { %8418 = vst [vmem:[#allocation16_spill] sm:$0xff] %v7630_v19  ;;  %v5050_v44 = vrot.slane %v1187_v20, 9  ;;  %v3717_v32 = vsel %vm6660_vm4, %v3712_v49, %v3716_v47  ;;  %v1327_v17 = vrot.slane %v6401_v48, 5  ;;  %v3749_v39 = vor.u32 %v3748_v30, %v3745_v40  ;;  %v7654_v62 = vld [vmem:[%s6616_s4 + $0x70] sm:$0xf] }
  0xf1   : > { %v1326_v43 = vrot.slane %v1324_v21, 4  ;;  %v3731_v11 = vsel %vm6660_vm4, %v3726_v16, %v7563_v29  ;;  %v3741_v15 = vsel %vm6660_vm4, %v3736_v23, %v3740_v14  ;;  %v3759_v60 = vor.u32 %v3758_v59, %v7600_v56  ;;  %8420 = vst [vmem:[#allocation17_spill] sm:$0xff] %v7654_v62  ;;  %v5385_v20 = vld [vmem:[%s6616_s4 + $0x78] sm:$0xf]  ;;  %v7673_v55 = vld [vmem:[%s6616_s4 + $0x7c] sm:$0xf] }
  0xf2   : > { %v3762_v47 = vshll.u32 %v7619_v37, 16  ;;  %v8419_v24 = vcombine.low %v7338_v3, %v7342_v6  ;;  %v5051_v30 = vrot.slane %v1188_v5, 9  ;;  %v1331_v29 = vrot.slane %v7053_v25, 5  ;;  %v6348_v3 = vld [vmem:[%s6616_s4 + $0xcc] sm:$0xff]   ;;  %8422 = vst [vmem:[#allocation18_spill] sm:$0xff] %v7673_v55 }
  0xf3   : > { %v3767_v49 = vshrl.u32 %v5382_v36, 16  ;;  %v8421_v45 = vcombine.low %v7364_v34, %v7372_v7  ;;  %v7661_v6 = vcombine.low %v3683_v2, %v3693_v1  ;;  %v7663_v26 = vcombine.low %v3707_v0, %v3717_v32  ;;  %v5388_v23 = vld [vmem:[%s6616_s4 + $0x84] sm:$0xf]  ;;  %v7686_v59 = vld [vmem:[%s6616_s4 + $0x88] sm:$0xf] }
  0xf4   : > { %v7669_v25 = vsel %vm6890_vm8, %v5050_v44, %v1324_v21  ;;  %v7675_v34 = vcombine.low %v3731_v11, %v3741_v15  ;;  %v7679_v7 = vsel %vm6890_vm8, %v1326_v43, %v1327_v17  ;;  %8423 = vst [vmem:[#allocation19_spill] sm:$0xff] %v7686_v59  ;;  %v7690_v21 = vrot.slane %v3762_v47, 5  ;;  %v5391_v0 = vld [vmem:[%s6616_s4 + $0x90] sm:$0xf]  ;;  %v7702_v48 = vld [vmem:[%s6616_s4 + $0x94] sm:$0xf] }
  0xf5   : > { %5900 = vmatmul.mubr.msk.bf16.gmra.mrb[24].mxu0 %vm667_vm5, %v6346_v51  ;;  %v7681_v51 = vrot.slane %v3749_v39, 4  ;;  %v3770_v2 = vshll.u32 %v5382_v36, 16  ;;  %v3776_v1 = vshll.u32 %v7654_v62, 16  ;;  %v7696_v44 = vsel %vm6890_vm8, %v5051_v30, %v1331_v29  ;;  %8424 = vst [vmem:[#allocation20_spill] sm:$0xff] %v7702_v48  ;;  %v7710_v30 = vld [vmem:[%s6616_s4 + $0x74] sm:$0x1] }
  0xf6   : > { %5748 = vmatmul.mubr.msk.bf16.gmra.mrb[8].mxu1 %vm667_vm5, %v8419_v24  ;;  %5903 = vmatprep.mubr.msk.bf16.mxu0 %vm667_vm5, %v6347_v57  ;;  %v7688_v57 = vrot.slane %v3759_v60, 4  ;;  %v7698_v5 = vrot.slane %v1331_v29, 4  ;;  %v3769_v32 = vrot.slane %v3767_v49, 4  ;;  %v3780_v43 = vshrl.u32 %v7654_v62, 16  ;;  %v7727_v16 = vld [vmem:[%s6616_s4 + $0x80] sm:$0x1] }
  0xf7   : > { %5751 = vmatprep.mubr.msk.bf16.mxu1 %vm667_vm5, %v8421_v45  ;;  %v3791_v17 = vshrl.u32 %v5385_v20, 16  ;;  %v3794_v39 = vshll.u32 %v5385_v20, 16  ;;  %v3800_v11 = vshll.u32 %v7673_v55, 16  ;;  %v3804_v36 = vshrl.u32 %v7673_v55, 16 }
  0xf8   : > { %v3815_v15 = vshrl.u32 %v5388_v23, 16  ;;  %v3818_v60 = vshll.u32 %v5388_v23, 16  ;;  %v3824_v47 = vshll.u32 %v7686_v59, 16  ;;  %v3828_v24 = vshrl.u32 %v7686_v59, 16  ;;  %v5394_v59 = vld [vmem:[%s6616_s4 + $0x9c] sm:$0xf] }
  0xf9   : > { %v3839_v29 = vshrl.u32 %v5391_v0, 16  ;;  %v3842_v49 = vshll.u32 %v5391_v0, 16  ;;  %v3848_v45 = vshll.u32 %v7702_v48, 16  ;;  %v3852_v20 = vshrl.u32 %v7702_v48, 16 }
  0xfa   : > { %v8425_v14 = vcombine.low %v7392_v28, %v7409_v8  ;;  %v3772_v23 = vrot.slane %v3770_v2, 5  ;;  %v7724_v0 = vrot.slane %v3776_v1, 5  ;;  %v3782_v40 = vrot.slane %v3780_v43, 4 }
  0xfb   : > { %v8426_v48 = vcombine.low %v7432_v58, %v7436_v18  ;;  %v3793_v28 = vrot.slane %v3791_v17, 4  ;;  %v3796_v8 = vrot.slane %v3794_v39, 5  ;;  %v3817_v2 = vrot.slane %v3815_v15, 4 }
  0xfc   : > { %v3820_v1 = vrot.slane %v3818_v60, 5  ;;  %v7739_v43 = vrot.slane %v3824_v47, 5  ;;  %v3830_v55 = vrot.slane %v3828_v24, 4  ;;  %v3841_v62 = vrot.slane %v3839_v29, 4 }
  0xfd   : > { %5904 = vmatmul.mubr.msk.bf16.gmra.mrb[28].mxu0 %vm667_vm5, %v6348_v3  ;;  %v7737_v3 = vld [vmem:[%s6616_s4 + $0x8c] sm:$0x1]  ;;  %v3844_v37 = vrot.slane %v3842_v49, 5  ;;  %v7741_v58 = vrot.slane %v3848_v45, 5  ;;  %v3854_v18 = vrot.slane %v3852_v20, 4  ;;  %v3773_v17 = vor.u32 %v3772_v23, %v3769_v32 }
  0xfe   : > { %5752 = vmatmul.mubr.msk.bf16.gmra.mrb[12].mxu1 %vm667_vm5, %v8425_v14  ;;  %5909 = vmatprep.mubr.msk.bf16.mxu0 %vm667_vm5, %v7496_v53  ;;  %v7733_v53 = vrot.slane %v3800_v11, 5  ;;  %v3806_v14 = vrot.slane %v3804_v36, 4  ;;  %v3786_v39 = vshll.u32 %v7710_v30, 16  ;;  %v7748_v11 = vld [vmem:[%s6616_s4 + $0x98] sm:$0x1]  ;;  %v3863_v36 = vshrl.u32 %v5394_v59, 16 }
  0xff   : > { %5755 = vmatprep.mubr.msk.bf16.mxu1 %vm667_vm5, %v8426_v48  ;;  %v7744_v48 = vld [vmem:[%s6616_s4 + $0xa0] sm:$0xf]  ;;  %v3866_v19 = vshll.u32 %v5394_v59, 16  ;;  %v3783_v15 = vor.u32 %v3782_v40, %v7724_v0  ;;  %v3797_v60 = vor.u32 %v3796_v8, %v3793_v28  ;;  %v3810_v24 = vshll.u32 %v7727_v16, 16 }
 0x100   : > { %v3807_v47 = vor.u32 %v3806_v14, %v7733_v53  ;;  %v3821_v29 = vor.u32 %v3820_v1, %v3817_v2  ;;  %v3834_v49 = vshll.u32 %v7737_v3, 16  ;;  %v3872_v45 = vshll.u32 %v7744_v48, 16 }
 0x101   : > { %v3876_v32 = vshrl.u32 %v7744_v48, 16  ;;  %v3831_v20 = vor.u32 %v3830_v55, %v7739_v43  ;;  %v3845_v59 = vor.u32 %v3844_v37, %v3841_v62  ;;  %v3855_v40 = vor.u32 %v3854_v18, %v7741_v58  ;;  %v5397_v55 = vld [vmem:[%s6616_s4 + $0xa8] sm:$0xf] }
 0x102   : > { %v3858_v23 = vshll.u32 %v7748_v11, 16  ;;  %v8427_v28 = vcombine.low %v7440_v63, %v7448_v27  ;;  %v3774_v8 = vrot.slane %v3773_v17, 4  ;;  %v3788_v14 = vrot.slane %v3786_v39, 5 }
 0x103   : > { %v3865_v2 = vrot.slane %v3863_v36, 4  ;;  %v3868_v1 = vrot.slane %v3866_v19, 5  ;;  %v3784_v37 = vrot.slane %v3783_v15, 4  ;;  %v3798_v63 = vrot.slane %v3797_v60, 4  ;;  %v7783_v60 = vld [vmem:[%s6616_s4 + $0xac] sm:$0xf] }
 0x104   : > { %v3808_v27 = vrot.slane %v3807_v47, 4  ;;  %v3812_v62 = vrot.slane %v3810_v24, 5  ;;  %v3836_v18 = vrot.slane %v3834_v49, 5  ;;  %v7773_v17 = vrot.slane %v3872_v45, 5 }
 0x105   : > { %5910 = vmatmul.mubr.msk.bf16.vlgmr.msra.gmra.mrb[0].mxu0 %vm667_vm5, %v7498_v54  ;;  %v8428_v54 = vcombine.low %v7459_v13, %v7472_v10  ;;  %v3878_v19 = vrot.slane %v3876_v32, 4  ;;  %v3832_v39 = vrot.slane %v3831_v20, 4  ;;  %v3846_v36 = vrot.slane %v3845_v59, 4 }
 0x106   : > { %5756 = vmatmul.mubr.msk.bf16.gmra.mrb[16].mxu1 %vm667_vm5, %v8427_v28  ;;  %5942 = vmatpush3.bf16.msra.mxu0 %v7485_v42  ;;  %v3822_v42 = vrot.slane %v3821_v29, 4  ;;  %v3856_v13 = vrot.slane %v3855_v40, 4  ;;  %v3860_v10 = vrot.slane %v3858_v23, 5  ;;  %v7776_v28 = vld [vmem:[%s6616_s4 + $0xa4] sm:$0x1]  ;;  %v3869_v15 = vor.u32 %v3868_v1, %v3865_v2 }
 0x107   : > { %5759 = vmatprep.mubr.msk.bf16.mxu1 %vm667_vm5, %v8428_v54  ;;  %5913 = vmatprep.mubr.msk.bf16.mxu0 %vm667_vm5, %v7567_v35  ;;  %v3765_v35 = vsel %vm6660_vm4, %v7688_v57, %v7690_v21  ;;  %v3887_v47 = vshrl.u32 %v5397_v55, 16  ;;  %v3890_v24 = vshll.u32 %v5397_v55, 16  ;;  %v8429_v29 = vrot.slane %v7059_v52, 5  ;;  %v7817_v40 = vld [vmem:[%s6616_s4 + $0xb0] sm:$0x1] }
 0x108   : > { %v3779_v45 = vsel %vm6660_vm4, %v3774_v8, %v7724_v0  ;;  %v3789_v57 = vsel %vm6660_vm4, %v3784_v37, %v3788_v14  ;;  %v3803_v21 = vsel %vm6660_vm4, %v3798_v63, %v7733_v53  ;;  %v3813_v32 = vsel %vm6660_vm4, %v3808_v27, %v3812_v62  ;;  %v7828_v2 = vld [vmem:[%s6616_s4 + $0xb4] sm:$0xf]  ;;  %v5446_v63 = vld [vmem:[%s6616_s4 + $0x48] sm:$0xe] }
 0x109   : > { %v7790_v49 = vsel %vm6890_vm8, %v7698_v5, %v8429_v29  ;;  %v3827_v52 = vsel %vm6660_vm4, %v3822_v42, %v7739_v43  ;;  %v3879_v5 = vor.u32 %v3878_v19, %v7773_v17  ;;  %v3882_v20 = vshll.u32 %v7776_v28, 16 }
 0x10a   : > { %v3837_v0 = vsel %vm6660_vm4, %v3832_v39, %v3836_v18  ;;  %v3851_v53 = vsel %vm6660_vm4, %v3846_v36, %v7741_v58  ;;  %v3861_v59 = vsel %vm6660_vm4, %v3856_v13, %v3860_v10  ;;  %v3896_v43 = vshll.u32 %v7783_v60, 16 }
 0x10b   : > { %v8430_v23 = vcombine.low %v7506_v38, %v7523_v50  ;;  %v3889_v8 = vrot.slane %v3887_v47, 4  ;;  %v3892_v58 = vrot.slane %v3890_v24, 5  ;;  %v3900_v14 = vshrl.u32 %v7783_v60, 16  ;;  %v5448_v47 = vld [vmem:[%s6616_s4 + $0x60] sm:$0xe] }
 0x10c   : > { %v8431_v1 = vcombine.low %v7612_v46, %v7616_v4  ;;  %v5067_v38 = vcombine.low %v7669_v25, %v7679_v7  ;;  %v8432_v50 = vsel %vm6660_vm4, %v7681_v51, %v7600_v56  ;;  %v5068_v54 = vcombine.low %v7696_v44, %v7790_v49  ;;  %v5447_v25 = vld [vmem:[%s6616_s4 + $0x54] sm:$0xe]  ;;  %v7857_v51 = vld [vmem:[%s6616_s4 + $0xb8] sm:$0xf]  ;;  %v8439_v49 = vld [vmem:[#allocation9_spill] sm:$0xff] }
 0x10d   : > { %5914 = vmatmul.mubr.msk.bf16.gmra.mrb[4].mxu0 %vm667_vm5, %v7661_v6  ;;  %v3870_v6 = vrot.slane %v3869_v15, 4  ;;  %v7843_v37 = vcombine.low %v3779_v45, %v3789_v57  ;;  %v7846_v27 = vcombine.low %v3803_v21, %v3813_v32  ;;  %v3880_v46 = vrot.slane %v3879_v5, 4  ;;  %v5449_v32 = vld [vmem:[%s6616_s4 + $0x6c] sm:$0xe] }
 0x10e   : > { %5760 = vmatmul.mubr.msk.bf16.gmra.mrb[20].mxu1 %vm667_vm5, %v8430_v23  ;;  %5917 = vmatprep.mubr.msk.bf16.mxu0 %vm667_vm5, %v7663_v26  ;;  %v5416_v26 = vcombine.low %v8432_v50, %v3765_v35  ;;  %v3884_v4 = vrot.slane %v3882_v20, 5  ;;  %v3906_v62 = vshll.u32 %v7817_v40, 16  ;;  %v7850_v7 = vcombine.low %v3827_v52, %v3837_v0  ;;  %v8433_v52 = vld [vmem:[#allocation16_spill] sm:$0xff] }
 0x10f   : > { %5763 = vmatprep.mubr.msk.bf16.mxu1 %vm667_vm5, %v8431_v1  ;;  %v7852_v55 = vcombine.low %v3851_v53, %v3861_v59  ;;  %v7854_v56 = vrot.slane %v3896_v43, 5  ;;  %v3911_v42 = vshrl.u32 %v7828_v2, 16  ;;  %v3875_v18 = vsel %vm6660_vm4, %v3870_v6, %v7773_v17  ;;  %v8435_v53 = vld [vmem:[#allocation14_spill] sm:$0xff]  ;;  %v8436_v43 = vld [vmem:[#allocation15_spill] sm:$0xff]  ;;  %v7903_v6 = vld [vmem:[%s6616_s4 + $0xbc] sm:$0x1] }
 0x110   : > { %v3893_v19 = vor.u32 %v3892_v58, %v3889_v8  ;;  %v3902_v39 = vrot.slane %v3900_v14, 4  ;;  %v3914_v36 = vshll.u32 %v7828_v2, 16  ;;  %v5462_v13 = vrot.slane %v5446_v63, 9  ;;  %v8437_v2 = vld [vmem:[#allocation17_spill] sm:$0xff] }
 0x111   : > { %v4370_v10 = vrot.slane %v7493_v41, 5  ;;  %v4373_v35 = vrot.slane %v7547_v61, 5  ;;  %v5463_v15 = vrot.slane %v5447_v25, 9  ;;  %v3885_v24 = vsel %vm6660_vm4, %v3880_v46, %v3884_v4  ;;  %v7924_v25 = vld [vmem:[%s6616_s4 + $0xc4] sm:$0xf] }
 0x112   : > { %v7869_v29 = vrot.slane %v3906_v62, 5  ;;  %v3920_v45 = vshll.u32 %v7857_v51, 16  ;;  %v4377_v17 = vrot.slane %v7511_v33, 5  ;;  %v7875_v57 = vrot.slane %v3911_v42, 4 }
 0x113   : > { %v7879_v41 = vsel %vm6890_vm8, %v5462_v13, %v4370_v10  ;;  %v4372_v61 = vrot.slane %v4370_v10, 4  ;;  %v4380_v21 = vrot.slane %v7557_v9, 5  ;;  %v8434_v5 = vcombine.low %v7626_v12, %v8433_v52  ;;  %v5451_v52 = vld [vmem:[%s6616_s4 + $0x84] sm:$0xe] }
 0x114   : > { %v7888_v33 = vrot.slane %v3893_v19, 4  ;;  %v4379_v20 = vrot.slane %v4377_v17, 4  ;;  %v5464_v0 = vrot.slane %v5448_v47, 9  ;;  %v3903_v9 = vor.u32 %v3902_v39, %v7854_v56  ;;  %v6349_v39 = vld [vmem:[%s6616_s4 + $0xc] sm:$0xff]  }
 0x115   : > { %5918 = vmatmul.mubr.msk.bf16.gmra.mrb[8].mxu0 %vm667_vm5, %v7675_v34  ;;  %v7892_v34 = vsel %vm6890_vm8, %v5463_v15, %v4377_v17  ;;  %v7898_v12 = vsel %vm6890_vm8, %v4372_v61, %v4373_v35  ;;  %v4384_v59 = vrot.slane %v8435_v53, 5  ;;  %v4387_v23 = vrot.slane %v8436_v43, 5  ;;  %v5450_v35 = vld [vmem:[%s6616_s4 + $0x78] sm:$0xe] }
 0x116   : > { %5764 = vmatmul.mubr.msk.bf16.gmra.mrb[24].mxu1 %vm667_vm5, %v8434_v5  ;;  %5921 = vmatprep.mubr.msk.bf16.mxu0 %vm667_vm5, %v5416_v26  ;;  %v5479_v8 = vcombine.low %v7879_v41, %v7898_v12  ;;  %v7909_v58 = vsel %vm6890_vm8, %v4379_v20, %v4380_v21  ;;  %v5465_v14 = vrot.slane %v5449_v32, 9  ;;  %v4391_v1 = vrot.slane %v8437_v2, 5 }
 0x117   : > { %5767 = vmatprep.mubr.msk.bf16.mxu1 %vm667_vm5, %v5067_v38  ;;  %v5403_v38 = vld [vmem:[%s6616_s4 + $0xc0] sm:$0xf]  ;;  %v5480_v50 = vcombine.low %v7892_v34, %v7909_v58  ;;  %v7917_v26 = vsel %vm6890_vm8, %v5464_v0, %v4384_v59  ;;  %v4386_v63 = vrot.slane %v4384_v59, 4  ;;  %v4394_v46 = vrot.slane %v7710_v30, 5  ;;  %v6412_v58 = vld [vmem:[%s6616_s4 + $0x8c] sm:$0x1] }
 0x118   : > { %v7920_v4 = vcombine.low %v3875_v18, %v3885_v24  ;;  %v3924_v62 = vshrl.u32 %v7857_v51, 16  ;;  %v7928_v42 = vsel %vm6890_vm8, %v5465_v14, %v4391_v1  ;;  %v4393_v19 = vrot.slane %v4391_v1, 4  ;;  %v5406_v1 = vld [vmem:[%s6616_s4 + $0xcc] sm:$0xf] }
 0x119   : > { %v7931_v13 = vrot.slane %v3914_v36, 5  ;;  %v7933_v10 = vrot.slane %v3920_v45, 5  ;;  %v3930_v30 = vshll.u32 %v7903_v6, 16  ;;  %v7938_v18 = vsel %vm6890_vm8, %v4386_v63, %v4387_v23  ;;  %v5177_v45 = vld [vmem:[%s6616_s4 + $0x78] sm:$0xf] }
 0x11a   : > { %v3899_v15 = vsel %vm6660_vm4, %v7888_v33, %v7854_v56  ;;  %v3935_v47 = vshrl.u32 %v5403_v38, 16  ;;  %v5481_v24 = vcombine.low %v7917_v26, %v7938_v18  ;;  %v7949_v36 = vsel %vm6890_vm8, %v4393_v19, %v4394_v46  ;;  %v8441_v46 = vld [vmem:[#allocation19_spill] sm:$0xff]  ;;  %v6350_v19 = vld [vmem:[%s6616_s4 + $0x18] sm:$0xff]  }
 0x11b   : > { %v3904_v17 = vrot.slane %v3903_v9, 4  ;;  %v3938_v61 = vshll.u32 %v5403_v38, 16  ;;  %v3944_v21 = vshll.u32 %v7924_v25, 16  ;;  %v5482_v32 = vcombine.low %v7928_v42, %v7949_v36  ;;  %v6415_v36 = vld [vmem:[%s6616_s4 + $0xac] sm:$0xf] }
 0x11c   : > { %v3926_v5 = vrot.slane %v3924_v62, 4  ;;  %v5466_v20 = vrot.slane %v5450_v35, 9  ;;  %v4401_v9 = vrot.slane %v7727_v16, 5  ;;  %v3948_v53 = vshrl.u32 %v7924_v25, 16 }
 0x11d   : > { %5922 = vmatmul.mubr.msk.bf16.gmra.mrb[12].mxu0 %vm667_vm5, %v7843_v37  ;;  %v8438_v37 = vld [vmem:[#allocation18_spill] sm:$0xff]  ;;  %v2257_v59 = vshrl.u32 %v5177_v45, 16  ;;  %v2260_v44 = vshll.u32 %v5177_v45, 16  ;;  %v5467_v16 = vrot.slane %v5451_v52, 9  ;;  %v3940_v2 = vrot.slane %v3938_v61, 5 }
 0x11e   : > { %5768 = vmatmul.mubr.msk.bf16.gmra.mrb[28].mxu1 %vm667_vm5, %v5068_v54  ;;  %5925 = vmatprep.mubr.msk.bf16.mxu0 %vm667_vm5, %v7846_v27  ;;  %v4398_v0 = vrot.slane %v8438_v37, 5  ;;  %v8440_v54 = vld [vmem:[#allocation10_spill] sm:$0xff]  ;;  %v3937_v27 = vrot.slane %v3935_v47, 4  ;;  %v4405_v62 = vrot.slane %v8441_v46, 5  ;;  %v7981_v35 = vrot.slane %v3944_v21, 5 }
 0x11f   : > { %5773 = vmatprep.mubr.msk.bf16.mxu1 %vm667_vm5, %v6349_v39  ;;  %v2279_v43 = vsel %vm6660_vm4, %v8440_v54, %v8439_v49  ;;  %v2259_v38 = vrot.slane %v2257_v59, 4  ;;  %v2262_v63 = vrot.slane %v2260_v44, 5  ;;  %v3917_v39 = vor.u32 %v7931_v13, %v7875_v57  ;;  %v7984_v47 = vld [vmem:[%s6616_s4 + $0xd0] sm:$0xf]  ;;  %v6351_v52 = vld [vmem:[%s6616_s4 + $0x24] sm:$0xff]  }
 0x120   : > { %v7974_v23 = vsel %vm6890_vm8, %v5466_v20, %v4398_v0  ;;  %v4400_v14 = vrot.slane %v4398_v0, 4  ;;  %v4408_v61 = vrot.slane %v7737_v3, 5  ;;  %v3909_v20 = vsel %vm6660_vm4, %v3904_v17, %v7869_v29  ;;  %v5452_v13 = vld [vmem:[%s6616_s4 + $0x90] sm:$0xe]  ;;  %v8000_v59 = vld [vmem:[%s6616_s4 + $0xc8] sm:$0x1] }
 0x121   : > { %v3950_v37 = vrot.slane %v3948_v53, 4  ;;  %v2263_v57 = vor.u32 %v2262_v63, %v2259_v38  ;;  %v3927_v21 = vor.u32 %v3926_v5, %v7933_v10  ;;  %v3959_v44 = vshrl.u32 %v5406_v1, 16  ;;  %v8444_v38 = vld [vmem:[#allocation8_spill] sm:$0xff] }
 0x122   : > { %v7988_v45 = vsel %vm6890_vm8, %v4400_v14, %v4401_v9  ;;  %v8004_v9 = vsel %vm6890_vm8, %v5467_v16, %v4405_v62  ;;  %v4407_v3 = vrot.slane %v4405_v62, 4  ;;  %v3941_v29 = vor.u32 %v3940_v2, %v3937_v27  ;;  %v8443_v16 = vld [vmem:[#allocation7_spill] sm:$0xff] }
 0x123   : > { %v5483_v0 = vcombine.low %v7974_v23, %v7988_v45  ;;  %v3962_v17 = vshll.u32 %v5406_v1, 16  ;;  %v3968_v53 = vshll.u32 %v7984_v47, 16  ;;  %v2264_v49 = vrot.slane %v2263_v57, 4  ;;  %v8038_v57 = vld [vmem:[%s6616_s4 + $0xd4] sm:$0x1] }
 0x124   : > { %v3972_v5 = vshrl.u32 %v7984_v47, 16  ;;  %v8015_v54 = vsel %vm6890_vm8, %v4407_v3, %v4408_v61  ;;  %v5468_v14 = vrot.slane %v5452_v13, 9  ;;  %v3951_v2 = vor.u32 %v3950_v37, %v7981_v35  ;;  %v6416_v45 = vld [vmem:[%s6616_s4 + $0xb8] sm:$0xf] }
 0x125   : > { %5926 = vmatmul.mubr.msk.bf16.gmra.mrb[16].mxu0 %vm667_vm5, %v7850_v7  ;;  %v8442_v7 = vld [vmem:[#allocation20_spill] sm:$0xff]  ;;  %v3954_v1 = vshll.u32 %v8000_v59, 16  ;;  %v5484_v63 = vcombine.low %v8004_v9, %v8015_v54  ;;  %v5422_v46 = vcombine.low %v3899_v15, %v3909_v20  ;;  %v3918_v62 = vrot.slane %v3917_v39, 4 }
 0x126   : > { %5774 = vmatmul.mubr.msk.bf16.vlgmr.msra.gmra.mrb[0].mxu1 %vm667_vm5, %v6350_v19  ;;  %5929 = vmatprep.mubr.msk.bf16.mxu0 %vm667_vm5, %v7852_v55  ;;  %v4412_v27 = vrot.slane %v8442_v7, 5  ;;  %v2269_v55 = vsel %vm6660_vm4, %v2264_v49, %v8444_v38  ;;  %v3932_v19 = vrot.slane %v3930_v30, 5  ;;  %v3928_v37 = vrot.slane %v3927_v21, 4  ;;  %v5453_v20 = vld [vmem:[%s6616_s4 + $0x9c] sm:$0xe] }
 0x127   : > { %5976 = vmatpush3.bf16.msra.mxu1 %v8443_v16  ;;  %5777 = vmatprep.mubr.msk.bf16.mxu1 %vm667_vm5, %v6351_v52  ;;  %v8034_v61 = vcombine.low %v2269_v55, %v2279_v43  ;;  %v6352_v52 = vld [vmem:[%s6616_s4 + $0x30] sm:$0xff]   ;;  %v4415_v49 = vrot.slane %v7748_v11, 5  ;;  %v3961_v56 = vrot.slane %v3959_v44, 4  ;;  %v3964_v33 = vrot.slane %v3962_v17, 5  ;;  %v6353_v30 = vld [vmem:[%s6616_s4 + $0x3c] sm:$0xff]  }
 0x128   : > { %v8042_v13 = vsel %vm6890_vm8, %v5468_v14, %v4412_v27  ;;  %v4414_v3 = vrot.slane %v4412_v27, 4  ;;  %v8045_v15 = vrot.slane %v3968_v53, 5  ;;  %v3974_v39 = vrot.slane %v3972_v5, 4  ;;  %v6402_v38 = vld [vmem:[%s6616_s4 + $0x1c] sm:$0xf] }
 0x129   : > { %v3942_v43 = vrot.slane %v3941_v29, 4  ;;  %v3952_v7 = vrot.slane %v3951_v2, 4  ;;  %v3956_v21 = vrot.slane %v3954_v1, 5  ;;  %v3923_v11 = vsel %vm6660_vm4, %v3918_v62, %v7933_v10  ;;  %v5454_v62 = vld [vmem:[%s6616_s4 + $0xa8] sm:$0xe] }
 0x12a   : > { %v8051_v16 = vsel %vm6890_vm8, %v4414_v3, %v4415_v49  ;;  %v3933_v44 = vsel %vm6660_vm4, %v3928_v37, %v3932_v19  ;;  %v3978_v29 = vshll.u32 %v8038_v57, 16  ;;  %v5469_v17 = vrot.slane %v5453_v20, 9  ;;  %v6354_v37 = vld [vmem:[%s6616_s4 + $0x48] sm:$0xff]   ;;  %v6403_v20 = vld [vmem:[%s6616_s4 + $0x20] sm:$0x1] }
 0x12b   : > { %v5485_v14 = vcombine.low %v8042_v13, %v8051_v16  ;;  %v3965_v53 = vor.u32 %v3964_v33, %v3961_v56  ;;  %v3975_v5 = vor.u32 %v3974_v39, %v8045_v15  ;;  %v4419_v27 = vrot.slane %v7744_v48, 5  ;;  %v6355_v33 = vld [vmem:[%s6616_s4 + $0x54] sm:$0xff]  }
 0x12c   : > { %v4422_v10 = vrot.slane %v7776_v28, 5  ;;  %v3947_v2 = vsel %vm6660_vm4, %v3942_v43, %v7981_v35  ;;  %v3957_v1 = vsel %vm6660_vm4, %v3952_v7, %v3956_v21  ;;  %v4342_v55 = vrot.slane %v6402_v38, 5  ;;  %v5444_v38 = vld [vmem:[%s6616_s4 + $0x30] sm:$0xe] }
 0x12d   : > { %5930 = vmatmul.mubr.msk.bf16.gmra.mrb[20].mxu0 %vm667_vm5, %v7920_v4  ;;  %v5442_v4 = vld [vmem:[%s6616_s4 + $0x18] sm:$0xe]  ;;  %v4421_v48 = vrot.slane %v4419_v27, 4  ;;  %v5423_v28 = vcombine.low %v3923_v11, %v3933_v44  ;;  %v3980_v19 = vrot.slane %v3978_v29, 5  ;;  %v5424_v3 = vcombine.low %v3947_v2, %v3957_v1  ;;  %v5443_v11 = vld [vmem:[%s6616_s4 + $0x24] sm:$0xe] }
 0x12e   : > { %5778 = vmatmul.mubr.msk.bf16.gmra.mrb[4].mxu1 %vm667_vm5, %v6352_v52  ;;  %5933 = vmatprep.mubr.msk.bf16.mxu0 %vm667_vm5, %v5422_v46  ;;  %v8078_v46 = vsel %vm6890_vm8, %v5469_v17, %v4419_v27  ;;  %v5458_v52 = vrot.slane %v5442_v4, 9  ;;  %v3966_v35 = vrot.slane %v3965_v53, 4  ;;  %v3976_v49 = vrot.slane %v3975_v5, 4  ;;  %v6404_v44 = vld [vmem:[%s6616_s4 + $0x28] sm:$0xf] }
 0x12f   : > { %5781 = vmatprep.mubr.msk.bf16.mxu1 %vm667_vm5, %v6353_v30  ;;  %v8084_v56 = vsel %vm6890_vm8, %v4421_v48, %v4422_v10  ;;  %v4344_v39 = vrot.slane %v4342_v55, 4  ;;  %v4345_v30 = vrot.slane %v6403_v20, 5  ;;  %v5470_v7 = vrot.slane %v5454_v62, 9  ;;  %v6405_v10 = vld [vmem:[%s6616_s4 + $0x34] sm:$0xf] }
 0x130   : > { %v5486_v43 = vcombine.low %v8078_v46, %v8084_v56  ;;  %v4426_v21 = vrot.slane %v7783_v60, 5  ;;  %v4349_v29 = vrot.slane %v6404_v44, 5  ;;  %v4429_v17 = vrot.slane %v7817_v40, 5  ;;  %v5455_v2 = vld [vmem:[%s6616_s4 + $0xb4] sm:$0xe] }
 0x131   : > { %v3971_v53 = vsel %vm6660_vm4, %v3966_v35, %v8045_v15  ;;  %v3981_v60 = vsel %vm6660_vm4, %v3976_v49, %v3980_v19  ;;  %v4343_v40 = vsel %vm6890_vm8, %v5458_v52, %v4342_v55  ;;  %v4346_v27 = vsel %vm6890_vm8, %v4344_v39, %v4345_v30  ;;  %v6406_v19 = vld [vmem:[%s6616_s4 + $0x2c] sm:$0x1]  ;;  %v6356_v52 = vld [vmem:[%s6616_s4 + $0x60] sm:$0xff]   ;;  %v6420_v46 = vld [vmem:[%s6616_s4 + $0xc8] sm:$0x1] }
 0x132   : > { %v8104_v5 = vsel %vm6890_vm8, %v5470_v7, %v4426_v21  ;;  %v4428_v4 = vrot.slane %v4426_v21, 4  ;;  %v4356_v15 = vrot.slane %v6405_v10, 5  ;;  %v5459_v1 = vrot.slane %v5443_v11, 9  ;;  %v6357_v39 = vld [vmem:[%s6616_s4 + $0x6c] sm:$0xff]   ;;  %v8446_v11 = vld [vmem:[#allocation12_spill] sm:$0xff] }
 0x133   : > { %v5425_v62 = vcombine.low %v3971_v53, %v3981_v60  ;;  %v5471_v35 = vrot.slane %v5455_v2, 9  ;;  %v4433_v49 = vrot.slane %v7857_v51, 5  ;;  %v5460_v20 = vrot.slane %v5444_v38, 9  ;;  %v8445_v7 = vld [vmem:[#allocation11_spill] sm:$0xff]  ;;  %v5456_v60 = vld [vmem:[%s6616_s4 + $0xc0] sm:$0xe] }
 0x134   : > { %v8116_v48 = vsel %vm6890_vm8, %v4428_v4, %v4429_v17  ;;  %v4358_v30 = vrot.slane %v4356_v15, 4  ;;  %v4359_v21 = vrot.slane %v8445_v7, 5  ;;  %v4363_v44 = vrot.slane %v8446_v11, 5  ;;  %v5445_v4 = vld [vmem:[%s6616_s4 + $0x3c] sm:$0xe] }
 0x135   : > { %5934 = vmatmul.mubr.msk.bf16.gmra.mrb[24].mxu0 %vm667_vm5, %v5423_v28  ;;  %v4351_v28 = vrot.slane %v4349_v29, 4  ;;  %v5487_v55 = vcombine.low %v8104_v5, %v8116_v48  ;;  %v8129_v17 = vsel %vm6890_vm8, %v5471_v35, %v4433_v49  ;;  %v4435_v53 = vrot.slane %v4433_v49, 4  ;;  %v5174_v35 = vld [vmem:[%s6616_s4 + $0x6c] sm:$0xf]  ;;  %v6407_v11 = vld [vmem:[%s6616_s4 + $0x70] sm:$0xf] }
 0x136   : > { %5782 = vmatmul.mubr.msk.bf16.gmra.mrb[8].mxu1 %vm667_vm5, %v6354_v37  ;;  %5937 = vmatprep.mubr.msk.bf16.mxu0 %vm667_vm5, %v5424_v3  ;;  %v4352_v37 = vrot.slane %v6406_v19, 5  ;;  %v5475_v3 = vcombine.low %v4343_v40, %v4346_v27  ;;  %v4350_v51 = vsel %vm6890_vm8, %v5459_v1, %v4349_v29  ;;  %v4357_v27 = vsel %vm6890_vm8, %v5460_v20, %v4356_v15  ;;  %v5457_v20 = vld [vmem:[%s6616_s4 + $0xcc] sm:$0xe] }
 0x137   : > { %5785 = vmatprep.mubr.msk.bf16.mxu1 %vm667_vm5, %v6355_v33  ;;  %v4436_v33 = vrot.slane %v7903_v6, 5  ;;  %v4360_v10 = vsel %vm6890_vm8, %v4358_v30, %v4359_v21  ;;  %v5472_v2 = vrot.slane %v5456_v60, 9  ;;  %v5461_v1 = vrot.slane %v5445_v4, 9 }
 0x138   : > { %v4353_v6 = vsel %vm6890_vm8, %v4351_v28, %v4352_v37  ;;  %v4365_v38 = vrot.slane %v4363_v44, 4  ;;  %v4440_v19 = vrot.slane %v7924_v25, 5  ;;  %v5477_v15 = vcombine.low %v4357_v27, %v4360_v10 }
 0x139   : > { %v8142_v40 = vsel %vm6890_vm8, %v4435_v53, %v4436_v33  ;;  %v5476_v37 = vcombine.low %v4350_v51, %v4353_v6  ;;  %v4364_v30 = vsel %vm6890_vm8, %v5461_v1, %v4363_v44  ;;  %v2236_v21 = vshll.u32 %v5174_v35, 16 }
 0x13a   : > { %v5488_v29 = vcombine.low %v8129_v17, %v8142_v40  ;;  %v8158_v49 = vsel %vm6890_vm8, %v5472_v2, %v4440_v19  ;;  %v4442_v33 = vrot.slane %v4440_v19, 4  ;;  %v2242_v53 = vshll.u32 %v6407_v11, 16 }
 0x13b   : > { %v2246_v44 = vshrl.u32 %v6407_v11, 16  ;;  %v5473_v4 = vrot.slane %v5457_v20, 9  ;;  %v4447_v51 = vrot.slane %v7984_v47, 5  ;;  %v4450_v6 = vrot.slane %v8038_v57, 5  ;;  %v5180_v57 = vld [vmem:[%s6616_s4 + $0x84] sm:$0xf] }
 0x13c   : > { %v6409_v20 = vld [vmem:[%s6616_s4 + $0x88] sm:$0xf]  ;;  %v2420_v56 = vshll.u32 %v6420_v46, 16 }
 0x13d   : > { %5938 = vmatmul.mubr.msk.bf16.gmra.mrb[28].mxu0 %vm667_vm5, %v5425_v62  ;;  %v8447_v62 = vld [vmem:[#allocation13_spill] sm:$0xff]  ;;  %v8181_v27 = vsel %vm6890_vm8, %v5473_v4, %v4447_v51  ;;  %v4449_v10 = vrot.slane %v4447_v51, 4  ;;  %v2248_v19 = vrot.slane %v2246_v44, 4  ;;  %v5186_v44 = vld [vmem:[%s6616_s4 + $0x9c] sm:$0xf]  ;;  %v6363_v4 = vld [vmem:[%s6616_s4 + $0xb4] sm:$0xff]  }
 0x13e   : > { %5786 = vmatmul.mubr.msk.bf16.gmra.mrb[12].mxu1 %vm667_vm5, %v6356_v52  ;;  %5943 = vmatprep.mubr.msk.bf16.mxu0 %vm667_vm5, %v5475_v3  ;;  %v4366_v28 = vrot.slane %v8447_v62, 5  ;;  %v4443_v52 = vrot.slane %v8000_v59, 5  ;;  %v6358_v3 = vld [vmem:[%s6616_s4 + $0x78] sm:$0xff]   ;;  %v2233_v59 = vshrl.u32 %v5174_v35, 16  ;;  %v2238_v62 = vrot.slane %v2236_v21, 5  ;;  %v6362_v21 = vld [vmem:[%s6616_s4 + $0xa8] sm:$0xff]  }
 0x13f   : > { %5789 = vmatprep.mubr.msk.bf16.mxu1 %vm667_vm5, %v6357_v39  ;;  %v6359_v39 = vld [vmem:[%s6616_s4 + $0x84] sm:$0xff]   ;;  %v8186_v47 = vsel %vm6890_vm8, %v4449_v10, %v4450_v6 }
 0x140   : > { %v4367_v25 = vsel %vm6890_vm8, %v4365_v38, %v4366_v28  ;;  %v8168_v7 = vsel %vm6890_vm8, %v4442_v33, %v4443_v52  ;;  %v2235_v1 = vrot.slane %v2233_v59, 4  ;;  %v6360_v38 = vld [vmem:[%s6616_s4 + $0x90] sm:$0xff]   ;;  %v2244_v28 = vrot.slane %v2242_v53, 5 }
 0x141   : > { %v5489_v60 = vcombine.low %v8158_v49, %v8168_v7  ;;  %v5478_v2 = vcombine.low %v4364_v30, %v4367_v25  ;;  %v5490_v52 = vcombine.low %v8181_v27, %v8186_v47  ;;  %v2281_v33 = vshrl.u32 %v5180_v57, 16  ;;  %v5183_v59 = vld [vmem:[%s6616_s4 + $0x90] sm:$0xf] }
 0x142   : > { %v2239_v22 = vor.u32 %v2238_v62, %v2235_v1  ;;  %v2249_v35 = vor.u32 %v2248_v19, %v2244_v28  ;;  %v2290_v30 = vshll.u32 %v6409_v20, 16  ;;  %v2294_v25 = vshrl.u32 %v6409_v20, 16  ;;  %v6410_v1 = vld [vmem:[%s6616_s4 + $0x94] sm:$0xf] }
 0x143   : > { %v2283_v12 = vrot.slane %v2281_v33, 4  ;;  %v2305_v10 = vshrl.u32 %v5183_v59, 16  ;;  %v2318_v62 = vshrl.u32 %v6410_v1, 16  ;;  %v2329_v19 = vshrl.u32 %v5186_v44, 16 }
 0x144   : > { %v2240_v53 = vrot.slane %v2239_v22, 4  ;;  %v2250_v41 = vrot.slane %v2249_v35, 4  ;;  %v8205_v51 = vrot.slane %v2290_v30, 5  ;;  %v2296_v6 = vrot.slane %v2294_v25, 4 }
 0x145   : > { %5944 = vmatmul.mubr.msk.bf16.vlgmr.msra.gmra.mrb[0].mxu0 %vm667_vm5, %v5476_v37  ;;  %v6361_v37 = vld [vmem:[%s6616_s4 + $0x9c] sm:$0xff]   ;;  %v2331_v20 = vrot.slane %v2329_v19, 4 }
 0x146   : > { %5790 = vmatmul.mubr.msk.bf16.gmra.mrb[16].mxu1 %vm667_vm5, %v6358_v3  ;;  %5947 = vmatprep.mubr.msk.bf16.mxu0 %vm667_vm5, %v5477_v15  ;;  %v6408_v3 = vld [vmem:[%s6616_s4 + $0x74] sm:$0x1]  ;;  %v2245_v22 = vsel %vm6660_vm4, %v2240_v53, %v2244_v28  ;;  %v2297_v33 = vor.u32 %v2296_v6, %v8205_v51 }
 0x147   : > { %5793 = vmatprep.mubr.msk.bf16.mxu1 %vm667_vm5, %v6359_v39  ;;  %v2252_v15 = vshll.u32 %v6408_v3, 16  ;;  %v2284_v39 = vshll.u32 %v5180_v57, 16  ;;  %v6411_v57 = vld [vmem:[%s6616_s4 + $0xa0] sm:$0xf] }
 0x148   : > { %v2338_v3 = vshll.u32 %v6411_v57, 16 }
 0x149   : > { %v2254_v11 = vrot.slane %v2252_v15, 5  ;;  %v2342_v15 = vshrl.u32 %v6411_v57, 16 }
 0x14a   : > { %v8227_v28 = vrot.slane %v2338_v3, 5 }
 0x14b   : > { %v2255_v34 = vsel %vm6660_vm4, %v2250_v41, %v2254_v11  ;;  %v2344_v25 = vrot.slane %v2342_v15, 4  ;;  %v2298_v41 = vrot.slane %v2297_v33, 4 }
 0x14d   : > { %5948 = vmatmul.mubr.msk.bf16.gmra.mrb[4].mxu0 %vm667_vm5, %v5478_v2  ;;  %v2308_v2 = vshll.u32 %v5183_v59, 16  ;;  %v6364_v59 = vld [vmem:[%s6616_s4 + $0xc0] sm:$0xff]  }
 0x14e   : > { %5794 = vmatmul.mubr.msk.bf16.gmra.mrb[20].mxu1 %vm667_vm5, %v6360_v38  ;;  %5951 = vmatprep.mubr.msk.bf16.mxu0 %vm667_vm5, %v5479_v8  ;;  %v2286_v8 = vrot.slane %v2284_v39, 5  ;;  %v2314_v38 = vshll.u32 %v6410_v1, 16  ;;  %v2307_v39 = vrot.slane %v2305_v10, 4  ;;  %v6414_v1 = vld [vmem:[%s6616_s4 + $0xa4] sm:$0x1] }
 0x14f   : > { %5797 = vmatprep.mubr.msk.bf16.mxu1 %vm667_vm5, %v6361_v37  ;;  %v2332_v37 = vshll.u32 %v5186_v44, 16  ;;  %v2310_v26 = vrot.slane %v2308_v2, 5  ;;  %v2345_v2 = vor.u32 %v2344_v25, %v8227_v28 }
 0x150   : > { %v2287_v35 = vor.u32 %v2286_v8, %v2283_v12  ;;  %v8225_v18 = vrot.slane %v2314_v38, 5  ;;  %v6413_v8 = vld [vmem:[%s6616_s4 + $0x98] sm:$0x1]  ;;  %v2348_v38 = vshll.u32 %v6414_v1, 16 }
 0x151   : > { %v2334_v30 = vrot.slane %v2332_v37, 5  ;;  %v2311_v12 = vor.u32 %v2310_v26, %v2307_v39  ;;  %v2324_v44 = vshll.u32 %v6413_v8, 16  ;;  %v2366_v37 = vshrl.u32 %v6415_v36, 16 }
 0x152   : > { %v2288_v53 = vrot.slane %v2287_v35, 4  ;;  %v2346_v33 = vrot.slane %v2345_v2, 4  ;;  %v2350_v39 = vrot.slane %v2348_v38, 5  ;;  %v6419_v38 = vld [vmem:[%s6616_s4 + $0xbc] sm:$0x1] }
 0x153   : > { %v2335_v10 = vor.u32 %v2334_v30, %v2331_v20  ;;  %v2312_v15 = vrot.slane %v2311_v12, 4  ;;  %v2368_v30 = vrot.slane %v2366_v37, 4  ;;  %v2396_v13 = vshll.u32 %v6419_v38, 16 }
 0x154   : > { %v2293_v57 = vsel %vm6660_vm4, %v2288_v53, %v8205_v51  ;;  %v5195_v53 = vld [vmem:[%s6616_s4 + $0xc0] sm:$0xf]  ;;  %v2351_v9 = vsel %vm6660_vm4, %v2346_v33, %v2350_v39 }
 0x155   : > { %5952 = vmatmul.mubr.msk.bf16.gmra.mrb[8].mxu0 %vm667_vm5, %v5480_v50  ;;  %v2300_v50 = vshll.u32 %v6412_v58, 16  ;;  %v2390_v58 = vshrl.u32 %v6416_v45, 16  ;;  %v2336_v35 = vrot.slane %v2335_v10, 4 }
 0x156   : > { %5798 = vmatmul.mubr.msk.bf16.gmra.mrb[24].mxu1 %vm667_vm5, %v6362_v21  ;;  %5955 = vmatprep.mubr.msk.bf16.mxu0 %vm667_vm5, %v5481_v24  ;;  %v2320_v24 = vrot.slane %v2318_v62, 4  ;;  %v5207_v21 = vcombine.low %v2245_v22, %v2255_v34  ;;  %v5192_v62 = vld [vmem:[%s6616_s4 + $0xb4] sm:$0xf]  ;;  %v2326_v22 = vrot.slane %v2324_v44, 5 }
 0x157   : > { %5801 = vmatprep.mubr.msk.bf16.mxu1 %vm667_vm5, %v6363_v4  ;;  %v2302_v11 = vrot.slane %v2300_v50, 5  ;;  %v5189_v4 = vld [vmem:[%s6616_s4 + $0xa8] sm:$0xf]  ;;  %v2377_v34 = vshrl.u32 %v5192_v62, 16  ;;  %v2380_v23 = vshll.u32 %v5192_v62, 16  ;;  %v2341_v8 = vsel %vm6660_vm4, %v2336_v35, %v8227_v28 }
 0x158   : > { %v2321_v6 = vor.u32 %v2320_v24, %v8225_v18  ;;  %v2353_v19 = vshrl.u32 %v5189_v4, 16  ;;  %v2356_v42 = vshll.u32 %v5189_v4, 16  ;;  %v2401_v4 = vshrl.u32 %v5195_v53, 16 }
 0x159   : > { %v2303_v3 = vsel %vm6660_vm4, %v2298_v41, %v2302_v11  ;;  %v2379_v25 = vrot.slane %v2377_v34, 4  ;;  %v2392_v11 = vrot.slane %v2390_v58, 4  ;;  %v2317_v41 = vsel %vm6660_vm4, %v2312_v15, %v8225_v18  ;;  %v6417_v18 = vld [vmem:[%s6616_s4 + $0xb0] sm:$0x1] }
 0x15a   : > { %v2322_v50 = vrot.slane %v2321_v6, 4  ;;  %v2355_v26 = vrot.slane %v2353_v19, 4  ;;  %v2358_v24 = vrot.slane %v2356_v42, 5  ;;  %v5209_v51 = vcombine.low %v2293_v57, %v2303_v3  ;;  %v6418_v6 = vld [vmem:[%s6616_s4 + $0xc4] sm:$0xf] }
 0x15b   : > { %v2372_v44 = vshll.u32 %v6417_v18, 16  ;;  %v2404_v28 = vshll.u32 %v5195_v53, 16  ;;  %v2410_v10 = vshll.u32 %v6418_v6, 16  ;;  %v2414_v2 = vshrl.u32 %v6418_v6, 16 }
 0x15c   : > { %v2327_v12 = vsel %vm6660_vm4, %v2322_v50, %v2326_v22  ;;  %v2359_v54 = vor.u32 %v2358_v24, %v2355_v26  ;;  %v2398_v22 = vrot.slane %v2396_v13, 5  ;;  %v2422_v35 = vrot.slane %v2420_v56, 5 }
 0x15d   : > { %5956 = vmatmul.mubr.msk.bf16.gmra.mrb[12].mxu0 %vm667_vm5, %v5482_v32  ;;  %v2362_v32 = vshll.u32 %v6415_v36, 16  ;;  %v5210_v16 = vcombine.low %v2317_v41, %v2327_v12  ;;  %v2374_v42 = vrot.slane %v2372_v44, 5  ;;  %v2403_v36 = vrot.slane %v2401_v4, 4 }
 0x15e   : > { %5802 = vmatmul.mubr.msk.bf16.gmra.mrb[28].mxu1 %vm667_vm5, %v6364_v59  ;;  %5959 = vmatprep.mubr.msk.bf16.mxu0 %vm667_vm5, %v5483_v0  ;;  %v2386_v0 = vshll.u32 %v6416_v45, 16  ;;  %v2382_v59 = vrot.slane %v2380_v23, 5  ;;  %v2360_v62 = vrot.slane %v2359_v54, 4  ;;  %v2412_v37 = vrot.slane %v2410_v10, 5 }
 0x15f   : > { %5823 = vmatprep.mubr.msk.bf16.mxu1 %vm667_vm5, %v5207_v21  ;;  %v2364_v20 = vrot.slane %v2362_v32, 5  ;;  %v2406_v32 = vrot.slane %v2404_v28, 5  ;;  %v2416_v57 = vrot.slane %v2414_v2, 4 }
 0x160   : > { %v2388_v21 = vrot.slane %v2386_v0, 5 }
 0x161   : > { %v2365_v34 = vsel %vm6660_vm4, %v2360_v62, %v2364_v20  ;;  %v2407_v45 = vor.u32 %v2406_v32, %v2403_v36  ;;  %v2417_v0 = vor.u32 %v2416_v57, %v2412_v37 }
 0x162   : > { %v2393_v1 = vor.u32 %v2392_v11, %v2388_v21 }
 0x163   : > { %v2408_v58 = vrot.slane %v2407_v45, 4  ;;  %v2418_v50 = vrot.slane %v2417_v0, 4 }
 0x164   : > { %v2394_v15 = vrot.slane %v2393_v1, 4 }
 0x165   : > { %5960 = vmatmul.mubr.msk.bf16.gmra.mrb[16].mxu0 %vm667_vm5, %v5484_v63  ;;  %v2369_v63 = vor.u32 %v2368_v30, %v2364_v20  ;;  %v2413_v33 = vsel %vm6660_vm4, %v2408_v58, %v2412_v37  ;;  %v2423_v39 = vsel %vm6660_vm4, %v2418_v50, %v2422_v35 }
 0x166   : > { %5824 = vmatmul.mubr.msk.bf16.vlgmr.msra.gmra.mrb[16].mxu1 %vm667_vm5, %v8034_v61  ;;  %5963 = vmatprep.mubr.msk.bf16.mxu0 %vm667_vm5, %v5485_v14  ;;  %v2383_v61 = vor.u32 %v2382_v59, %v2379_v25  ;;  %v5211_v14 = vcombine.low %v2341_v8, %v2351_v9  ;;  %v2399_v5 = vsel %vm6660_vm4, %v2394_v15, %v2398_v22 }
 0x167   : > { %5827 = vmatprep.mubr.msk.bf16.mxu1 %vm667_vm5, %v5209_v51  ;;  %v2370_v19 = vrot.slane %v2369_v63, 4  ;;  %v5214_v26 = vcombine.low %v2413_v33, %v2423_v39 }
 0x168   : > { %v2384_v3 = vrot.slane %v2383_v61, 4 }
 0x169   : > { %v2375_v23 = vsel %vm6660_vm4, %v2370_v19, %v2374_v42 }
 0x16a   : > { %v5212_v48 = vcombine.low %v2365_v34, %v2375_v23 }
 0x16d   : > { %5964 = vmatmul.mubr.msk.bf16.gmra.mrb[20].mxu0 %vm667_vm5, %v5486_v43  ;;  %v2389_v43 = vsel %vm6660_vm4, %v2384_v3, %v2388_v21 }
 0x16e   : > { %5828 = vmatmul.mubr.msk.bf16.gmra.mrb[20].mxu1 %vm667_vm5, %v5210_v16  ;;  %5967 = vmatprep.mubr.msk.bf16.mxu0 %vm667_vm5, %v5487_v55  ;;  %v5213_v55 = vcombine.low %v2389_v43, %v2399_v5 }
 0x16f   : > { %5831 = vmatprep.mubr.msk.bf16.mxu1 %vm667_vm5, %v5211_v14 }
 0x175   : > { %5968 = vmatmul.mubr.msk.bf16.gmra.mrb[24].mxu0 %vm667_vm5, %v5488_v29 }
 0x176   : > { %5832 = vmatmul.mubr.msk.bf16.gmra.mrb[24].mxu1 %vm667_vm5, %v5212_v48  ;;  %5971 = vmatprep.mubr.msk.bf16.mxu0 %vm667_vm5, %v5489_v60 }
 0x177   : > { %5835 = vmatprep.mubr.msk.bf16.mxu1 %vm667_vm5, %v5213_v55 }
 0x17d   : > { %5972 = vmatmul.mubr.msk.bf16.gmra.mrb[28].mxu0 %vm667_vm5, %v5490_v52 }
 0x17e   : > { %5836 = vmatmul.mubr.msk.bf16.gmra.mrb[28].mxu1 %vm667_vm5, %v5214_v26 }
 0x1f9   : > { %v5775_v17 = vpop.f32.mrb[0].mxu1 }
 0x1fa   : > { %v1833_v40 = vpop.f32.mrb[1].mxu1 }
 0x1fb   : > { %v5776_v29 = vpop.f32.mrb[2].mxu1 }
 0x1fc   : > { %v1836_v49 = vpop.f32.mrb[3].mxu1 }
 0x201   : > { %v5779_v7 = vpop.f32.mrb[4].mxu1 }
 0x202   : > { %v1849_v60 = vpop.f32.mrb[5].mxu1 }
 0x203   : > { %v5780_v24 = vpop.f32.mrb[6].mxu1 }
 0x204   : > { %v1852_v20 = vpop.f32.mrb[7].mxu1 }
 0x209   : > { %v5783_v30 = vpop.f32.mrb[8].mxu1 }
 0x20a   : > { %v1865_v51 = vpop.f32.mrb[9].mxu1 }
 0x20b   : > { %v5784_v31 = vpop.f32.mrb[10].mxu1 }
 0x20c   : > { %v1868_v25 = vpop.f32.mrb[11].mxu1 }
 0x211   : > { %v5787_v59 = vpop.f32.mrb[12].mxu1 }
 0x212   : > { %v1881_v21 = vpop.f32.mrb[13].mxu1 }
 0x213   : > { %v5788_v11 = vpop.f32.mrb[14].mxu1 }
 0x214   : > { %v1884_v27 = vpop.f32.mrb[15].mxu1 }
 0x218   : > { %v5945_v47 = vpop.f32.mrb[0].mxu0 }
 0x219   : > { %v5977_v52 = vadd.f32 %v5945_v47, %v5775_v17  ;;  %v4587_v53 = vpop.f32.mrb[1].mxu0 }
 0x21a   : > { %v5946_v41 = vpop.f32.mrb[2].mxu0  ;;  %v5978_v12 = vadd.f32 %v4587_v53, %v1833_v40 }
 0x21b   : > { %v5979_v8 = vadd.f32 %v5946_v41, %v5776_v29  ;;  %v4590_v9 = vpop.f32.mrb[3].mxu0 }
 0x21c   : > { %v5980_v54 = vadd.f32 %v4590_v9, %v1836_v49  ;;  %4746 = vxpose.xlu0.b32.start [1/16] (narrow) %v5978_v12, 8 }
 0x220   : > { %v5949_v63 = vpop.f32.mrb[4].mxu0  ;;  %4747 = vxpose.xlu0.b32.cont [2/16] (narrow) %v5980_v54, 8 }
 0x221   : > { %v5981_v18 = vadd.f32 %v5949_v63, %v5779_v7  ;;  %v4603_v44 = vpop.f32.mrb[5].mxu0 }
 0x222   : > { %v5982_v4 = vadd.f32 %v4603_v44, %v1849_v60  ;;  %v5950_v28 = vpop.f32.mrb[6].mxu0 }
 0x223   : > { %v5983_v6 = vadd.f32 %v5950_v28, %v5780_v24  ;;  %v4606_v10 = vpop.f32.mrb[7].mxu0 }
 0x224   : > { %v5984_v2 = vadd.f32 %v4606_v10, %v1852_v20  ;;  %4748 = vxpose.xlu0.b32.cont [3/16] (narrow) %v5977_v52, 8 }
 0x228   : > { %v5953_v61 = vpop.f32.mrb[8].mxu0  ;;  %4749 = vxpose.xlu0.b32.cont [4/16] (narrow) %v5979_v8, 8 }
 0x229   : > { %v5985_v1 = vadd.f32 %v5953_v61, %v5783_v30  ;;  %v4619_v38 = vpop.f32.mrb[9].mxu0 }
 0x22a   : > { %v5986_v13 = vadd.f32 %v4619_v38, %v1865_v51  ;;  %v5954_v16 = vpop.f32.mrb[10].mxu0 }
 0x22b   : > { %v5987_v14 = vadd.f32 %v5954_v16, %v5784_v31  ;;  %v4622_v62 = vpop.f32.mrb[11].mxu0 }
 0x22c   : > { %v5988_v19 = vadd.f32 %v4622_v62, %v1868_v25  ;;  %4750 = vxpose.xlu0.b32.cont [5/16] (narrow) %v5982_v4, 8  ;;  %v4813_v62 = vld [vmem:[#allocation2] sm:$0xff] (!%p5507_p0) }
 0x230   : > { %v5957_v42 = vpop.f32.mrb[12].mxu0  ;;  %4751 = vxpose.xlu0.b32.cont [6/16] (narrow) %v5984_v2, 8 }
 0x231   : > { %v8316_v36 = vadd.f32 %v5957_v42, %v5787_v59  ;;  %v4635_v32 = vpop.f32.mrb[13].mxu0 }
 0x232   : > { %v5990_v37 = vadd.f32 %v4635_v32, %v1881_v21  ;;  %v5958_v57 = vpop.f32.mrb[14].mxu0 }
 0x233   : > { %v8318_v3 = vadd.f32 %v5958_v57, %v5788_v11  ;;  %v4638_v15 = vpop.f32.mrb[15].mxu0 }
 0x234   : > { %v5992_v22 = vadd.f32 %v4638_v15, %v1884_v27  ;;  %4752 = vxpose.xlu0.b32.cont [7/16] (narrow) %v5981_v18, 8 }
 0x238   : > { %v5961_v34 = vpop.f32.mrb[16].mxu0  ;;  %4753 = vxpose.xlu0.b32.cont [8/16] (narrow) %v5983_v6, 8 }
 0x239   : > { %v5825_v23 = vpop.f32.mrb[16].mxu1  ;;  %v4651_v45 = vpop.f32.mrb[17].mxu0 }
 0x23a   : > { %v5993_v0 = vadd.f32 %v5961_v34, %v5825_v23  ;;  %v2623_v46 = vpop.f32.mrb[17].mxu1  ;;  %v5962_v56 = vpop.f32.mrb[18].mxu0 }
 0x23b   : > { %v5826_v43 = vpop.f32.mrb[18].mxu1  ;;  %v4654_v5 = vpop.f32.mrb[19].mxu0  ;;  %v5994_v48 = vadd.f32 %v4651_v45, %v2623_v46 }
 0x23c   : > { %v5995_v55 = vadd.f32 %v5962_v56, %v5826_v43  ;;  %v2626_v58 = vpop.f32.mrb[19].mxu1  ;;  %4754 = vxpose.xlu0.b32.cont [9/16] (narrow) %v5986_v13, 8 }
 0x23d   : > { %v5996_v50 = vadd.f32 %v4654_v5, %v2626_v58  ;;  %4778 = vxpose.xlu1.b32.start [1/16] (narrow) %v5994_v48, 8 }
 0x240   : > { %v5965_v35 = vpop.f32.mrb[20].mxu0  ;;  %4755 = vxpose.xlu0.b32.cont [10/16] (narrow) %v5988_v19, 8 }
 0x241   : > { %4779 = vxpose.xlu1.b32.cont [2/16] (narrow) %v5996_v50, 8  ;;  %v5829_v33 = vpop.f32.mrb[20].mxu1  ;;  %v4667_v39 = vpop.f32.mrb[21].mxu0 }
 0x242   : > { %v5997_v26 = vadd.f32 %v5965_v35, %v5829_v33  ;;  %v2639_v17 = vpop.f32.mrb[21].mxu1  ;;  %v5966_v40 = vpop.f32.mrb[22].mxu0 }
 0x243   : > { %v5998_v29 = vadd.f32 %v4667_v39, %v2639_v17  ;;  %v5830_v49 = vpop.f32.mrb[22].mxu1  ;;  %v4670_v7 = vpop.f32.mrb[23].mxu0 }
 0x244   : > { %v5999_v60 = vadd.f32 %v5966_v40, %v5830_v49  ;;  %v2642_v24 = vpop.f32.mrb[23].mxu1  ;;  %4756 = vxpose.xlu0.b32.cont [11/16] (narrow) %v5985_v1, 8 }
 0x245   : > { %v6000_v20 = vadd.f32 %v4670_v7, %v2642_v24  ;;  %4780 = vxpose.xlu1.b32.cont [3/16] (narrow) %v5993_v0, 8 }
 0x248   : > { %v5969_v30 = vpop.f32.mrb[24].mxu0  ;;  %4757 = vxpose.xlu0.b32.cont [12/16] (narrow) %v5987_v14, 8 }
 0x249   : > { %4781 = vxpose.xlu1.b32.cont [4/16] (narrow) %v5995_v55, 8  ;;  %v5833_v51 = vpop.f32.mrb[24].mxu1  ;;  %v4683_v31 = vpop.f32.mrb[25].mxu0 }
 0x24a   : > { %v6001_v25 = vadd.f32 %v5969_v30, %v5833_v51  ;;  %v2655_v59 = vpop.f32.mrb[25].mxu1  ;;  %v5970_v21 = vpop.f32.mrb[26].mxu0 }
 0x24b   : > { %v6002_v11 = vadd.f32 %v4683_v31, %v2655_v59  ;;  %v5834_v27 = vpop.f32.mrb[26].mxu1  ;;  %v4686_v47 = vpop.f32.mrb[27].mxu0 }
 0x24c   : > { %v6003_v52 = vadd.f32 %v5970_v21, %v5834_v27  ;;  %v2658_v53 = vpop.f32.mrb[27].mxu1  ;;  %4758 = vxpose.xlu0.b32.cont [13/16] (narrow) %v5990_v37, 8 }
 0x24d   : > { %v6004_v41 = vadd.f32 %v4686_v47, %v2658_v53  ;;  %4782 = vxpose.xlu1.b32.cont [5/16] (narrow) %v5998_v29, 8 }
 0x250   : > { %v5973_v12 = vpop.f32.mrb[28].mxu0  ;;  %4759 = vxpose.xlu0.b32.cont [14/16] (narrow) %v5992_v22, 8 }
 0x251   : > { %4783 = vxpose.xlu1.b32.cont [6/16] (narrow) %v6000_v20, 8  ;;  %v5837_v8 = vpop.f32.mrb[28].mxu1  ;;  %v4699_v9 = vpop.f32.mrb[29].mxu0 }
 0x252   : > { %v6005_v54 = vadd.f32 %v5973_v12, %v5837_v8  ;;  %v2671_v63 = vpop.f32.mrb[29].mxu1  ;;  %v5974_v18 = vpop.f32.mrb[30].mxu0 }
 0x253   : > { %v6006_v44 = vadd.f32 %v4699_v9, %v2671_v63  ;;  %v5838_v4 = vpop.f32.mrb[30].mxu1  ;;  %v4702_v28 = vpop.f32.mrb[31].mxu0 }
 0x254   : > { %v6007_v6 = vadd.f32 %v5974_v18, %v5838_v4  ;;  %v2674_v10 = vpop.f32.mrb[31].mxu1  ;;  %4760 = vxpose.xlu0.b32.cont [15/16] (narrow) %v8316_v36, 8  ;;  %v4820_v36 = vld [vmem:[#allocation3] sm:$0xff] (!%p5507_p0) }
 0x255   : > { %v6008_v2 = vadd.f32 %v4702_v28, %v2674_v10  ;;  %4784 = vxpose.xlu1.b32.cont [7/16] (narrow) %v5997_v26, 8 }
 0x258   : > { %4761 = vxpose.xlu0.b32.end [16/16] (narrow) %v8318_v3, 8 }
 0x259   : > { %4785 = vxpose.xlu1.b32.cont [8/16] (narrow) %v5999_v60, 8 }
 0x25d   : > { %4786 = vxpose.xlu1.b32.cont [9/16] (narrow) %v6002_v11, 8 }
 0x261   : > { %4787 = vxpose.xlu1.b32.cont [10/16] (narrow) %v6004_v41, 8 }
 0x265   : > { %4788 = vxpose.xlu1.b32.cont [11/16] (narrow) %v6001_v25, 8 }
 0x269   : > { %4789 = vxpose.xlu1.b32.cont [12/16] (narrow) %v6003_v52, 8 }
 0x26d   : > { %4790 = vxpose.xlu1.b32.cont [13/16] (narrow) %v6006_v44, 8 }
 0x271   : > { %4791 = vxpose.xlu1.b32.cont [14/16] (narrow) %v6008_v2, 8 }
 0x275   : > { %4792 = vxpose.xlu1.b32.cont [15/16] (narrow) %v6005_v54, 8 }
 0x279   : > { %4793 = vxpose.xlu1.b32.end [16/16] (narrow) %v6007_v6, 8 }
 0x29c   : > { %v4762_v61 = vpop.trf.xlu0 }
 0x29d   : > { %v4821_v13 = vmul.f32 (!%p5507_p0), %v4762_v61, %v4762_v61 }
 0x2b7   : > { %4812 = sbr.rel (%p5507_p0) target bundleno = 853 (0x355), region = 36 }
 0x2bd   : > { %v4794_v1 = vpop.trf.xlu1 }
 0x2be   : > { %v4814_v38 = vadd.f32 %v4794_v1, %v4762_v61  ;;  %v4822_v16 = vmul.f32 %v4794_v1, %v4794_v1 }
 0x2c0   : > { %4815 = vadd.xlane.f32.xlu0 %v4814_v38  ;;  %v4823_v14 = vadd.f32 %v4822_v16, %v4821_v13 }
 0x2c4   : > { %4824 = vadd.xlane.f32.xlu0 %v4823_v14 }
 0x34d   : > { %v4816_v19 = vpop.xlane.xlu0 %4815 }
 0x34e   : > { %v4817_v42 = vadd.f32 %v4816_v19, %v4813_v62 }
 0x350   : > { %4819 = vst.msk [vmem:[#allocation2] sm:$0xff] %vm4818_vm9, %v4817_v42 }
 0x351   : > { %v4825_v32 = vpop.xlane.xlu0 %4824 }
 0x352   : > { %v4826_v37 = vadd.f32 %v4825_v32, %v4820_v36 }
 0x354   : > { %4827 = vst.msk [vmem:[#allocation3] sm:$0xff] %vm4818_vm9, %v4826_v37 }
 0x355 PF: > { %p5508_p1 = scmp.ne.s32.totalorder %s6502_s12, 1 }
 0x356   : > { %v6521_v15 = vmov (!%p5508_p1), 0  }
 0x357   : > { %4831 = sbr.rel (%p5508_p1) target bundleno = 1012 (0x3f4), region = 40  ;;  %v4832_v57 = vld [vmem:[#allocation2] sm:$0xff] (!%p5508_p1)  ;;  %6421 = vset.pattern.permute.xlu0 (!%p5508_p1), %v6521_v15 }
 0x358   : > { %v4833_v22 = vmul.f32 (!%p5508_p1), 0.00390625, %v4832_v57 }
 0x35a   : > { %4841 = vperm.xlu0 (!%p5508_p1), %6421, %v4833_v22   ;;  %v4836_v23 = vmul.f32 (!%p5508_p1), %v4833_v22, %v4833_v22 }
 0x35b   : > { %v4834_v3 = vld [vmem:[#allocation3] sm:$0xff] (!%p5508_p1) }
 0x35c   : > { %v4835_v34 = vmul.f32 (!%p5508_p1), 0.00390625, %v4834_v3 }
 0x35e   : > { %v4837_v45 = vsub.f32 %v4835_v34, %v4836_v23 }
 0x360   : > { %v4838_v0 = vmax.f32 %v4837_v45, 0.0 }
 0x362   : > { %v4846_v46 = vadd.f32 1e-05, %v4838_v0 }
 0x364   : > { %6422 = vrsqrt.f32 %v4846_v46 }
 0x36e   : > { %v6423_v56 = vpop.eup %6422 }
 0x36f   : > { %4850 = vperm.xlu0 %6421, %v6423_v56  }
 0x3d9   : > { %v4842_v43 = vpop.permute.xlu0 %4841 }
 0x3da   : > { %v4844_v5 = vsub.f32 %v4762_v61, %v4842_v43  ;;  %v4845_v48 = vsub.f32 %v4794_v1, %v4842_v43 }
 0x3ee   : > { %v4851_v55 = vpop.permute.xlu0 %4850 }
 0x3ef   : > { %v4853_v58 = vmul.f32 %v4851_v55, %v4844_v5  ;;  %v4854_v50 = vmul.f32 %v4851_v55, %v4845_v48 }
 0x3f1   : > { %v4855_v35 = vmax.f32 %v4853_v58, 0.0  ;;  %v4856_v33 = vmax.f32 %v4854_v50, 0.0 }
 0x3f3   : > { %4857 = vst [vmem:[%s6618_s5] sm:$0xff] %v4855_v35  ;;  %4858 = vst [vmem:[%s6618_s5 + $0x8] sm:$0xff] %v4856_v33 }
 0x3f4 PF: > { %s5515_s12 = sshll.u32 %s6506_s13, 8  ;;  %s4877_s30 = sshll.u32 %s6618_s5, 4  ;;  %s4878_s30 = int_to_ptr.vmem [resolvable:$true] %s4877_s30 }
 0x3f5   : > { %s8330_s29 = scalar_lea.hbm %s8382_s2, %s5515_s12  ;;  %s4860_s3 = scalar_lea.sflag [#allocation5], %s157_s26 }
 0x3f6   : > { %s6424_s6 = scalar_lea.vmem %s4878_s30, 256  ;;  %s6522_s7 = smov [#allocation4]  }
 0x3f7   : > { %p6425_p2 = scmp.ne.s32.totalorder %s4878_s30, %s6424_s6  ;;  %s6428_s8 = sshll.u32 %s6522_s7, 4  ;;  %s6429_s8 = int_to_ptr.vmem [resolvable:$false] %s6428_s8 }
 0x3f8   : > { %s6430_s17 = scalar_lea.vmem %s6429_s8, 512  ;;  %p6431_p6 = scmp.lt.s32.totalorder %s4878_s30, %s6429_s8 }
 0x3f9   : > { %p6426_p4 = pnand %p6425_p2, %p6587_p3  ;;  %p6432_p7 = scmp.lt.s32.totalorder %s6430_s17, %s6424_s6 }
 0x3fb   : > { %p6427_p5 = pneg %p6426_p4  ;;  %p6433_p8 = por %p6432_p7, %p6431_p6 }
 0x3fd   : > { %p6434_p10 = pnand %p6433_p8, %p6427_p5 }
 0x3ff   : > { %6437 = shalt.err (!%p6434_p10)
}
 0x400   : > { %s6438_s13 = scalar_lea.hbm %s8330_s29, 256  ;;  %s6442_s18 = scalar_lea.hbm %s8382_s2, 512 }
 0x401   : > { %p6439_p11 = scmp.ne.s32.totalorder %s8330_s29, %s6438_s13  ;;  %p6443_p0 = scmp.lt.u32.totalorder %s8330_s29, %s8382_s2 }
 0x402   : > { %p6444_p1 = scmp.lt.u32.totalorder %s6442_s18, %s6438_s13  ;;  %p6446_p4 = scmp.lt.u32.totalorder %s6438_s13, %s8330_s29 }
 0x403   : > { %p6440_p12 = pnand %p6439_p11, %p6587_p3 }
 0x404   : > { %p6445_p2 = por %p6444_p1, %p6443_p0 }
 0x405   : > { %p6441_p13 = pneg %p6440_p12 }
 0x406   : > { %p6447_p5 = por %p6446_p4, %p6445_p2 }
 0x408   : > { %p6448_p6 = pnand %p6447_p5, %p6441_p13 }
 0x40a   : > { %6451 = shalt.err (!%p6448_p6)
}
 0x40b   : > { %6244 = dma.vmem_to_hbm [thread:$0]  (%p6587_p3), %s4878_s30, 256, %s8330_s29, %s4860_s3  }
 0x40c PF: > { %p6250_p7 = scmp.ge.s32.totalorder %s6518_s16, 2  ;;  %s4889_s27 = sand.u32 1, %s6490_s9  }
 0x40d   : > { %s4890_s12 = scalar_lea.sflag [#allocation5], %s4889_s27 }
 0x40e   : > { %p6247_p8 = pnand %p6250_p7, %p6597_p9 }
 0x410   : > { %6485 = dma.done.wait (!%p6247_p8), %s4890_s12, 256  }
 0x411   : > { %6487 = vsyncadd (!%p6247_p8), %s4890_s12, 4294967040  ;;  %s15_s16 = sadd.s32 1, %s6518_s16   ;;  %s8448_s9 = smov %s6494_s10 }
 0x412   : > { %p12_p10 = scmp.ge.s32.totalorder %s15_s16, 6   ;;  %s8449_s10 = smov %s6498_s11 }
 0x413   : > { %s8450_s11 = smov %s6605_s25  ;;  %s8451_s12 = smov %s6510_s14 }
 0x414   : > { %s8452_s13 = smov %s6514_s15  ;;  %s8453_s14 = smov %s8456_s19 }
 0x415   : > { %s8454_s15 = smov %s8460_s20  ;;  %14 = sbr.rel (!%p12_p10) target bundleno = 5 (0x5), region = 86 }
 0x41c   :  { %4895 = vsyncpa [#allocation5], 1 }
 0x41d   :  { %4897 = vsyncpa [#allocation5 + $0x1], 1 }

</bundles_post_ra>
